<compile_context>
chip_gen: v7x
topology: tpu7x:2x2x1
jax: 0.10.0
libtpu: 0.0.40
codegen_flags: <defaults>
</compile_context>

<pallas_src>
import math

import jax
import jax.numpy as jnp
from jax import lax
from jax.experimental import pallas as pl
from jax.experimental.pallas import tpu as pltpu  # noqa: F401  (kept for TODOs above)

# ---------------- model hyper-parameters (module defaults) ----------------
IN_FEATURES = 6
OUT_FEATURES = 8
NUM_HEADS = 8
HIDDEN_DIM = 64


def _stock_hete_gat_kernel(
    # batched (row-stacked) inputs --------------------------------------------
    gi_ref,                      # (T*BN, 3H) GRU gate pre-activations, bias folded
    pos_ref, neg_ref,            # (BN, BN) block-diagonal adjacencies
    pmean_ref,                   # (BN, BN) block-diag per-graph centering (I - 1/N)
    # GRU recurrent params -----------------------------------------------------
    whh_ref,                     # (H, 3H) gate order r|z|n (fused recurrent matmul)
    bhh_n_ref,                   # (1, H)
    # graph / view params ------------------------------------------------------
    wcat_ref,                    # (H, 5K) = [wgp | wgn | wpp | wpn | wself]
    bself_ref,                   # (1, H)
    wmp_ref, bmp_ref,            # (K, H), (1, H)  bias pre-folded with (bgp+bpp)@wmp
    wmn_ref, bmn_ref,            # (K, H), (1, H)  bias pre-folded with (bgn+bpn)@wmn
    wsem1_ref, bsem1_ref, wsem2_ref,   # (H, H), (1, H), (H, 1)
    wpred_ref, bpred_ref,        # (H, 1), (1, 1)
    # outputs ------------------------------------------------------------------
    pred_ref,                    # (BN, 1)
    beta_ref,                    # (3*BN, 1) = rows [beta0 | beta1 | beta2]
):
    BN = pos_ref.shape[0]
    T = gi_ref.shape[0] // BN
    H = whh_ref.shape[0]
    K = wmp_ref.shape[0]

    # ---- GRU encoder (input projection already done in the wrapper) ---------
    # step 0 (h == 0): the recurrent matmul vanishes.
    gi0 = gi_ref[0:BN, :]
    r = jax.nn.sigmoid(gi0[:, 0:H])
    z = jax.nn.sigmoid(gi0[:, H:2 * H])
    n = jnp.tanh(gi0[:, 2 * H:] + r * bhh_n_ref[...])
    h = (1.0 - z) * n

    def gru_step(t, h):
        lo = pl.multiple_of(t * BN, BN)
        # single fused recurrent matmul on the serial chain (r|z|n)
        gh = jnp.dot(h, whh_ref[...], preferred_element_type=jnp.float32)
        gi = gi_ref[pl.ds(lo, BN), :]          # reload row block from VMEM ref
        r = jax.nn.sigmoid(gi[:, 0:H] + gh[:, 0:H])
        z = jax.nn.sigmoid(gi[:, H:2 * H] + gh[:, H:2 * H])
        n = jnp.tanh(gi[:, 2 * H:] + r * (gh[:, 2 * H:] + bhh_n_ref[...]))
        return (1.0 - z) * n + z * h

    h = lax.fori_loop(1, T, gru_step, h, unroll=True)

    # ---- dual multi-head graph aggregation (block-diagonal over the batch) ---
    pos = pos_ref[...]
    neg = neg_ref[...]
    uw_p = pos * pl.reciprocal(jnp.sum(pos, axis=1, keepdims=True) + 1e-8)
    uw_n = neg * pl.reciprocal(jnp.sum(neg, axis=1, keepdims=True) + 1e-8)

    # five matmuls sharing LHS h fused into one (H, 5K) matmul
    hw = jnp.dot(h, wcat_ref[...], preferred_element_type=jnp.float32)   # (BN, 5K)
    sup_p = hw[:, 0 * K:1 * K]
    sup_n = hw[:, 1 * K:2 * K]
    proj_p = hw[:, 2 * K:3 * K]
    proj_n = hw[:, 3 * K:4 * K]
    self_h = hw[:, 4 * K:5 * K]

    agg_p = jnp.dot(uw_p, sup_p, preferred_element_type=jnp.float32)
    agg_n = jnp.dot(uw_n, sup_n, preferred_element_type=jnp.float32)

    e0 = self_h + bself_ref[...]
    e1 = jnp.dot(agg_p + proj_p, wmp_ref[...],
                 preferred_element_type=jnp.float32) + bmp_ref[...]
    e2 = jnp.dot(agg_n + proj_n, wmn_ref[...],
                 preferred_element_type=jnp.float32) + bmn_ref[...]

    # ---- semantic attention over the 3 views (row-stacked -> 2 matmuls) -----
    est = jnp.concatenate([e0, e1, e2], axis=0)                    # (3BN, H)
    tt = jnp.tanh(jnp.dot(est, wsem1_ref[...],
                          preferred_element_type=jnp.float32) + bsem1_ref[...])
    s = jnp.dot(tt, wsem2_ref[...], preferred_element_type=jnp.float32)   # (3BN, 1)
    s0 = s[0:BN]
    s1 = s[BN:2 * BN]
    s2 = s[2 * BN:3 * BN]
    m = jnp.maximum(jnp.maximum(s0, s1), s2)
    p0 = jnp.exp(s0 - m)
    p1 = jnp.exp(s1 - m)
    p2 = jnp.exp(s2 - m)
    inv_den = pl.reciprocal(p0 + p1 + p2)          # exact: betas are returned
    b0 = p0 * inv_den
    b1 = p1 * inv_den
    b2 = p2 * inv_den
    emb = b0 * e0 + b1 * e1 + b2 * e2                              # (BN, H)

    # ---- PairNorm (mode='PN-SI', scale=1), per-graph column mean -------------
    xc = jnp.dot(pmean_ref[...], emb, preferred_element_type=jnp.float32)
    xn = xc * lax.rsqrt(1e-6 + jnp.sum(xc * xc, axis=1, keepdims=True))

    # ---- predictor: Linear(H, 1) + Tanh ---------------------------------------
    pred_ref[...] = jnp.tanh(
        jnp.dot(xn, wpred_ref[...], preferred_element_type=jnp.float32)
        + bpred_ref[...])

    # betas written as three direct row-block stores (no lane-1 concatenate)
    beta_ref[0:BN, :] = b0
    beta_ref[BN:2 * BN, :] = b1
    beta_ref[2 * BN:3 * BN, :] = b2


def _block_diag(blocks):
    """(B, N, N) -> (B*N, B*N) block-diagonal matrix."""
    B, N, _ = blocks.shape
    eye_b = jnp.eye(B, dtype=blocks.dtype)
    return (eye_b[:, None, :, None] * blocks[:, :, None, :]).reshape(B * N, B * N)


def stock_hete_gat_forward(inputs, pos_adj, neg_adj, params):
    """inputs: (B, N, T, F) or (N, T, F); pos_adj/neg_adj: (B, N, N) or (N, N)."""
    single = inputs.ndim == 3
    if single:
        inputs, pos_adj, neg_adj = inputs[None], pos_adj[None], neg_adj[None]
    B, N, T, F = inputs.shape
    BN = B * N
    H = HIDDEN_DIM

    # time-major + row-stacked over the batch: rows at step t are [t*BN:(t+1)*BN]
    x = jnp.transpose(inputs.astype(jnp.float32), (2, 0, 1, 3)).reshape(T * BN, F)
    pos_adj = pos_adj.astype(jnp.float32)
    neg_adj = neg_adj.astype(jnp.float32)

    # ---- one-time parameter staging (fusion / splitting / bias folding) ------
    wih, whh = params["wih"], params["whh"]
    bih, bhh = params["bih"], params["bhh"]
    bi_fold = jnp.concatenate(
        [bih[:, :H] + bhh[:, :H],
         bih[:, H:2 * H] + bhh[:, H:2 * H],
         bih[:, 2 * H:]], axis=1)
    # GRU input projection hoisted into XLA: one (T*B*N, F) @ (F, 3H) GEMM.
    gi_all = x @ wih + bi_fold                                      # (T*BN, 3H)
    bhh_n = bhh[:, 2 * H:]

    wcat = jnp.concatenate(
        [params["wgp"], params["wgn"], params["wpp"], params["wpn"], params["wself"]],
        axis=1)                                                     # (H, 5K)
    bmp_eff = (params["bgp"] + params["bpp"]) @ params["wmp"] + params["bmp"]
    bmn_eff = (params["bgn"] + params["bpn"]) @ params["wmn"] + params["bmn"]

    # block-diagonal adjacencies + per-graph centering operator for PairNorm
    pos_bd = _block_diag(pos_adj)                                   # (BN, BN)
    neg_bd = _block_diag(neg_adj)                                   # (BN, BN)
    pmean = jnp.kron(jnp.eye(B, dtype=jnp.float32),
                     jnp.eye(N, dtype=jnp.float32)
                     - jnp.full((N, N), 1.0 / N, jnp.float32))      # (BN, BN)

    # Single fused kernel step: whole-array (VMEM) blocks, no grid.
    # TODO(synk): on v7x use grid=(2,) + pltpu.CORE_PARALLEL, 2 graphs per core.
    # TODO(synk): optional bf16 cast of whh/wcat/wmp/wmn/wsem1/wpred on v6e/v7x.
    pred_flat, beta_flat = pl.pallas_call(
        _stock_hete_gat_kernel,
        out_shape=(jax.ShapeDtypeStruct((BN, 1), jnp.float32),
                   jax.ShapeDtypeStruct((3 * BN, 1), jnp.float32)),
    )(gi_all, pos_bd, neg_bd, pmean,
      whh, bhh_n, wcat, params["bself"],
      params["wmp"], bmp_eff, params["wmn"], bmn_eff,
      params["wsem1"], params["bsem1"], params["wsem2"],
      params["wpred"], params["bpred"])

    pred = pred_flat.reshape(B, N, 1)
    beta = jnp.transpose(beta_flat.reshape(3, B, N, 1), (1, 2, 0, 3))   # (B,N,3,1)

    # Normalized adjacencies (the returned attention weights) recomputed with
    # plain XLA — identical formula, keeps the kernel output slab tiny.
    uw_p = pos_adj / (pos_adj.sum(axis=2, keepdims=True) + 1e-8)
    uw_n = neg_adj / (neg_adj.sum(axis=2, keepdims=True) + 1e-8)
    attn = {
        "pos_attn_weights": jnp.broadcast_to(uw_p[:, None], (B, NUM_HEADS, N, N)),
        "neg_attn_weights": jnp.broadcast_to(uw_n[:, None], (B, NUM_HEADS, N, N)),
        "sem_attn_weights": beta,
    }
    if single:
        pred = pred[0]
        attn = {k: v[0] for k, v in attn.items()}
    return pred, attn


# ----------------------- pure-JAX reference (for check) -----------------------
def reference_forward(inputs_ntf, pos_adj, neg_adj, params):
    N, T, F = inputs_ntf.shape
    H = HIDDEN_DIM
    wih, whh = params["wih"], params["whh"]
    bih, bhh = params["bih"][0], params["bhh"][0]

    def step(h, x_t):
        gi = x_t @ wih + bih
        gh = h @ whh + bhh
        r = jax.nn.sigmoid(gi[:, :H] + gh[:, :H])
        z = jax.nn.sigmoid(gi[:, H:2 * H] + gh[:, H:2 * H])
        n = jnp.tanh(gi[:, 2 * H:] + r * gh[:, 2 * H:])
        return (1.0 - z) * n + z * h, None

    h, _ = lax.scan(step, jnp.zeros((N, H), jnp.float32),
                    jnp.transpose(inputs_ntf, (1, 0, 2)))

    def gat(h, adj, w, b, wp, bp):
        sup = (h @ w).reshape(N, NUM_HEADS, OUT_FEATURES).transpose(1, 0, 2)
        deg = adj.sum(axis=1, keepdims=True)
        uw = adj / (deg + 1e-8)
        sup = jnp.einsum("ij,hjo->hio", uw, sup)
        sup = sup.transpose(1, 0, 2).reshape(N, NUM_HEADS * OUT_FEATURES)
        return sup + b + h @ wp + bp

    pos_sup = gat(h, pos_adj, params["wgp"], params["bgp"], params["wpp"], params["bpp"])
    neg_sup = gat(h, neg_adj, params["wgn"], params["bgn"], params["wpn"], params["bpn"])

    e0 = h @ params["wself"] + params["bself"]
    e1 = pos_sup @ params["wmp"] + params["bmp"]
    e2 = neg_sup @ params["wmn"] + params["bmn"]
    stack = jnp.stack([e0, e1, e2], axis=1)                        # (N, 3, H)

    w = jnp.tanh(stack @ params["wsem1"] + params["bsem1"]) @ params["wsem2"]
    beta = jax.nn.softmax(w, axis=1)
    emb = (beta * stack).sum(axis=1)

    xc = emb - emb.mean(axis=0)
    xn = xc / jnp.sqrt(1e-6 + (xc ** 2).sum(axis=1, keepdims=True))
    return jnp.tanh(xn @ params["wpred"] + params["bpred"])


# ----------------------------- parameter init ---------------------------------
def init_params(key):
    H, F, NH, OF = HIDDEN_DIM, IN_FEATURES, NUM_HEADS, OUT_FEATURES
    keys = iter(jax.random.split(key, 32))

    def u(shape, scale):
        return jax.random.uniform(next(keys), shape, jnp.float32, -scale, scale)

    g = 1.0 / math.sqrt(H)
    params = {
        # GRU (weights pre-transposed to (in, 3H), gate order r|z|n as PyTorch)
        "wih": u((F, 3 * H), g), "whh": u((H, 3 * H), g),
        "bih": u((1, 3 * H), g), "bhh": u((1, 3 * H), g),
        # pos / neg GraphAttnMultiHead
        "wgp": u((H, NH * OF), 1.0 / math.sqrt(NH * OF)),
        "bgp": u((1, NH * OF), 1.0 / math.sqrt(NH * OF)),
        "wpp": u((H, NH * OF), 0.02),
        "bpp": u((1, NH * OF), g),
        "wgn": u((H, NH * OF), 1.0 / math.sqrt(NH * OF)),
        "bgn": u((1, NH * OF), 1.0 / math.sqrt(NH * OF)),
        "wpn": u((H, NH * OF), 0.02),
        "bpn": u((1, NH * OF), g),
        # MLPs
        "wself": u((H, H), 0.02), "bself": u((1, H), g),
        "wmp": u((NH * OF, H), 0.02), "bmp": u((1, H), g),
        "wmn": u((NH * OF, H), 0.02), "bmn": u((1, H), g),
        # semantic attention
        "wsem1": u((H, H), 0.02), "bsem1": u((1, H), g),
        "wsem2": u((H, 1), 0.02),
        # predictor
        "wpred": u((H, 1), 0.02), "bpred": u((1, 1), g),
    }
    return params


if __name__ == "__main__":
    key = jax.random.PRNGKey(0)
    k_par, k_x, k_p, k_n = jax.random.split(key, 4)

    B, N, T = 4, 16, 8                         # 4 graphs, 16 stocks, 8 timesteps
    params = init_params(k_par)
    inputs = jax.random.normal(k_x, (B, N, T, IN_FEATURES), jnp.float32)
    eye = jnp.broadcast_to(jnp.eye(N, dtype=jnp.float32), (B, N, N))
    pos_adj = (jax.random.uniform(k_p, (B, N, N)) > 0.6).astype(jnp.float32) + eye
    neg_adj = (jax.random.uniform(k_n, (B, N, N)) > 0.6).astype(jnp.float32) + eye

    forward = jax.jit(stock_hete_gat_forward)
    pred, attn = forward(inputs, pos_adj, neg_adj, params)
    pred = jax.block_until_ready(pred)

    ref = jax.vmap(reference_forward, in_axes=(0, 0, 0, None))(
        inputs, pos_adj, neg_adj, params)
    ref = jax.block_until_ready(ref)

    assert pred.shape == (B, N, 1)
    assert attn["pos_attn_weights"].shape == (B, NUM_HEADS, N, N)
    assert attn["neg_attn_weights"].shape == (B, NUM_HEADS, N, N)
    assert attn["sem_attn_weights"].shape == (B, N, 3, 1)
    max_err = jnp.max(jnp.abs(pred - ref))
    assert jnp.allclose(pred, ref, atol=1e-3, rtol=1e-3), (
        f"mismatch: max abs err {max_err}")

    print("KERNEL_OK")
</pallas_src>

<mosaic_0001>
module attributes {stable_mosaic.version = 11 : i64} {
  func.func @_stock_hete_gat_kernel(%arg0: memref<512x192xf32, #tpu.memory_space<vmem>>, %arg1: memref<64x64xf32, #tpu.memory_space<vmem>>, %arg2: memref<64x64xf32, #tpu.memory_space<vmem>>, %arg3: memref<64x64xf32, #tpu.memory_space<vmem>>, %arg4: memref<64x192xf32, #tpu.memory_space<vmem>>, %arg5: memref<1x64xf32, #tpu.memory_space<vmem>>, %arg6: memref<64x320xf32, #tpu.memory_space<vmem>>, %arg7: memref<1x64xf32, #tpu.memory_space<vmem>>, %arg8: memref<64x64xf32, #tpu.memory_space<vmem>>, %arg9: memref<1x64xf32, #tpu.memory_space<vmem>>, %arg10: memref<64x64xf32, #tpu.memory_space<vmem>>, %arg11: memref<1x64xf32, #tpu.memory_space<vmem>>, %arg12: memref<64x64xf32, #tpu.memory_space<vmem>>, %arg13: memref<1x64xf32, #tpu.memory_space<vmem>>, %arg14: memref<64x1xf32, #tpu.memory_space<vmem>>, %arg15: memref<64x1xf32, #tpu.memory_space<vmem>>, %arg16: memref<1x1xf32, #tpu.memory_space<vmem>>, %arg17: memref<64x1xf32, #tpu.memory_space<vmem>>, %arg18: memref<192x1xf32, #tpu.memory_space<vmem>>) attributes {dimension_semantics = [], scalar_prefetch = 0 : i64, scratch_operands = 0 : i64, tpu.core_type = #tpu.core_type<tc>} {
    %c0 = arith.constant 0 : index
    %c0_0 = arith.constant 0 : index
    %0 = vector.load %arg0[%c0, %c0_0] : memref<512x192xf32, #tpu.memory_space<vmem>>, vector<64x192xf32>
    %1 = vector.extract_strided_slice %0 {offsets = [0, 0], sizes = [64, 64], strides = [1, 1]} : vector<64x192xf32> to vector<64x64xf32>
    %2 = arith.negf %1 : vector<64x64xf32>
    %3 = math.exp %2 : vector<64x64xf32>
    %cst = arith.constant 1.000000e+00 : f32
    %4 = vector.broadcast %cst : f32 to vector<64x64xf32>
    %5 = arith.addf %4, %3 : vector<64x64xf32>
    %6 = arith.divf %4, %5 : vector<64x64xf32>
    %7 = vector.extract_strided_slice %0 {offsets = [0, 64], sizes = [64, 64], strides = [1, 1]} : vector<64x192xf32> to vector<64x64xf32>
    %8 = arith.negf %7 : vector<64x64xf32>
    %9 = math.exp %8 : vector<64x64xf32>
    %cst_1 = arith.constant 1.000000e+00 : f32
    %10 = vector.broadcast %cst_1 : f32 to vector<64x64xf32>
    %11 = arith.addf %10, %9 : vector<64x64xf32>
    %12 = arith.divf %10, %11 : vector<64x64xf32>
    %13 = vector.extract_strided_slice %0 {offsets = [0, 128], sizes = [64, 64], strides = [1, 1]} : vector<64x192xf32> to vector<64x64xf32>
    %c0_2 = arith.constant 0 : index
    %c0_3 = arith.constant 0 : index
    %14 = vector.load %arg5[%c0_2, %c0_3] : memref<1x64xf32, #tpu.memory_space<vmem>>, vector<1x64xf32>
    %15 = vector.broadcast %14 : vector<1x64xf32> to vector<64x64xf32>
    %16 = arith.mulf %6, %15 : vector<64x64xf32>
    %17 = arith.addf %13, %16 : vector<64x64xf32>
    %18 = math.tanh %17 : vector<64x64xf32>
    %cst_4 = arith.constant 1.000000e+00 : f32
    %19 = vector.broadcast %cst_4 : f32 to vector<64x64xf32>
    %20 = arith.subf %19, %12 : vector<64x64xf32>
    %21 = arith.mulf %20, %18 : vector<64x64xf32>
    %c1_i32 = arith.constant 1 : i32
    %c64_i32 = arith.constant 64 : i32
    %22 = arith.muli %c1_i32, %c64_i32 : i32
    %23 = tpu.assume_multiple %22, 64 : i32
    %c0_5 = arith.constant 0 : index
    %c0_6 = arith.constant 0 : index
    %24 = vector.load %arg4[%c0_5, %c0_6] : memref<64x192xf32, #tpu.memory_space<vmem>>, vector<64x192xf32>
    %cst_7 = arith.constant dense<0.000000e+00> : vector<64x192xf32>
    %25 = tpu.matmul %21, %24, %cst_7 {dimension_numbers = #tpu.dot_dimension_numbers<[1], [0], [0], [1], [0, 0, 1, 1], [], []>} : vector<64x64xf32>, vector<64x192xf32>, vector<64x192xf32> -> vector<64x192xf32>
    %26 = arith.index_cast %23 : i32 to index
    %c0_8 = arith.constant 0 : index
    %27 = vector.load %arg0[%26, %c0_8] : memref<512x192xf32, #tpu.memory_space<vmem>>, vector<64x192xf32>
    %28 = vector.extract_strided_slice %27 {offsets = [0, 0], sizes = [64, 64], strides = [1, 1]} : vector<64x192xf32> to vector<64x64xf32>
    %29 = vector.extract_strided_slice %25 {offsets = [0, 0], sizes = [64, 64], strides = [1, 1]} : vector<64x192xf32> to vector<64x64xf32>
    %30 = arith.addf %28, %29 : vector<64x64xf32>
    %31 = arith.negf %30 : vector<64x64xf32>
    %32 = math.exp %31 : vector<64x64xf32>
    %cst_9 = arith.constant 1.000000e+00 : f32
    %33 = vector.broadcast %cst_9 : f32 to vector<64x64xf32>
    %34 = arith.addf %33, %32 : vector<64x64xf32>
    %35 = arith.divf %33, %34 : vector<64x64xf32>
    %36 = vector.extract_strided_slice %27 {offsets = [0, 64], sizes = [64, 64], strides = [1, 1]} : vector<64x192xf32> to vector<64x64xf32>
    %37 = vector.extract_strided_slice %25 {offsets = [0, 64], sizes = [64, 64], strides = [1, 1]} : vector<64x192xf32> to vector<64x64xf32>
    %38 = arith.addf %36, %37 : vector<64x64xf32>
    %39 = arith.negf %38 : vector<64x64xf32>
    %40 = math.exp %39 : vector<64x64xf32>
    %cst_10 = arith.constant 1.000000e+00 : f32
    %41 = vector.broadcast %cst_10 : f32 to vector<64x64xf32>
    %42 = arith.addf %41, %40 : vector<64x64xf32>
    %43 = arith.divf %41, %42 : vector<64x64xf32>
    %44 = vector.extract_strided_slice %27 {offsets = [0, 128], sizes = [64, 64], strides = [1, 1]} : vector<64x192xf32> to vector<64x64xf32>
    %45 = vector.extract_strided_slice %25 {offsets = [0, 128], sizes = [64, 64], strides = [1, 1]} : vector<64x192xf32> to vector<64x64xf32>
    %c0_11 = arith.constant 0 : index
    %c0_12 = arith.constant 0 : index
    %46 = vector.load %arg5[%c0_11, %c0_12] : memref<1x64xf32, #tpu.memory_space<vmem>>, vector<1x64xf32>
    %47 = vector.broadcast %46 : vector<1x64xf32> to vector<64x64xf32>
    %48 = arith.addf %45, %47 : vector<64x64xf32>
    %49 = arith.mulf %35, %48 : vector<64x64xf32>
    %50 = arith.addf %44, %49 : vector<64x64xf32>
    %51 = math.tanh %50 : vector<64x64xf32>
    %cst_13 = arith.constant 1.000000e+00 : f32
    %52 = vector.broadcast %cst_13 : f32 to vector<64x64xf32>
    %53 = arith.subf %52, %43 : vector<64x64xf32>
    %54 = arith.mulf %53, %51 : vector<64x64xf32>
    %55 = arith.mulf %43, %21 : vector<64x64xf32>
    %56 = arith.addf %54, %55 : vector<64x64xf32>
    %c2_i32 = arith.constant 2 : i32
    %c64_i32_14 = arith.constant 64 : i32
    %57 = arith.muli %c2_i32, %c64_i32_14 : i32
    %58 = tpu.assume_multiple %57, 64 : i32
    %c0_15 = arith.constant 0 : index
    %c0_16 = arith.constant 0 : index
    %59 = vector.load %arg4[%c0_15, %c0_16] : memref<64x192xf32, #tpu.memory_space<vmem>>, vector<64x192xf32>
    %cst_17 = arith.constant dense<0.000000e+00> : vector<64x192xf32>
    %60 = tpu.matmul %56, %59, %cst_17 {dimension_numbers = #tpu.dot_dimension_numbers<[1], [0], [0], [1], [0, 0, 1, 1], [], []>} : vector<64x64xf32>, vector<64x192xf32>, vector<64x192xf32> -> vector<64x192xf32>
    %61 = arith.index_cast %58 : i32 to index
    %c0_18 = arith.constant 0 : index
    %62 = vector.load %arg0[%61, %c0_18] : memref<512x192xf32, #tpu.memory_space<vmem>>, vector<64x192xf32>
    %63 = vector.extract_strided_slice %62 {offsets = [0, 0], sizes = [64, 64], strides = [1, 1]} : vector<64x192xf32> to vector<64x64xf32>
    %64 = vector.extract_strided_slice %60 {offsets = [0, 0], sizes = [64, 64], strides = [1, 1]} : vector<64x192xf32> to vector<64x64xf32>
    %65 = arith.addf %63, %64 : vector<64x64xf32>
    %66 = arith.negf %65 : vector<64x64xf32>
    %67 = math.exp %66 : vector<64x64xf32>
    %cst_19 = arith.constant 1.000000e+00 : f32
    %68 = vector.broadcast %cst_19 : f32 to vector<64x64xf32>
    %69 = arith.addf %68, %67 : vector<64x64xf32>
    %70 = arith.divf %68, %69 : vector<64x64xf32>
    %71 = vector.extract_strided_slice %62 {offsets = [0, 64], sizes = [64, 64], strides = [1, 1]} : vector<64x192xf32> to vector<64x64xf32>
    %72 = vector.extract_strided_slice %60 {offsets = [0, 64], sizes = [64, 64], strides = [1, 1]} : vector<64x192xf32> to vector<64x64xf32>
    %73 = arith.addf %71, %72 : vector<64x64xf32>
    %74 = arith.negf %73 : vector<64x64xf32>
    %75 = math.exp %74 : vector<64x64xf32>
    %cst_20 = arith.constant 1.000000e+00 : f32
    %76 = vector.broadcast %cst_20 : f32 to vector<64x64xf32>
    %77 = arith.addf %76, %75 : vector<64x64xf32>
    %78 = arith.divf %76, %77 : vector<64x64xf32>
    %79 = vector.extract_strided_slice %62 {offsets = [0, 128], sizes = [64, 64], strides = [1, 1]} : vector<64x192xf32> to vector<64x64xf32>
    %80 = vector.extract_strided_slice %60 {offsets = [0, 128], sizes = [64, 64], strides = [1, 1]} : vector<64x192xf32> to vector<64x64xf32>
    %c0_21 = arith.constant 0 : index
    %c0_22 = arith.constant 0 : index
    %81 = vector.load %arg5[%c0_21, %c0_22] : memref<1x64xf32, #tpu.memory_space<vmem>>, vector<1x64xf32>
    %82 = vector.broadcast %81 : vector<1x64xf32> to vector<64x64xf32>
    %83 = arith.addf %80, %82 : vector<64x64xf32>
    %84 = arith.mulf %70, %83 : vector<64x64xf32>
    %85 = arith.addf %79, %84 : vector<64x64xf32>
    %86 = math.tanh %85 : vector<64x64xf32>
    %cst_23 = arith.constant 1.000000e+00 : f32
    %87 = vector.broadcast %cst_23 : f32 to vector<64x64xf32>
    %88 = arith.subf %87, %78 : vector<64x64xf32>
    %89 = arith.mulf %88, %86 : vector<64x64xf32>
    %90 = arith.mulf %78, %56 : vector<64x64xf32>
    %91 = arith.addf %89, %90 : vector<64x64xf32>
    %c3_i32 = arith.constant 3 : i32
    %c64_i32_24 = arith.constant 64 : i32
    %92 = arith.muli %c3_i32, %c64_i32_24 : i32
    %93 = tpu.assume_multiple %92, 64 : i32
    %c0_25 = arith.constant 0 : index
    %c0_26 = arith.constant 0 : index
    %94 = vector.load %arg4[%c0_25, %c0_26] : memref<64x192xf32, #tpu.memory_space<vmem>>, vector<64x192xf32>
    %cst_27 = arith.constant dense<0.000000e+00> : vector<64x192xf32>
    %95 = tpu.matmul %91, %94, %cst_27 {dimension_numbers = #tpu.dot_dimension_numbers<[1], [0], [0], [1], [0, 0, 1, 1], [], []>} : vector<64x64xf32>, vector<64x192xf32>, vector<64x192xf32> -> vector<64x192xf32>
    %96 = arith.index_cast %93 : i32 to index
    %c0_28 = arith.constant 0 : index
    %97 = vector.load %arg0[%96, %c0_28] : memref<512x192xf32, #tpu.memory_space<vmem>>, vector<64x192xf32>
    %98 = vector.extract_strided_slice %97 {offsets = [0, 0], sizes = [64, 64], strides = [1, 1]} : vector<64x192xf32> to vector<64x64xf32>
    %99 = vector.extract_strided_slice %95 {offsets = [0, 0], sizes = [64, 64], strides = [1, 1]} : vector<64x192xf32> to vector<64x64xf32>
    %100 = arith.addf %98, %99 : vector<64x64xf32>
    %101 = arith.negf %100 : vector<64x64xf32>
    %102 = math.exp %101 : vector<64x64xf32>
    %cst_29 = arith.constant 1.000000e+00 : f32
    %103 = vector.broadcast %cst_29 : f32 to vector<64x64xf32>
    %104 = arith.addf %103, %102 : vector<64x64xf32>
    %105 = arith.divf %103, %104 : vector<64x64xf32>
    %106 = vector.extract_strided_slice %97 {offsets = [0, 64], sizes = [64, 64], strides = [1, 1]} : vector<64x192xf32> to vector<64x64xf32>
    %107 = vector.extract_strided_slice %95 {offsets = [0, 64], sizes = [64, 64], strides = [1, 1]} : vector<64x192xf32> to vector<64x64xf32>
    %108 = arith.addf %106, %107 : vector<64x64xf32>
    %109 = arith.negf %108 : vector<64x64xf32>
    %110 = math.exp %109 : vector<64x64xf32>
    %cst_30 = arith.constant 1.000000e+00 : f32
    %111 = vector.broadcast %cst_30 : f32 to vector<64x64xf32>
    %112 = arith.addf %111, %110 : vector<64x64xf32>
    %113 = arith.divf %111, %112 : vector<64x64xf32>
    %114 = vector.extract_strided_slice %97 {offsets = [0, 128], sizes = [64, 64], strides = [1, 1]} : vector<64x192xf32> to vector<64x64xf32>
    %115 = vector.extract_strided_slice %95 {offsets = [0, 128], sizes = [64, 64], strides = [1, 1]} : vector<64x192xf32> to vector<64x64xf32>
    %c0_31 = arith.constant 0 : index
    %c0_32 = arith.constant 0 : index
    %116 = vector.load %arg5[%c0_31, %c0_32] : memref<1x64xf32, #tpu.memory_space<vmem>>, vector<1x64xf32>
    %117 = vector.broadcast %116 : vector<1x64xf32> to vector<64x64xf32>
    %118 = arith.addf %115, %117 : vector<64x64xf32>
    %119 = arith.mulf %105, %118 : vector<64x64xf32>
    %120 = arith.addf %114, %119 : vector<64x64xf32>
    %121 = math.tanh %120 : vector<64x64xf32>
    %cst_33 = arith.constant 1.000000e+00 : f32
    %122 = vector.broadcast %cst_33 : f32 to vector<64x64xf32>
    %123 = arith.subf %122, %113 : vector<64x64xf32>
    %124 = arith.mulf %123, %121 : vector<64x64xf32>
    %125 = arith.mulf %113, %91 : vector<64x64xf32>
    %126 = arith.addf %124, %125 : vector<64x64xf32>
    %c4_i32 = arith.constant 4 : i32
    %c64_i32_34 = arith.constant 64 : i32
    %127 = arith.muli %c4_i32, %c64_i32_34 : i32
    %128 = tpu.assume_multiple %127, 64 : i32
    %c0_35 = arith.constant 0 : index
    %c0_36 = arith.constant 0 : index
    %129 = vector.load %arg4[%c0_35, %c0_36] : memref<64x192xf32, #tpu.memory_space<vmem>>, vector<64x192xf32>
    %cst_37 = arith.constant dense<0.000000e+00> : vector<64x192xf32>
    %130 = tpu.matmul %126, %129, %cst_37 {dimension_numbers = #tpu.dot_dimension_numbers<[1], [0], [0], [1], [0, 0, 1, 1], [], []>} : vector<64x64xf32>, vector<64x192xf32>, vector<64x192xf32> -> vector<64x192xf32>
    %131 = arith.index_cast %128 : i32 to index
    %c0_38 = arith.constant 0 : index
    %132 = vector.load %arg0[%131, %c0_38] : memref<512x192xf32, #tpu.memory_space<vmem>>, vector<64x192xf32>
    %133 = vector.extract_strided_slice %132 {offsets = [0, 0], sizes = [64, 64], strides = [1, 1]} : vector<64x192xf32> to vector<64x64xf32>
    %134 = vector.extract_strided_slice %130 {offsets = [0, 0], sizes = [64, 64], strides = [1, 1]} : vector<64x192xf32> to vector<64x64xf32>
    %135 = arith.addf %133, %134 : vector<64x64xf32>
    %136 = arith.negf %135 : vector<64x64xf32>
    %137 = math.exp %136 : vector<64x64xf32>
    %cst_39 = arith.constant 1.000000e+00 : f32
    %138 = vector.broadcast %cst_39 : f32 to vector<64x64xf32>
    %139 = arith.addf %138, %137 : vector<64x64xf32>
    %140 = arith.divf %138, %139 : vector<64x64xf32>
    %141 = vector.extract_strided_slice %132 {offsets = [0, 64], sizes = [64, 64], strides = [1, 1]} : vector<64x192xf32> to vector<64x64xf32>
    %142 = vector.extract_strided_slice %130 {offsets = [0, 64], sizes = [64, 64], strides = [1, 1]} : vector<64x192xf32> to vector<64x64xf32>
    %143 = arith.addf %141, %142 : vector<64x64xf32>
    %144 = arith.negf %143 : vector<64x64xf32>
    %145 = math.exp %144 : vector<64x64xf32>
    %cst_40 = arith.constant 1.000000e+00 : f32
    %146 = vector.broadcast %cst_40 : f32 to vector<64x64xf32>
    %147 = arith.addf %146, %145 : vector<64x64xf32>
    %148 = arith.divf %146, %147 : vector<64x64xf32>
    %149 = vector.extract_strided_slice %132 {offsets = [0, 128], sizes = [64, 64], strides = [1, 1]} : vector<64x192xf32> to vector<64x64xf32>
    %150 = vector.extract_strided_slice %130 {offsets = [0, 128], sizes = [64, 64], strides = [1, 1]} : vector<64x192xf32> to vector<64x64xf32>
    %c0_41 = arith.constant 0 : index
    %c0_42 = arith.constant 0 : index
    %151 = vector.load %arg5[%c0_41, %c0_42] : memref<1x64xf32, #tpu.memory_space<vmem>>, vector<1x64xf32>
    %152 = vector.broadcast %151 : vector<1x64xf32> to vector<64x64xf32>
    %153 = arith.addf %150, %152 : vector<64x64xf32>
    %154 = arith.mulf %140, %153 : vector<64x64xf32>
    %155 = arith.addf %149, %154 : vector<64x64xf32>
    %156 = math.tanh %155 : vector<64x64xf32>
    %cst_43 = arith.constant 1.000000e+00 : f32
    %157 = vector.broadcast %cst_43 : f32 to vector<64x64xf32>
    %158 = arith.subf %157, %148 : vector<64x64xf32>
    %159 = arith.mulf %158, %156 : vector<64x64xf32>
    %160 = arith.mulf %148, %126 : vector<64x64xf32>
    %161 = arith.addf %159, %160 : vector<64x64xf32>
    %c5_i32 = arith.constant 5 : i32
    %c64_i32_44 = arith.constant 64 : i32
    %162 = arith.muli %c5_i32, %c64_i32_44 : i32
    %163 = tpu.assume_multiple %162, 64 : i32
    %c0_45 = arith.constant 0 : index
    %c0_46 = arith.constant 0 : index
    %164 = vector.load %arg4[%c0_45, %c0_46] : memref<64x192xf32, #tpu.memory_space<vmem>>, vector<64x192xf32>
    %cst_47 = arith.constant dense<0.000000e+00> : vector<64x192xf32>
    %165 = tpu.matmul %161, %164, %cst_47 {dimension_numbers = #tpu.dot_dimension_numbers<[1], [0], [0], [1], [0, 0, 1, 1], [], []>} : vector<64x64xf32>, vector<64x192xf32>, vector<64x192xf32> -> vector<64x192xf32>
    %166 = arith.index_cast %163 : i32 to index
    %c0_48 = arith.constant 0 : index
    %167 = vector.load %arg0[%166, %c0_48] : memref<512x192xf32, #tpu.memory_space<vmem>>, vector<64x192xf32>
    %168 = vector.extract_strided_slice %167 {offsets = [0, 0], sizes = [64, 64], strides = [1, 1]} : vector<64x192xf32> to vector<64x64xf32>
    %169 = vector.extract_strided_slice %165 {offsets = [0, 0], sizes = [64, 64], strides = [1, 1]} : vector<64x192xf32> to vector<64x64xf32>
    %170 = arith.addf %168, %169 : vector<64x64xf32>
    %171 = arith.negf %170 : vector<64x64xf32>
    %172 = math.exp %171 : vector<64x64xf32>
    %cst_49 = arith.constant 1.000000e+00 : f32
    %173 = vector.broadcast %cst_49 : f32 to vector<64x64xf32>
    %174 = arith.addf %173, %172 : vector<64x64xf32>
    %175 = arith.divf %173, %174 : vector<64x64xf32>
    %176 = vector.extract_strided_slice %167 {offsets = [0, 64], sizes = [64, 64], strides = [1, 1]} : vector<64x192xf32> to vector<64x64xf32>
    %177 = vector.extract_strided_slice %165 {offsets = [0, 64], sizes = [64, 64], strides = [1, 1]} : vector<64x192xf32> to vector<64x64xf32>
    %178 = arith.addf %176, %177 : vector<64x64xf32>
    %179 = arith.negf %178 : vector<64x64xf32>
    %180 = math.exp %179 : vector<64x64xf32>
    %cst_50 = arith.constant 1.000000e+00 : f32
    %181 = vector.broadcast %cst_50 : f32 to vector<64x64xf32>
    %182 = arith.addf %181, %180 : vector<64x64xf32>
    %183 = arith.divf %181, %182 : vector<64x64xf32>
    %184 = vector.extract_strided_slice %167 {offsets = [0, 128], sizes = [64, 64], strides = [1, 1]} : vector<64x192xf32> to vector<64x64xf32>
    %185 = vector.extract_strided_slice %165 {offsets = [0, 128], sizes = [64, 64], strides = [1, 1]} : vector<64x192xf32> to vector<64x64xf32>
    %c0_51 = arith.constant 0 : index
    %c0_52 = arith.constant 0 : index
    %186 = vector.load %arg5[%c0_51, %c0_52] : memref<1x64xf32, #tpu.memory_space<vmem>>, vector<1x64xf32>
    %187 = vector.broadcast %186 : vector<1x64xf32> to vector<64x64xf32>
    %188 = arith.addf %185, %187 : vector<64x64xf32>
    %189 = arith.mulf %175, %188 : vector<64x64xf32>
    %190 = arith.addf %184, %189 : vector<64x64xf32>
    %191 = math.tanh %190 : vector<64x64xf32>
    %cst_53 = arith.constant 1.000000e+00 : f32
    %192 = vector.broadcast %cst_53 : f32 to vector<64x64xf32>
    %193 = arith.subf %192, %183 : vector<64x64xf32>
    %194 = arith.mulf %193, %191 : vector<64x64xf32>
    %195 = arith.mulf %183, %161 : vector<64x64xf32>
    %196 = arith.addf %194, %195 : vector<64x64xf32>
    %c6_i32 = arith.constant 6 : i32
    %c64_i32_54 = arith.constant 64 : i32
    %197 = arith.muli %c6_i32, %c64_i32_54 : i32
    %198 = tpu.assume_multiple %197, 64 : i32
    %c0_55 = arith.constant 0 : index
    %c0_56 = arith.constant 0 : index
    %199 = vector.load %arg4[%c0_55, %c0_56] : memref<64x192xf32, #tpu.memory_space<vmem>>, vector<64x192xf32>
    %cst_57 = arith.constant dense<0.000000e+00> : vector<64x192xf32>
    %200 = tpu.matmul %196, %199, %cst_57 {dimension_numbers = #tpu.dot_dimension_numbers<[1], [0], [0], [1], [0, 0, 1, 1], [], []>} : vector<64x64xf32>, vector<64x192xf32>, vector<64x192xf32> -> vector<64x192xf32>
    %201 = arith.index_cast %198 : i32 to index
    %c0_58 = arith.constant 0 : index
    %202 = vector.load %arg0[%201, %c0_58] : memref<512x192xf32, #tpu.memory_space<vmem>>, vector<64x192xf32>
    %203 = vector.extract_strided_slice %202 {offsets = [0, 0], sizes = [64, 64], strides = [1, 1]} : vector<64x192xf32> to vector<64x64xf32>
    %204 = vector.extract_strided_slice %200 {offsets = [0, 0], sizes = [64, 64], strides = [1, 1]} : vector<64x192xf32> to vector<64x64xf32>
    %205 = arith.addf %203, %204 : vector<64x64xf32>
    %206 = arith.negf %205 : vector<64x64xf32>
    %207 = math.exp %206 : vector<64x64xf32>
    %cst_59 = arith.constant 1.000000e+00 : f32
    %208 = vector.broadcast %cst_59 : f32 to vector<64x64xf32>
    %209 = arith.addf %208, %207 : vector<64x64xf32>
    %210 = arith.divf %208, %209 : vector<64x64xf32>
    %211 = vector.extract_strided_slice %202 {offsets = [0, 64], sizes = [64, 64], strides = [1, 1]} : vector<64x192xf32> to vector<64x64xf32>
    %212 = vector.extract_strided_slice %200 {offsets = [0, 64], sizes = [64, 64], strides = [1, 1]} : vector<64x192xf32> to vector<64x64xf32>
    %213 = arith.addf %211, %212 : vector<64x64xf32>
    %214 = arith.negf %213 : vector<64x64xf32>
    %215 = math.exp %214 : vector<64x64xf32>
    %cst_60 = arith.constant 1.000000e+00 : f32
    %216 = vector.broadcast %cst_60 : f32 to vector<64x64xf32>
    %217 = arith.addf %216, %215 : vector<64x64xf32>
    %218 = arith.divf %216, %217 : vector<64x64xf32>
    %219 = vector.extract_strided_slice %202 {offsets = [0, 128], sizes = [64, 64], strides = [1, 1]} : vector<64x192xf32> to vector<64x64xf32>
    %220 = vector.extract_strided_slice %200 {offsets = [0, 128], sizes = [64, 64], strides = [1, 1]} : vector<64x192xf32> to vector<64x64xf32>
    %c0_61 = arith.constant 0 : index
    %c0_62 = arith.constant 0 : index
    %221 = vector.load %arg5[%c0_61, %c0_62] : memref<1x64xf32, #tpu.memory_space<vmem>>, vector<1x64xf32>
    %222 = vector.broadcast %221 : vector<1x64xf32> to vector<64x64xf32>
    %223 = arith.addf %220, %222 : vector<64x64xf32>
    %224 = arith.mulf %210, %223 : vector<64x64xf32>
    %225 = arith.addf %219, %224 : vector<64x64xf32>
    %226 = math.tanh %225 : vector<64x64xf32>
    %cst_63 = arith.constant 1.000000e+00 : f32
    %227 = vector.broadcast %cst_63 : f32 to vector<64x64xf32>
    %228 = arith.subf %227, %218 : vector<64x64xf32>
    %229 = arith.mulf %228, %226 : vector<64x64xf32>
    %230 = arith.mulf %218, %196 : vector<64x64xf32>
    %231 = arith.addf %229, %230 : vector<64x64xf32>
    %c7_i32 = arith.constant 7 : i32
    %c64_i32_64 = arith.constant 64 : i32
    %232 = arith.muli %c7_i32, %c64_i32_64 : i32
    %233 = tpu.assume_multiple %232, 64 : i32
    %c0_65 = arith.constant 0 : index
    %c0_66 = arith.constant 0 : index
    %234 = vector.load %arg4[%c0_65, %c0_66] : memref<64x192xf32, #tpu.memory_space<vmem>>, vector<64x192xf32>
    %cst_67 = arith.constant dense<0.000000e+00> : vector<64x192xf32>
    %235 = tpu.matmul %231, %234, %cst_67 {dimension_numbers = #tpu.dot_dimension_numbers<[1], [0], [0], [1], [0, 0, 1, 1], [], []>} : vector<64x64xf32>, vector<64x192xf32>, vector<64x192xf32> -> vector<64x192xf32>
    %236 = arith.index_cast %233 : i32 to index
    %c0_68 = arith.constant 0 : index
    %237 = vector.load %arg0[%236, %c0_68] : memref<512x192xf32, #tpu.memory_space<vmem>>, vector<64x192xf32>
    %238 = vector.extract_strided_slice %237 {offsets = [0, 0], sizes = [64, 64], strides = [1, 1]} : vector<64x192xf32> to vector<64x64xf32>
    %239 = vector.extract_strided_slice %235 {offsets = [0, 0], sizes = [64, 64], strides = [1, 1]} : vector<64x192xf32> to vector<64x64xf32>
    %240 = arith.addf %238, %239 : vector<64x64xf32>
    %241 = arith.negf %240 : vector<64x64xf32>
    %242 = math.exp %241 : vector<64x64xf32>
    %cst_69 = arith.constant 1.000000e+00 : f32
    %243 = vector.broadcast %cst_69 : f32 to vector<64x64xf32>
    %244 = arith.addf %243, %242 : vector<64x64xf32>
    %245 = arith.divf %243, %244 : vector<64x64xf32>
    %246 = vector.extract_strided_slice %237 {offsets = [0, 64], sizes = [64, 64], strides = [1, 1]} : vector<64x192xf32> to vector<64x64xf32>
    %247 = vector.extract_strided_slice %235 {offsets = [0, 64], sizes = [64, 64], strides = [1, 1]} : vector<64x192xf32> to vector<64x64xf32>
    %248 = arith.addf %246, %247 : vector<64x64xf32>
    %249 = arith.negf %248 : vector<64x64xf32>
    %250 = math.exp %249 : vector<64x64xf32>
    %cst_70 = arith.constant 1.000000e+00 : f32
    %251 = vector.broadcast %cst_70 : f32 to vector<64x64xf32>
    %252 = arith.addf %251, %250 : vector<64x64xf32>
    %253 = arith.divf %251, %252 : vector<64x64xf32>
    %254 = vector.extract_strided_slice %237 {offsets = [0, 128], sizes = [64, 64], strides = [1, 1]} : vector<64x192xf32> to vector<64x64xf32>
    %255 = vector.extract_strided_slice %235 {offsets = [0, 128], sizes = [64, 64], strides = [1, 1]} : vector<64x192xf32> to vector<64x64xf32>
    %c0_71 = arith.constant 0 : index
    %c0_72 = arith.constant 0 : index
    %256 = vector.load %arg5[%c0_71, %c0_72] : memref<1x64xf32, #tpu.memory_space<vmem>>, vector<1x64xf32>
    %257 = vector.broadcast %256 : vector<1x64xf32> to vector<64x64xf32>
    %258 = arith.addf %255, %257 : vector<64x64xf32>
    %259 = arith.mulf %245, %258 : vector<64x64xf32>
    %260 = arith.addf %254, %259 : vector<64x64xf32>
    %261 = math.tanh %260 : vector<64x64xf32>
    %cst_73 = arith.constant 1.000000e+00 : f32
    %262 = vector.broadcast %cst_73 : f32 to vector<64x64xf32>
    %263 = arith.subf %262, %253 : vector<64x64xf32>
    %264 = arith.mulf %263, %261 : vector<64x64xf32>
    %265 = arith.mulf %253, %231 : vector<64x64xf32>
    %266 = arith.addf %264, %265 : vector<64x64xf32>
    %c7_i32_74 = arith.constant 7 : i32
    %c0_75 = arith.constant 0 : index
    %c0_76 = arith.constant 0 : index
    %267 = vector.load %arg1[%c0_75, %c0_76] : memref<64x64xf32, #tpu.memory_space<vmem>>, vector<64x64xf32>
    %c0_77 = arith.constant 0 : index
    %c0_78 = arith.constant 0 : index
    %268 = vector.load %arg2[%c0_77, %c0_78] : memref<64x64xf32, #tpu.memory_space<vmem>>, vector<64x64xf32>
    %cst_79 = arith.constant dense<0.000000e+00> : vector<64xf32>
    %269 = vector.multi_reduction <add>, %267, %cst_79 [1] : vector<64x64xf32> to vector<64xf32>
    %270 = vector.shape_cast %269 : vector<64xf32> to vector<64x1xf32>
    %cst_80 = arith.constant 9.99999993E-9 : f32
    %271 = vector.broadcast %cst_80 : f32 to vector<64x1xf32>
    %272 = arith.addf %270, %271 : vector<64x1xf32>
    %273 = tpu.reciprocal %272 : vector<64x1xf32> -> vector<64x1xf32>
    %274 = vector.broadcast %273 : vector<64x1xf32> to vector<64x64xf32>
    %275 = arith.mulf %267, %274 : vector<64x64xf32>
    %cst_81 = arith.constant dense<0.000000e+00> : vector<64xf32>
    %276 = vector.multi_reduction <add>, %268, %cst_81 [1] : vector<64x64xf32> to vector<64xf32>
    %277 = vector.shape_cast %276 : vector<64xf32> to vector<64x1xf32>
    %cst_82 = arith.constant 9.99999993E-9 : f32
    %278 = vector.broadcast %cst_82 : f32 to vector<64x1xf32>
    %279 = arith.addf %277, %278 : vector<64x1xf32>
    %280 = tpu.reciprocal %279 : vector<64x1xf32> -> vector<64x1xf32>
    %281 = vector.broadcast %280 : vector<64x1xf32> to vector<64x64xf32>
    %282 = arith.mulf %268, %281 : vector<64x64xf32>
    %c0_83 = arith.constant 0 : index
    %c0_84 = arith.constant 0 : index
    %283 = vector.load %arg6[%c0_83, %c0_84] : memref<64x320xf32, #tpu.memory_space<vmem>>, vector<64x320xf32>
    %cst_85 = arith.constant dense<0.000000e+00> : vector<64x320xf32>
    %284 = tpu.matmul %266, %283, %cst_85 {dimension_numbers = #tpu.dot_dimension_numbers<[1], [0], [0], [1], [0, 0, 1, 1], [], []>} : vector<64x64xf32>, vector<64x320xf32>, vector<64x320xf32> -> vector<64x320xf32>
    %285 = vector.extract_strided_slice %284 {offsets = [0, 0], sizes = [64, 64], strides = [1, 1]} : vector<64x320xf32> to vector<64x64xf32>
    %286 = vector.extract_strided_slice %284 {offsets = [0, 64], sizes = [64, 64], strides = [1, 1]} : vector<64x320xf32> to vector<64x64xf32>
    %287 = vector.extract_strided_slice %284 {offsets = [0, 128], sizes = [64, 64], strides = [1, 1]} : vector<64x320xf32> to vector<64x64xf32>
    %288 = vector.extract_strided_slice %284 {offsets = [0, 192], sizes = [64, 64], strides = [1, 1]} : vector<64x320xf32> to vector<64x64xf32>
    %289 = vector.extract_strided_slice %284 {offsets = [0, 256], sizes = [64, 64], strides = [1, 1]} : vector<64x320xf32> to vector<64x64xf32>
    %cst_86 = arith.constant dense<0.000000e+00> : vector<64x64xf32>
    %290 = tpu.matmul %275, %285, %cst_86 {dimension_numbers = #tpu.dot_dimension_numbers<[1], [0], [0], [1], [0, 0, 1, 1], [], []>} : vector<64x64xf32>, vector<64x64xf32>, vector<64x64xf32> -> vector<64x64xf32>
    %cst_87 = arith.constant dense<0.000000e+00> : vector<64x64xf32>
    %291 = tpu.matmul %282, %286, %cst_87 {dimension_numbers = #tpu.dot_dimension_numbers<[1], [0], [0], [1], [0, 0, 1, 1], [], []>} : vector<64x64xf32>, vector<64x64xf32>, vector<64x64xf32> -> vector<64x64xf32>
    %c0_88 = arith.constant 0 : index
    %c0_89 = arith.constant 0 : index
    %292 = vector.load %arg7[%c0_88, %c0_89] : memref<1x64xf32, #tpu.memory_space<vmem>>, vector<1x64xf32>
    %293 = vector.broadcast %292 : vector<1x64xf32> to vector<64x64xf32>
    %294 = arith.addf %289, %293 : vector<64x64xf32>
    %295 = arith.addf %290, %287 : vector<64x64xf32>
    %c0_90 = arith.constant 0 : index
    %c0_91 = arith.constant 0 : index
    %296 = vector.load %arg8[%c0_90, %c0_91] : memref<64x64xf32, #tpu.memory_space<vmem>>, vector<64x64xf32>
    %cst_92 = arith.constant dense<0.000000e+00> : vector<64x64xf32>
    %297 = tpu.matmul %295, %296, %cst_92 {dimension_numbers = #tpu.dot_dimension_numbers<[1], [0], [0], [1], [0, 0, 1, 1], [], []>} : vector<64x64xf32>, vector<64x64xf32>, vector<64x64xf32> -> vector<64x64xf32>
    %c0_93 = arith.constant 0 : index
    %c0_94 = arith.constant 0 : index
    %298 = vector.load %arg9[%c0_93, %c0_94] : memref<1x64xf32, #tpu.memory_space<vmem>>, vector<1x64xf32>
    %299 = vector.broadcast %298 : vector<1x64xf32> to vector<64x64xf32>
    %300 = arith.addf %297, %299 : vector<64x64xf32>
    %301 = arith.addf %291, %288 : vector<64x64xf32>
    %c0_95 = arith.constant 0 : index
    %c0_96 = arith.constant 0 : index
    %302 = vector.load %arg10[%c0_95, %c0_96] : memref<64x64xf32, #tpu.memory_space<vmem>>, vector<64x64xf32>
    %cst_97 = arith.constant dense<0.000000e+00> : vector<64x64xf32>
    %303 = tpu.matmul %301, %302, %cst_97 {dimension_numbers = #tpu.dot_dimension_numbers<[1], [0], [0], [1], [0, 0, 1, 1], [], []>} : vector<64x64xf32>, vector<64x64xf32>, vector<64x64xf32> -> vector<64x64xf32>
    %c0_98 = arith.constant 0 : index
    %c0_99 = arith.constant 0 : index
    %304 = vector.load %arg11[%c0_98, %c0_99] : memref<1x64xf32, #tpu.memory_space<vmem>>, vector<1x64xf32>
    %305 = vector.broadcast %304 : vector<1x64xf32> to vector<64x64xf32>
    %306 = arith.addf %303, %305 : vector<64x64xf32>
    %307 = tpu.concatenate %294, %300, %306 in 0 : vector<64x64xf32>, vector<64x64xf32>, vector<64x64xf32> -> vector<192x64xf32>
    %c0_100 = arith.constant 0 : index
    %c0_101 = arith.constant 0 : index
    %308 = vector.load %arg12[%c0_100, %c0_101] : memref<64x64xf32, #tpu.memory_space<vmem>>, vector<64x64xf32>
    %cst_102 = arith.constant dense<0.000000e+00> : vector<192x64xf32>
    %309 = tpu.matmul %307, %308, %cst_102 {dimension_numbers = #tpu.dot_dimension_numbers<[1], [0], [0], [1], [0, 0, 1, 1], [], []>} : vector<192x64xf32>, vector<64x64xf32>, vector<192x64xf32> -> vector<192x64xf32>
    %c0_103 = arith.constant 0 : index
    %c0_104 = arith.constant 0 : index
    %310 = vector.load %arg13[%c0_103, %c0_104] : memref<1x64xf32, #tpu.memory_space<vmem>>, vector<1x64xf32>
    %311 = vector.broadcast %310 : vector<1x64xf32> to vector<192x64xf32>
    %312 = arith.addf %309, %311 : vector<192x64xf32>
    %313 = math.tanh %312 : vector<192x64xf32>
    %c0_105 = arith.constant 0 : index
    %c0_106 = arith.constant 0 : index
    %314 = vector.load %arg14[%c0_105, %c0_106] : memref<64x1xf32, #tpu.memory_space<vmem>>, vector<64x1xf32>
    %cst_107 = arith.constant dense<0.000000e+00> : vector<192x1xf32>
    %315 = tpu.matmul %313, %314, %cst_107 {dimension_numbers = #tpu.dot_dimension_numbers<[1], [0], [0], [1], [0, 0, 1, 1], [], []>} : vector<192x64xf32>, vector<64x1xf32>, vector<192x1xf32> -> vector<192x1xf32>
    %316 = vector.extract_strided_slice %315 {offsets = [0, 0], sizes = [64, 1], strides = [1, 1]} : vector<192x1xf32> to vector<64x1xf32>
    %317 = vector.extract_strided_slice %315 {offsets = [64, 0], sizes = [64, 1], strides = [1, 1]} : vector<192x1xf32> to vector<64x1xf32>
    %318 = vector.extract_strided_slice %315 {offsets = [128, 0], sizes = [64, 1], strides = [1, 1]} : vector<192x1xf32> to vector<64x1xf32>
    %319 = arith.maximumf %316, %317 : vector<64x1xf32>
    %320 = arith.maximumf %319, %318 : vector<64x1xf32>
    %321 = arith.subf %316, %320 : vector<64x1xf32>
    %322 = math.exp %321 : vector<64x1xf32>
    %323 = arith.subf %317, %320 : vector<64x1xf32>
    %324 = math.exp %323 : vector<64x1xf32>
    %325 = arith.subf %318, %320 : vector<64x1xf32>
    %326 = math.exp %325 : vector<64x1xf32>
    %327 = arith.addf %322, %324 : vector<64x1xf32>
    %328 = arith.addf %327, %326 : vector<64x1xf32>
    %329 = tpu.reciprocal %328 : vector<64x1xf32> -> vector<64x1xf32>
    %330 = arith.mulf %322, %329 : vector<64x1xf32>
    %331 = arith.mulf %324, %329 : vector<64x1xf32>
    %332 = arith.mulf %326, %329 : vector<64x1xf32>
    %333 = vector.broadcast %330 : vector<64x1xf32> to vector<64x64xf32>
    %334 = arith.mulf %333, %294 : vector<64x64xf32>
    %335 = vector.broadcast %331 : vector<64x1xf32> to vector<64x64xf32>
    %336 = arith.mulf %335, %300 : vector<64x64xf32>
    %337 = arith.addf %334, %336 : vector<64x64xf32>
    %338 = vector.broadcast %332 : vector<64x1xf32> to vector<64x64xf32>
    %339 = arith.mulf %338, %306 : vector<64x64xf32>
    %340 = arith.addf %337, %339 : vector<64x64xf32>
    %c0_108 = arith.constant 0 : index
    %c0_109 = arith.constant 0 : index
    %341 = vector.load %arg3[%c0_108, %c0_109] : memref<64x64xf32, #tpu.memory_space<vmem>>, vector<64x64xf32>
    %cst_110 = arith.constant dense<0.000000e+00> : vector<64x64xf32>
    %342 = tpu.matmul %341, %340, %cst_110 {dimension_numbers = #tpu.dot_dimension_numbers<[1], [0], [0], [1], [0, 0, 1, 1], [], []>} : vector<64x64xf32>, vector<64x64xf32>, vector<64x64xf32> -> vector<64x64xf32>
    %343 = arith.mulf %342, %342 : vector<64x64xf32>
    %cst_111 = arith.constant dense<0.000000e+00> : vector<64xf32>
    %344 = vector.multi_reduction <add>, %343, %cst_111 [1] : vector<64x64xf32> to vector<64xf32>
    %345 = vector.shape_cast %344 : vector<64xf32> to vector<64x1xf32>
    %cst_112 = arith.constant 9.99999997E-7 : f32
    %346 = vector.broadcast %cst_112 : f32 to vector<64x1xf32>
    %347 = arith.addf %346, %345 : vector<64x1xf32>
    %348 = math.rsqrt %347 : vector<64x1xf32>
    %349 = vector.broadcast %348 : vector<64x1xf32> to vector<64x64xf32>
    %350 = arith.mulf %342, %349 : vector<64x64xf32>
    %c0_113 = arith.constant 0 : index
    %c0_114 = arith.constant 0 : index
    %351 = vector.load %arg15[%c0_113, %c0_114] : memref<64x1xf32, #tpu.memory_space<vmem>>, vector<64x1xf32>
    %cst_115 = arith.constant dense<0.000000e+00> : vector<64x1xf32>
    %352 = tpu.matmul %350, %351, %cst_115 {dimension_numbers = #tpu.dot_dimension_numbers<[1], [0], [0], [1], [0, 0, 1, 1], [], []>} : vector<64x64xf32>, vector<64x1xf32>, vector<64x1xf32> -> vector<64x1xf32>
    %c0_116 = arith.constant 0 : index
    %c0_117 = arith.constant 0 : index
    %353 = vector.load %arg16[%c0_116, %c0_117] : memref<1x1xf32, #tpu.memory_space<vmem>>, vector<1x1xf32>
    %354 = vector.broadcast %353 : vector<1x1xf32> to vector<64x1xf32>
    %355 = arith.addf %352, %354 : vector<64x1xf32>
    %356 = math.tanh %355 : vector<64x1xf32>
    %c0_118 = arith.constant 0 : index
    %c0_119 = arith.constant 0 : index
    %357 = vector.load %arg17[%c0_118, %c0_119] : memref<64x1xf32, #tpu.memory_space<vmem>>, vector<64x1xf32>
    tpu.vector_store %arg17[%c0_118, %c0_119], %356 {strides = array<i32>} : memref<64x1xf32, #tpu.memory_space<vmem>>, vector<64x1xf32>,
    %c0_120 = arith.constant 0 : index
    %c0_121 = arith.constant 0 : index
    %358 = vector.load %arg18[%c0_120, %c0_121] : memref<192x1xf32, #tpu.memory_space<vmem>>, vector<64x1xf32>
    tpu.vector_store %arg18[%c0_120, %c0_121], %330 {strides = array<i32>} : memref<192x1xf32, #tpu.memory_space<vmem>>, vector<64x1xf32>,
    %c64 = arith.constant 64 : index
    %c0_122 = arith.constant 0 : index
    %359 = vector.load %arg18[%c64, %c0_122] : memref<192x1xf32, #tpu.memory_space<vmem>>, vector<64x1xf32>
    tpu.vector_store %arg18[%c64, %c0_122], %331 {strides = array<i32>} : memref<192x1xf32, #tpu.memory_space<vmem>>, vector<64x1xf32>,
    %c128 = arith.constant 128 : index
    %c0_123 = arith.constant 0 : index
    %360 = vector.load %arg18[%c128, %c0_123] : memref<192x1xf32, #tpu.memory_space<vmem>>, vector<64x1xf32>
    tpu.vector_store %arg18[%c128, %c0_123], %332 {strides = array<i32>} : memref<192x1xf32, #tpu.memory_space<vmem>>, vector<64x1xf32>,
    return
  }
}

</mosaic_0001>

<bundles_post_ra>
// kernel: stock_hete_gat_forward.1
= control target key start
LH: loop header
LB: loop body
LE: loop exit
PB: predicated region body
PF: predicated region fallthrough
CT: control target
= control target key end

     0   :  { %s6450_s22 = smov 64   ;;  %vm243_vm0 = vcmask 523264   ;;  %vm4709_vm1 = vcmask 7168   ;;  %s8878_s0 = inlined_call_operand.vmem [shape: f32[512,192], index: 0, kind: input, shape index: {}]   ;;  %s8879_s5 = inlined_call_operand.vmem [shape: f32[1,64], index: 5, kind: input, shape index: {}]   ;;  %s8880_s4 = inlined_call_operand.vmem [shape: f32[64,192], index: 4, kind: input, shape index: {}]   ;;  %s8881_s6 = inlined_call_operand.vmem [shape: f32[64,320], index: 6, kind: input, shape index: {}]   ;;  %s8882_s1 = inlined_call_operand.vmem [shape: f32[64,64], index: 1, kind: input, shape index: {}]   ;;  %s8883_s2 = inlined_call_operand.vmem [shape: f32[64,64], index: 2, kind: input, shape index: {}]   ;;  %s8884_s8 = inlined_call_operand.vmem [shape: f32[64,64], index: 8, kind: input, shape index: {}]   ;;  %s8885_s10 = inlined_call_operand.vmem [shape: f32[64,64], index: 10, kind: input, shape index: {}]   ;;  %s8886_s12 = inlined_call_operand.vmem [shape: f32[64,64], index: 12, kind: input, shape index: {}]   ;;  %s8887_s7 = inlined_call_operand.vmem [shape: f32[1,64], index: 7, kind: input, shape index: {}]   ;;  %s8888_s14 = inlined_call_operand.vmem [shape: f32[64,1], index: 14, kind: input, shape index: {}]   ;;  %s8889_s13 = inlined_call_operand.vmem [shape: f32[1,64], index: 13, kind: input, shape index: {}]   ;;  %s8890_s9 = inlined_call_operand.vmem [shape: f32[1,64], index: 9, kind: input, shape index: {}]   ;;  %s8891_s11 = inlined_call_operand.vmem [shape: f32[1,64], index: 11, kind: input, shape index: {}]   ;;  %s8892_s18 = inlined_call_operand.vmem [shape: f32[192,1], index: 18, kind: output, shape index: {1}]   ;;  %s8893_s3 = inlined_call_operand.vmem [shape: f32[64,64], index: 3, kind: input, shape index: {}]   ;;  %s8894_s15 = inlined_call_operand.vmem [shape: f32[64,1], index: 15, kind: input, shape index: {}]   ;;  %s8895_s16 = inlined_call_operand.<no memory space> [shape: f32[1,1], index: 16, kind: input, shape index: {}]   ;;  %s8896_s17 = inlined_call_operand.vmem [shape: f32[64,1], index: 17, kind: output, shape index: {0}]  }
   0x1   :  { %8901 = sst [smem:[#allocation4_spill]] %s8878_s0 }
   0x2   :  { %8902 = sst [smem:[#allocation5_spill]] %s8879_s5  ;;  %s8904_s29 = sld [smem:[#allocation4_spill]] }
   0x3   :  { %8903 = sst [smem:[#allocation6_spill]] %s8880_s4  ;;  %s8905_s19 = sld [smem:[#allocation5_spill]] }
   0x4   :  { %s8906_s24 = sld [smem:[#allocation6_spill]] }
   0x8   :  { %v60_v0 = vld [vmem:[%s8904_s29] sm:$0xff]  ;;  %v62_v2 = vld [vmem:[%s8904_s29 + $0x10] sm:$0xff]  ;;  %v61_v34 = vld [vmem:[%s8904_s29 + $0x8] sm:$0xff] }
   0x9   :  { %v4757_v1 = vmul.f32 -1.442695, %v60_v0  ;;  %v64_v3 = vld [vmem:[%s8904_s29 + $0x20] sm:$0xff]  ;;  %v4758_v4 = vmul.f32 -1.442695, %v62_v2  ;;  %v66_v6 = vld [vmem:[%s8904_s29 + $0x30] sm:$0xff] }
   0xa   :  { %v4759_v5 = vmul.f32 -1.442695, %v64_v3  ;;  %v4760_v7 = vmul.f32 -1.442695, %v66_v6  ;;  %v68_v8 = vld [vmem:[%s8904_s29 + $0x40] sm:$0xff]  ;;  %v70_v10 = vld [vmem:[%s8904_s29 + $0x50] sm:$0xff] }
   0xb   :  { %5888 = vpow2.f32 %v4757_v1  ;;  %v4761_v9 = vmul.f32 -1.442695, %v68_v8  ;;  %v72_v11 = vld [vmem:[%s8904_s29 + $0x60] sm:$0xff]  ;;  %v4762_v12 = vmul.f32 -1.442695, %v70_v10  ;;  %v74_v14 = vld [vmem:[%s8904_s29 + $0x70] sm:$0xff] }
   0xc   :  { %5890 = vpow2.f32 %v4758_v4  ;;  %v4763_v13 = vmul.f32 -1.442695, %v72_v11  ;;  %v4764_v15 = vmul.f32 -1.442695, %v74_v14  ;;  %v6575_v32 = vld [vmem:[%s8905_s19] ss:$0 sm:$0xff] }
   0xd   :  { %5892 = vpow2.f32 %v4759_v5  ;;  %v63_v37 = vld [vmem:[%s8904_s29 + $0x18] sm:$0xff]  ;;  %v65_v40 = vld [vmem:[%s8904_s29 + $0x28] sm:$0xff]  ;;  %v203_v8 = vld [vmem:[%s8906_s24] sm:$0xff] }
   0xe   :  { %5894 = vpow2.f32 %v4760_v7  ;;  %v67_v44 = vld [vmem:[%s8904_s29 + $0x38] sm:$0xff]  ;;  %v69_v48 = vld [vmem:[%s8904_s29 + $0x48] sm:$0xff] }
   0xf   :  { %5896 = vpow2.f32 %v4761_v9  ;;  %v71_v54 = vld [vmem:[%s8904_s29 + $0x58] sm:$0xff]  ;;  %v73_v59 = vld [vmem:[%s8904_s29 + $0x68] sm:$0xff]  ;;  %v6451_v9 = vmov 0.0  }
  0x10   :  { %5898 = vpow2.f32 %v4762_v12  ;;  %v75_v62 = vld [vmem:[%s8904_s29 + $0x78] sm:$0xff]  ;;  %v204_v6 = vld [vmem:[%s8906_s24 + $0x8] sm:$0xff]  ;;  %324 = vmatprep.mubr.f32.mxu0 %v6451_v9  ;;  %v205_v12 = vld [vmem:[%s8906_s24 + $0x10] sm:$0xff]  ;;  %648 = vmatprep.mubr.f32.mxu1 %v6451_v9 }
  0x11   :  { %5900 = vpow2.f32 %v4763_v13  ;;  %v206_v7 = vld [vmem:[%s8906_s24 + $0x18] sm:$0xff]  ;;  %v208_v13 = vld [vmem:[%s8906_s24 + $0x28] sm:$0xff] }
  0x12   :  { %5902 = vpow2.f32 %v4764_v15  ;;  %v6647_v11 = vpack.c.bf16 %v206_v7, %v204_v6  ;;  %v210_v14 = vld [vmem:[%s8906_s24 + $0x38] sm:$0xff]  ;;  %v6660_v15 = vpack.c.bf16 %v205_v12, %v203_v8  ;;  %v4776_v7 = vld [vmem:[%s8904_s29 + $0x90] sm:$0xff] }
  0x14   :  { %5584 = vmatprep.subr.bf16.mxu0 %v6647_v11  ;;  %5600 = vmatprep.subr.bf16.mxu1 %v6647_v11 }
  0x15   :  { %v5889_v16 = vpop.eup %5888  ;;  %5586 = vmatpush1.bf16.msra.mxu0 %v6660_v15  ;;  %5602 = vmatpush1.bf16.msra.mxu1 %v6660_v15 }
  0x16   :  { %v5891_v17 = vpop.eup %5890  ;;  %v100_v18 = vadd.f32 1.0, %v5889_v16  ;;  %v6662_v16 = vpack.c.bf16 %v210_v14, %v208_v13  ;;  %v4778_v14 = vld [vmem:[%s8904_s29 + $0xa0] sm:$0xff] }
  0x17   :  { %v5893_v19 = vpop.eup %5892  ;;  %v101_v20 = vadd.f32 1.0, %v5891_v17  ;;  %v207_v17 = vld [vmem:[%s8906_s24 + $0x20] sm:$0xff] }
  0x18   :  { %v5895_v21 = vpop.eup %5894  ;;  %5904 = vrcp.f32 %v100_v18  ;;  %v102_v22 = vadd.f32 1.0, %v5893_v19  ;;  %v209_v18 = vld [vmem:[%s8906_s24 + $0x30] sm:$0xff]  ;;  %v212_v19 = vld [vmem:[%s8906_s24 + $0x48] sm:$0xff]  ;;  %5588 = vmatprep.subr.bf16.mxu0 %v6662_v16  ;;  %5604 = vmatprep.subr.bf16.mxu1 %v6662_v16 }
  0x19   :  { %v5897_v23 = vpop.eup %5896  ;;  %5906 = vrcp.f32 %v101_v20  ;;  %v103_v24 = vadd.f32 1.0, %v5895_v21  ;;  %v214_v21 = vld [vmem:[%s8906_s24 + $0x58] sm:$0xff] }
  0x1a   :  { %v5899_v25 = vpop.eup %5898  ;;  %5908 = vrcp.f32 %v102_v22  ;;  %v104_v26 = vadd.f32 1.0, %v5897_v23  ;;  %v6680_v22 = vpack.c.bf16 %v209_v18, %v207_v17 }
  0x1b   :  { %v5901_v27 = vpop.eup %5900  ;;  %5910 = vrcp.f32 %v103_v24  ;;  %v105_v28 = vadd.f32 1.0, %v5899_v25  ;;  %v6683_v24 = vpack.c.bf16 %v214_v21, %v212_v19  ;;  %v211_v25 = vld [vmem:[%s8906_s24 + $0x40] sm:$0xff]  ;;  %v4780_v21 = vld [vmem:[%s8904_s29 + $0xb0] sm:$0xff] }
  0x1c   :  { %v5903_v29 = vpop.eup %5902  ;;  %5912 = vrcp.f32 %v104_v26  ;;  %v106_v30 = vadd.f32 1.0, %v5901_v27  ;;  %v213_v26 = vld [vmem:[%s8906_s24 + $0x50] sm:$0xff]  ;;  %v216_v27 = vld [vmem:[%s8906_s24 + $0x68] sm:$0xff]  ;;  %5590 = vmatpush1.bf16.msra.mxu0 %v6680_v22  ;;  %5606 = vmatpush1.bf16.msra.mxu1 %v6680_v22 }
  0x1d   :  { %5914 = vrcp.f32 %v105_v28  ;;  %v107_v31 = vadd.f32 1.0, %v5903_v29  ;;  %v218_v28 = vld [vmem:[%s8906_s24 + $0x78] sm:$0xff]  ;;  %v6702_v29 = vpack.c.bf16 %v213_v26, %v211_v25  ;;  %5592 = vmatprep.subr.bf16.mxu0 %v6683_v24  ;;  %5608 = vmatprep.subr.bf16.mxu1 %v6683_v24 }
  0x1e   :  { %5916 = vrcp.f32 %v106_v30  ;;  %v6705_v30 = vpack.c.bf16 %v218_v28, %v216_v27  ;;  %v4782_v28 = vld [vmem:[%s8904_s29 + $0xc0] sm:$0xff] }
  0x1f   :  { %5918 = vrcp.f32 %v107_v31  ;;  %v215_v31 = vld [vmem:[%s8906_s24 + $0x60] sm:$0xff] }
  0x20   :  { %5594 = vmatpush1.bf16.msra.mxu0 %v6702_v29  ;;  %5610 = vmatpush1.bf16.msra.mxu1 %v6702_v29 }
  0x21   :  { %5596 = vmatprep.subr.bf16.mxu0 %v6705_v30  ;;  %5612 = vmatprep.subr.bf16.mxu1 %v6705_v30 }
  0x22   :  { %v6577_v33 = vpop.eup %5904 }
  0x23   :  { %v6582_v35 = vpop.eup %5906  ;;  %v131_v36 = vmul.f32 %v6577_v33, %v6575_v32 }
  0x24   :  { %v6589_v38 = vpop.eup %5908  ;;  %v132_v39 = vmul.f32 %v6582_v35, %v6575_v32 }
  0x25   :  { %v6596_v41 = vpop.eup %5910  ;;  %v139_v42 = vadd.f32 %v131_v36, %v61_v34  ;;  %v133_v43 = vmul.f32 %v6589_v38, %v6575_v32  ;;  %v217_v34 = vld [vmem:[%s8906_s24 + $0x70] sm:$0xff] }
  0x26   :  { %v6603_v45 = vpop.eup %5912  ;;  %v140_v46 = vadd.f32 %v132_v39, %v63_v37  ;;  %v134_v47 = vmul.f32 %v6596_v41, %v6575_v32  ;;  %v6716_v36 = vpack.c.bf16 %v217_v34, %v215_v31  ;;  %v155_v37 = vsub.f32 1.0, %v6577_v33 }
  0x27   :  { %v6610_v49 = vpop.eup %5914  ;;  %5920 = vtanh.f32 %v139_v42  ;;  %v141_v50 = vadd.f32 %v133_v43, %v65_v40  ;;  %v135_v51 = vmul.f32 %v6603_v45, %v6575_v32  ;;  %v157_v39 = vsub.f32 1.0, %v6589_v38 }
  0x28   :  { %v6614_v52 = vpop.eup %5916  ;;  %5922 = vtanh.f32 %v140_v46  ;;  %v142_v53 = vadd.f32 %v134_v47, %v67_v44  ;;  %v136_v55 = vmul.f32 %v6610_v49, %v6575_v32  ;;  %5598 = vmatpush1.bf16.msra.mxu0 %v6716_v36  ;;  %5614 = vmatpush1.bf16.msra.mxu1 %v6716_v36  ;;  %v156_v43 = vsub.f32 1.0, %v6582_v35 }
  0x29   :  { %v6621_v56 = vpop.eup %5918  ;;  %5924 = vtanh.f32 %v141_v50  ;;  %v143_v57 = vadd.f32 %v135_v51, %v69_v48  ;;  %v137_v58 = vmul.f32 %v6614_v52, %v6575_v32  ;;  %5616 = vmatprep.subr.bf16.mxu0 %v6647_v11  ;;  %5632 = vmatprep.subr.bf16.mxu1 %v6647_v11  ;;  %v158_v47 = vsub.f32 1.0, %v6596_v41 }
  0x2a   :  { %5926 = vtanh.f32 %v142_v53  ;;  %v144_v60 = vadd.f32 %v136_v55, %v71_v54  ;;  %v138_v61 = vmul.f32 %v6621_v56, %v6575_v32  ;;  %v159_v33 = vsub.f32 1.0, %v6603_v45 }
  0x2b   :  { %5928 = vtanh.f32 %v143_v57  ;;  %v145_v63 = vadd.f32 %v137_v58, %v73_v59  ;;  %v160_v38 = vsub.f32 1.0, %v6610_v49  ;;  %v161_v41 = vsub.f32 1.0, %v6614_v52 }
  0x2c   :  { %5930 = vtanh.f32 %v144_v60  ;;  %v146_v0 = vadd.f32 %v138_v61, %v75_v62  ;;  %v162_v57 = vsub.f32 1.0, %v6621_v56 }
  0x2d   :  { %5932 = vtanh.f32 %v145_v63 }
  0x2e   :  { %5934 = vtanh.f32 %v146_v0 }
  0x31   :  { %v5921_v1 = vpop.eup %5920 }
  0x32   :  { %v5923_v2 = vpop.eup %5922  ;;  %171 = vrot.lane.b32.xlu0 %v5921_v1, %s6450_s22 }
  0x33   :  { %v5925_v3 = vpop.eup %5924 }
  0x34   :  { %175 = vrot.lane.b32.xlu1 %v5925_v3, %s6450_s22  ;;  %v5927_v4 = vpop.eup %5926  ;;  %v4774_v3 = vld [vmem:[%s8904_s29 + $0x80] sm:$0xff] }
  0x35   :  { %v5929_v5 = vpop.eup %5928 }
  0x36   :  { %173 = vrot.lane.b32.xlu0 %v5923_v2, %s6450_s22  ;;  %v5931_v10 = vpop.eup %5930 }
  0x37   :  { %v5933_v20 = vpop.eup %5932 }
  0x38   :  { %177 = vrot.lane.b32.xlu1 %v5927_v4, %s6450_s22  ;;  %v5935_v23 = vpop.eup %5934 }
  0x3a   :  { %179 = vrot.lane.b32.xlu0 %v5929_v5, %s6450_s22 }
  0x3c   :  { %181 = vrot.lane.b32.xlu1 %v5931_v10, %s6450_s22 }
  0x3e   :  { %183 = vrot.lane.b32.xlu0 %v5933_v20, %s6450_s22 }
  0x40   :  { %185 = vrot.lane.b32.xlu1 %v5935_v23, %s6450_s22 }
  0xa4   :  { %v172_v40 = vpop.permute.xlu0 %171 }
  0xa5   :  { %v6727_v42 = vmul.f32 %v172_v40, %v155_v37 }
  0xa6   :  { %v176_v44 = vpop.permute.xlu1 %175 }
  0xa7   :  { %227 = vrot.lane.b32.xlu0 %v6727_v42, %s6450_s22  ;;  %v6732_v46 = vmul.f32 %v176_v44, %v157_v39  ;;  %v4784_v44 = vld [vmem:[%s8904_s29 + $0xd0] sm:$0xff] }
  0xa8   :  { %v174_v48 = vpop.permute.xlu0 %173 }
  0xa9   :  { %v6735_v50 = vmul.f32 %v174_v48, %v156_v43 }
  0xaa   :  { %v178_v51 = vpop.permute.xlu1 %177 }
  0xab   :  { %229 = vrot.lane.b32.xlu1 %v6735_v50, %s6450_s22  ;;  %231 = vrot.lane.b32.xlu0 %v6732_v46, %s6450_s22  ;;  %v6742_v35 = vmul.f32 %v178_v51, %v158_v47 }
  0xac   :  { %v180_v53 = vpop.permute.xlu0 %179 }
  0xad   :  { %v6745_v54 = vmul.f32 %v180_v53, %v159_v33 }
  0xae   :  { %v182_v55 = vpop.permute.xlu1 %181 }
  0xaf   :  { %233 = vrot.lane.b32.xlu1 %v6742_v35, %s6450_s22  ;;  %235 = vrot.lane.b32.xlu0 %v6745_v54, %s6450_s22  ;;  %v6752_v45 = vmul.f32 %v182_v55, %v160_v38 }
  0xb0   :  { %v184_v58 = vpop.permute.xlu0 %183 }
  0xb1   :  { %v6755_v59 = vmul.f32 %v184_v58, %v161_v41  ;;  %v4786_v41 = vld [vmem:[%s8904_s29 + $0xe0] sm:$0xff] }
  0xb2   :  { %v186_v49 = vpop.permute.xlu1 %185 }
  0xb3   :  { %237 = vrot.lane.b32.xlu1 %v6752_v45, %s6450_s22  ;;  %239 = vrot.lane.b32.xlu0 %v6755_v59, %s6450_s22  ;;  %v6761_v52 = vmul.f32 %v186_v49, %v162_v57 }
  0xb7   :  { %241 = vrot.lane.b32.xlu1 %v6761_v52, %s6450_s22 }
 0x119   :  { %v228_v60 = vpop.permute.xlu0 %227 }
 0x11a   :  { %4766 = vmatmul.mubr.msk.f32.vlgmr.msra.gmra.mrb[0].mxu0 %vm243_vm0, %v228_v60 }
 0x11b   :  { %330 = vmatprep.mubr.f32.mxu0 %v6451_v9  ;;  %5618 = vmatpush1.bf16.msra.mxu0 %v6660_v15 }
 0x11c   :  { %5620 = vmatprep.subr.bf16.mxu0 %v6662_v16 }
 0x11d   :  { %v230_v56 = vpop.permute.xlu1 %229  ;;  %v232_v61 = vpop.permute.xlu0 %231 }
 0x11e   :  { %4767 = vmatmul.mubr.msk.f32.gmra.mrb[2].mxu0 %vm243_vm0, %v230_v56 }
 0x11f   :  { %336 = vmatprep.mubr.f32.mxu0 %v6451_v9  ;;  %5622 = vmatpush1.bf16.msra.mxu0 %v6680_v22 }
 0x120   :  { %5624 = vmatprep.subr.bf16.mxu0 %v6683_v24 }
 0x121   :  { %v234_v62 = vpop.permute.xlu1 %233  ;;  %v236_v63 = vpop.permute.xlu0 %235 }
 0x122   :  { %4768 = vmatmul.mubr.msk.f32.gmra.mrb[4].mxu0 %vm243_vm0, %v232_v61  ;;  %v4788_v61 = vld [vmem:[%s8904_s29 + $0xf0] sm:$0xff] }
 0x123   :  { %342 = vmatprep.mubr.f32.mxu0 %v6451_v9  ;;  %5626 = vmatpush1.bf16.msra.mxu0 %v6702_v29 }
 0x124   :  { %5628 = vmatprep.subr.bf16.mxu0 %v6705_v30 }
 0x125   :  { %v238_v0 = vpop.permute.xlu1 %237  ;;  %v240_v1 = vpop.permute.xlu0 %239 }
 0x126   :  { %4769 = vmatmul.mubr.msk.f32.gmra.mrb[6].mxu0 %vm243_vm0, %v234_v62 }
 0x127   :  { %348 = vmatprep.mubr.f32.mxu0 %v6451_v9  ;;  %5630 = vmatpush1.bf16.msra.mxu0 %v6716_v36 }
 0x128   :  { %5648 = vmatprep.subr.bf16.mxu0 %v6647_v11 }
 0x129   :  { %v242_v2 = vpop.permute.xlu1 %241 }
 0x12a   :  { %4770 = vmatmul.mubr.msk.f32.gmra.mrb[8].mxu0 %vm243_vm0, %v236_v63 }
 0x12b   :  { %354 = vmatprep.mubr.f32.mxu0 %v6451_v9 }
 0x12e   :  { %4771 = vmatmul.mubr.msk.f32.gmra.mrb[10].mxu0 %vm243_vm0, %v238_v0 }
 0x12f   :  { %360 = vmatprep.mubr.f32.mxu0 %v6451_v9 }
 0x132   :  { %4772 = vmatmul.mubr.msk.f32.gmra.mrb[12].mxu0 %vm243_vm0, %v240_v1 }
 0x133   :  { %366 = vmatprep.mubr.f32.mxu0 %v6451_v9 }
 0x136   :  { %4773 = vmatmul.mubr.msk.f32.gmra.mrb[14].mxu0 %vm243_vm0, %v242_v2  ;;  %v4775_v2 = vld [vmem:[%s8904_s29 + $0x88] sm:$0xff] }
 0x137   :  { %972 = vmatprep.mubr.f32.mxu0 %v6451_v9 }
 0x1ed   :  { %v326_v4 = vpop.f32.mrb[0].mxu0 }
 0x1ee   :  { %v392_v5 = vadd.f32 %v4774_v3, %v326_v4  ;;  %v328_v6 = vpop.f32.mrb[1].mxu0 }
 0x1ef   :  { %v448_v63 = vadd.f32 %v6575_v32, %v328_v6 }
 0x1f0   :  { %v4790_v8 = vmul.f32 -1.442695, %v392_v5 }
 0x1f1   :  { %v332_v10 = vpop.f32.mrb[2].mxu0 }
 0x1f2   :  { %5936 = vpow2.f32 %v4790_v8  ;;  %v393_v12 = vadd.f32 %v4776_v7, %v332_v10  ;;  %v334_v13 = vpop.f32.mrb[3].mxu0 }
 0x1f4   :  { %v4791_v17 = vmul.f32 -1.442695, %v393_v12 }
 0x1f5   :  { %v338_v18 = vpop.f32.mrb[4].mxu0 }
 0x1f6   :  { %5938 = vpow2.f32 %v4791_v17  ;;  %v394_v19 = vadd.f32 %v4778_v14, %v338_v18  ;;  %v340_v20 = vpop.f32.mrb[5].mxu0  ;;  %v449_v14 = vadd.f32 %v6575_v32, %v334_v13  ;;  %v4777_v18 = vld [vmem:[%s8904_s29 + $0x98] sm:$0xff]  ;;  %v4779_v13 = vld [vmem:[%s8904_s29 + $0xa8] sm:$0xff] }
 0x1f8   :  { %v4792_v23 = vmul.f32 -1.442695, %v394_v19 }
 0x1f9   :  { %v344_v25 = vpop.f32.mrb[6].mxu0 }
 0x1fa   :  { %5940 = vpow2.f32 %v4792_v23  ;;  %v395_v26 = vadd.f32 %v4780_v21, %v344_v25  ;;  %v6801_v27 = vpop.f32.mrb[7].mxu0 }
 0x1fc   :  { %v5937_v31 = vpop.eup %5936  ;;  %v4793_v34 = vmul.f32 -1.442695, %v395_v26  ;;  %v450_v26 = vadd.f32 %v6575_v32, %v340_v20  ;;  %v4781_v20 = vld [vmem:[%s8904_s29 + $0xb8] sm:$0xff] }
 0x1fd   :  { %v424_v37 = vadd.f32 1.0, %v5937_v31  ;;  %v350_v39 = vpop.f32.mrb[8].mxu0 }
 0x1fe   :  { %5942 = vpow2.f32 %v4793_v34  ;;  %v396_v40 = vadd.f32 %v4782_v28, %v350_v39  ;;  %v6806_v43 = vpop.f32.mrb[9].mxu0 }
 0x1ff   :  { %5944 = vrcp.f32 %v424_v37 }
 0x200   :  { %v5939_v47 = vpop.eup %5938  ;;  %v4794_v48 = vmul.f32 -1.442695, %v396_v40  ;;  %v451_v40 = vadd.f32 %v6575_v32, %v6801_v27  ;;  %v4783_v27 = vld [vmem:[%s8904_s29 + $0xc8] sm:$0xff] }
 0x201   :  { %v425_v33 = vadd.f32 1.0, %v5939_v47  ;;  %v356_v51 = vpop.f32.mrb[10].mxu0 }
 0x202   :  { %5946 = vpow2.f32 %v4794_v48  ;;  %v397_v38 = vadd.f32 %v4784_v44, %v356_v51  ;;  %v6811_v53 = vpop.f32.mrb[11].mxu0 }
 0x203   :  { %5948 = vrcp.f32 %v425_v33 }
 0x204   :  { %v5941_v55 = vpop.eup %5940  ;;  %v4795_v57 = vmul.f32 -1.442695, %v397_v38  ;;  %v452_v38 = vadd.f32 %v6575_v32, %v6806_v43  ;;  %v4785_v43 = vld [vmem:[%s8904_s29 + $0xd8] sm:$0xff] }
 0x205   :  { %v426_v58 = vadd.f32 1.0, %v5941_v55  ;;  %v362_v49 = vpop.f32.mrb[12].mxu0 }
 0x206   :  { %5950 = vpow2.f32 %v4795_v57  ;;  %v398_v60 = vadd.f32 %v4786_v41, %v362_v49  ;;  %v6816_v56 = vpop.f32.mrb[13].mxu0 }
 0x207   :  { %5952 = vrcp.f32 %v426_v58 }
 0x208   :  { %v5943_v62 = vpop.eup %5942  ;;  %v4796_v0 = vmul.f32 -1.442695, %v398_v60 }
 0x209   :  { %v6822_v1 = vpop.eup %5944  ;;  %v427_v3 = vadd.f32 1.0, %v5943_v62  ;;  %v368_v4 = vpop.f32.mrb[14].mxu0 }
 0x20a   :  { %v456_v5 = vmul.f32 %v6822_v1, %v448_v63  ;;  %5954 = vpow2.f32 %v4796_v0  ;;  %v399_v7 = vadd.f32 %v4788_v61, %v368_v4  ;;  %v370_v8 = vpop.f32.mrb[15].mxu0  ;;  %v453_v61 = vadd.f32 %v6575_v32, %v6811_v53  ;;  %v4787_v53 = vld [vmem:[%s8904_s29 + $0xe8] sm:$0xff] }
 0x20b   :  { %5956 = vrcp.f32 %v427_v3  ;;  %v454_v3 = vadd.f32 %v6575_v32, %v6816_v56  ;;  %v4789_v56 = vld [vmem:[%s8904_s29 + $0xf8] sm:$0xff] }
 0x20c   :  { %v5947_v10 = vpop.eup %5946  ;;  %v464_v12 = vadd.f32 %v4775_v2, %v456_v5  ;;  %v4797_v6 = vmul.f32 -1.442695, %v399_v7 }
 0x20d   :  { %v6829_v17 = vpop.eup %5948  ;;  %v428_v19 = vadd.f32 1.0, %v5947_v10 }
 0x20e   :  { %5958 = vtanh.f32 %v464_v12  ;;  %v457_v21 = vmul.f32 %v6829_v17, %v449_v14  ;;  %v455_v12 = vadd.f32 %v6575_v32, %v370_v8  ;;  %v480_v8 = vsub.f32 1.0, %v6822_v1 }
 0x20f   :  { %5960 = vrcp.f32 %v428_v19 }
 0x210   :  { %v5951_v23 = vpop.eup %5950  ;;  %v465_v25 = vadd.f32 %v4777_v18, %v457_v21  ;;  %5962 = vpow2.f32 %v4797_v6 }
 0x211   :  { %v6836_v28 = vpop.eup %5952  ;;  %v429_v31 = vadd.f32 1.0, %v5951_v23 }
 0x212   :  { %5964 = vtanh.f32 %v465_v25  ;;  %v458_v34 = vmul.f32 %v6836_v28, %v450_v26 }
 0x213   :  { %5966 = vrcp.f32 %v429_v31 }
 0x214   :  { %v5955_v37 = vpop.eup %5954  ;;  %v466_v39 = vadd.f32 %v4779_v13, %v458_v34  ;;  %v528_v13 = vmul.f32 %v6822_v1, %v6727_v42  ;;  %v530_v42 = vmul.f32 %v6836_v28, %v6732_v46 }
 0x215   :  { %v6844_v44 = vpop.eup %5956  ;;  %v430_v47 = vadd.f32 1.0, %v5955_v37  ;;  %v481_v37 = vsub.f32 1.0, %v6829_v17 }
 0x216   :  { %5968 = vtanh.f32 %v466_v39  ;;  %v459_v48 = vmul.f32 %v6844_v44, %v451_v40  ;;  %v529_v40 = vmul.f32 %v6829_v17, %v6735_v50  ;;  %v483_v50 = vsub.f32 1.0, %v6844_v44 }
 0x217   :  { %5970 = vrcp.f32 %v430_v47 }
 0x218   :  { %v5959_v33 = vpop.eup %5958  ;;  %v467_v51 = vadd.f32 %v4781_v20, %v459_v48  ;;  %v482_v48 = vsub.f32 1.0, %v6836_v28 }
 0x219   :  { %v6852_v41 = vpop.eup %5960  ;;  %496 = vrot.lane.b32.xlu0 %v5959_v33, %s6450_s22 }
 0x21a   :  { %v5963_v55 = vpop.eup %5962  ;;  %5972 = vtanh.f32 %v467_v51  ;;  %v460_v57 = vmul.f32 %v6852_v41, %v452_v38  ;;  %v531_v38 = vmul.f32 %v6844_v44, %v6742_v35  ;;  %v484_v46 = vsub.f32 1.0, %v6852_v41 }
 0x21b   :  { %v431_v58 = vadd.f32 1.0, %v5963_v55 }
 0x21c   :  { %v5965_v49 = vpop.eup %5964  ;;  %v468_v60 = vadd.f32 %v4783_v27, %v460_v57  ;;  %v532_v57 = vmul.f32 %v6852_v41, %v6745_v54 }
 0x21d   :  { %v6861_v62 = vpop.eup %5966  ;;  %5974 = vrcp.f32 %v431_v58  ;;  %498 = vrot.lane.b32.xlu1 %v5965_v49, %s6450_s22 }
 0x21e   :  { %5976 = vtanh.f32 %v468_v60  ;;  %v461_v63 = vmul.f32 %v6861_v62, %v453_v61  ;;  %v485_v35 = vsub.f32 1.0, %v6861_v62  ;;  %v533_v60 = vmul.f32 %v6861_v62, %v6752_v45 }
 0x220   :  { %v5969_v0 = vpop.eup %5968  ;;  %v469_v2 = vadd.f32 %v4785_v43, %v461_v63 }
 0x221   :  { %v5971_v4 = vpop.eup %5970  ;;  %500 = vrot.lane.b32.xlu0 %v5969_v0, %s6450_s22 }
 0x222   :  { %5978 = vtanh.f32 %v469_v2  ;;  %v462_v5 = vmul.f32 %v5971_v4, %v454_v3  ;;  %v486_v63 = vsub.f32 1.0, %v5971_v4  ;;  %v534_v41 = vmul.f32 %v5971_v4, %v6755_v59 }
 0x224   :  { %v5973_v7 = vpop.eup %5972  ;;  %v470_v10 = vadd.f32 %v4787_v53, %v462_v5 }
 0x225   :  { %502 = vrot.lane.b32.xlu1 %v5973_v7, %s6450_s22 }
 0x226   :  { %5980 = vtanh.f32 %v470_v10 }
 0x227   :  { %v5975_v14 = vpop.eup %5974 }
 0x228   :  { %v5977_v6 = vpop.eup %5976  ;;  %v463_v18 = vmul.f32 %v5975_v14, %v455_v12  ;;  %v487_v3 = vsub.f32 1.0, %v5975_v14  ;;  %v535_v62 = vmul.f32 %v5975_v14, %v6761_v52 }
 0x229   :  { %504 = vrot.lane.b32.xlu0 %v5977_v6, %s6450_s22  ;;  %v4806_v6 = vld [vmem:[%s8904_s29 + $0x100] sm:$0xff] }
 0x22a   :  { %v471_v19 = vadd.f32 %v4789_v56, %v463_v18 }
 0x22c   :  { %v5979_v21 = vpop.eup %5978  ;;  %5982 = vtanh.f32 %v471_v19 }
 0x22d   :  { %506 = vrot.lane.b32.xlu1 %v5979_v21, %s6450_s22 }
 0x230   :  { %v5981_v23 = vpop.eup %5980 }
 0x231   :  { %508 = vrot.lane.b32.xlu0 %v5981_v23, %s6450_s22  ;;  %v4808_v23 = vld [vmem:[%s8904_s29 + $0x110] sm:$0xff] }
 0x236   :  { %v5983_v25 = vpop.eup %5982 }
 0x237   :  { %510 = vrot.lane.b32.xlu1 %v5983_v25, %s6450_s22 }
 0x28b   :  { %v497_v26 = vpop.permute.xlu0 %496 }
 0x28c   :  { %v520_v31 = vmul.f32 %v497_v26, %v480_v8 }
 0x28e   :  { %v6886_v34 = vadd.f32 %v528_v13, %v520_v31  ;;  %v4810_v31 = vld [vmem:[%s8904_s29 + $0x120] sm:$0xff] }
 0x28f   :  { %v499_v39 = vpop.permute.xlu1 %498 }
 0x290   :  { %v521_v20 = vmul.f32 %v499_v39, %v481_v37  ;;  %552 = vrot.lane.b32.xlu0 %v6886_v34, %s6450_s22 }
 0x292   :  { %v6893_v47 = vadd.f32 %v529_v40, %v521_v20 }
 0x293   :  { %v501_v33 = vpop.permute.xlu0 %500 }
 0x294   :  { %v522_v1 = vmul.f32 %v501_v33, %v482_v48  ;;  %554 = vrot.lane.b32.xlu1 %v6893_v47, %s6450_s22  ;;  %v4812_v48 = vld [vmem:[%s8904_s29 + $0x130] sm:$0xff] }
 0x296   :  { %v6900_v51 = vadd.f32 %v530_v42, %v522_v1 }
 0x297   :  { %v503_v17 = vpop.permute.xlu1 %502 }
 0x298   :  { %v523_v27 = vmul.f32 %v503_v17, %v483_v50  ;;  %556 = vrot.lane.b32.xlu0 %v6900_v51, %s6450_s22  ;;  %v4814_v17 = vld [vmem:[%s8904_s29 + $0x140] sm:$0xff] }
 0x29a   :  { %v6907_v55 = vadd.f32 %v531_v38, %v523_v27 }
 0x29b   :  { %v505_v28 = vpop.permute.xlu0 %504 }
 0x29c   :  { %v524_v58 = vmul.f32 %v505_v28, %v484_v46  ;;  %558 = vrot.lane.b32.xlu1 %v6907_v55, %s6450_s22 }
 0x29e   :  { %v6914_v49 = vadd.f32 %v532_v57, %v524_v58 }
 0x29f   :  { %v507_v44 = vpop.permute.xlu1 %506 }
 0x2a0   :  { %v525_v61 = vmul.f32 %v507_v44, %v485_v35  ;;  %560 = vrot.lane.b32.xlu0 %v6914_v49, %s6450_s22  ;;  %v4816_v35 = vld [vmem:[%s8904_s29 + $0x150] sm:$0xff] }
 0x2a2   :  { %v6921_v43 = vadd.f32 %v533_v60, %v525_v61 }
 0x2a3   :  { %v509_v54 = vpop.permute.xlu0 %508 }
 0x2a4   :  { %v526_v0 = vmul.f32 %v509_v54, %v486_v63  ;;  %562 = vrot.lane.b32.xlu1 %v6921_v43, %s6450_s22 }
 0x2a6   :  { %v6926_v2 = vadd.f32 %v534_v41, %v526_v0  ;;  %v4818_v0 = vld [vmem:[%s8904_s29 + $0x160] sm:$0xff] }
 0x2a8   :  { %564 = vrot.lane.b32.xlu0 %v6926_v2, %s6450_s22 }
 0x2a9   :  { %v511_v45 = vpop.permute.xlu1 %510 }
 0x2aa   :  { %v527_v53 = vmul.f32 %v511_v45, %v487_v3 }
 0x2ac   :  { %v6931_v5 = vadd.f32 %v535_v62, %v527_v53 }
 0x2ae   :  { %566 = vrot.lane.b32.xlu1 %v6931_v5, %s6450_s22 }
 0x302   :  { %v553_v59 = vpop.permute.xlu0 %552 }
 0x303   :  { %4798 = vmatmul.mubr.msk.f32.vlgmr.msra.gmra.mrb[0].mxu1 %vm243_vm0, %v553_v59 }
 0x304   :  { %654 = vmatprep.mubr.f32.mxu1 %v6451_v9  ;;  %5634 = vmatpush1.bf16.msra.mxu1 %v6660_v15 }
 0x305   :  { %5636 = vmatprep.subr.bf16.mxu1 %v6662_v16 }
 0x306   :  { %v555_v4 = vpop.permute.xlu1 %554 }
 0x307   :  { %4799 = vmatmul.mubr.msk.f32.gmra.mrb[2].mxu1 %vm243_vm0, %v555_v4 }
 0x308   :  { %660 = vmatprep.mubr.f32.mxu1 %v6451_v9  ;;  %5638 = vmatpush1.bf16.msra.mxu1 %v6680_v22 }
 0x309   :  { %5640 = vmatprep.subr.bf16.mxu1 %v6683_v24 }
 0x30a   :  { %v557_v52 = vpop.permute.xlu0 %556 }
 0x30b   :  { %4800 = vmatmul.mubr.msk.f32.gmra.mrb[4].mxu1 %vm243_vm0, %v557_v52 }
 0x30c   :  { %666 = vmatprep.mubr.f32.mxu1 %v6451_v9  ;;  %5642 = vmatpush1.bf16.msra.mxu1 %v6702_v29 }
 0x30d   :  { %5644 = vmatprep.subr.bf16.mxu1 %v6705_v30 }
 0x30e   :  { %v559_v7 = vpop.permute.xlu1 %558 }
 0x30f   :  { %4801 = vmatmul.mubr.msk.f32.gmra.mrb[6].mxu1 %vm243_vm0, %v559_v7 }
 0x310   :  { %672 = vmatprep.mubr.f32.mxu1 %v6451_v9  ;;  %5646 = vmatpush1.bf16.msra.mxu1 %v6716_v36 }
 0x311   :  { %5664 = vmatprep.subr.bf16.mxu1 %v6647_v11 }
 0x312   :  { %v561_v10 = vpop.permute.xlu0 %560 }
 0x313   :  { %4802 = vmatmul.mubr.msk.f32.gmra.mrb[8].mxu1 %vm243_vm0, %v561_v10 }
 0x314   :  { %678 = vmatprep.mubr.f32.mxu1 %v6451_v9 }
 0x316   :  { %v563_v12 = vpop.permute.xlu1 %562 }
 0x317   :  { %4803 = vmatmul.mubr.msk.f32.gmra.mrb[10].mxu1 %vm243_vm0, %v563_v12 }
 0x318   :  { %684 = vmatprep.mubr.f32.mxu1 %v6451_v9 }
 0x31a   :  { %v565_v14 = vpop.permute.xlu0 %564 }
 0x31b   :  { %4804 = vmatmul.mubr.msk.f32.gmra.mrb[12].mxu1 %vm243_vm0, %v565_v14  ;;  %v4807_v14 = vld [vmem:[%s8904_s29 + $0x108] sm:$0xff] }
 0x31c   :  { %690 = vmatprep.mubr.f32.mxu1 %v6451_v9 }
 0x320   :  { %v567_v56 = vpop.permute.xlu1 %566 }
 0x321   :  { %4805 = vmatmul.mubr.msk.f32.gmra.mrb[14].mxu1 %vm243_vm0, %v567_v56 }
 0x322   :  { %1296 = vmatprep.mubr.f32.mxu1 %v6451_v9 }
 0x3d6   :  { %v650_v18 = vpop.f32.mrb[0].mxu1 }
 0x3d7   :  { %v716_v19 = vadd.f32 %v4806_v6, %v650_v18  ;;  %v652_v21 = vpop.f32.mrb[1].mxu1  ;;  %v4820_v6 = vld [vmem:[%s8904_s29 + $0x170] sm:$0xff] }
 0x3d8   :  { %v772_v7 = vadd.f32 %v6575_v32, %v652_v21 }
 0x3d9   :  { %v4822_v25 = vmul.f32 -1.442695, %v716_v19 }
 0x3da   :  { %v656_v8 = vpop.f32.mrb[2].mxu1 }
 0x3db   :  { %5984 = vpow2.f32 %v4822_v25  ;;  %v717_v26 = vadd.f32 %v4808_v23, %v656_v8  ;;  %v658_v13 = vpop.f32.mrb[3].mxu1 }
 0x3dc   :  { %v773_v21 = vadd.f32 %v6575_v32, %v658_v13 }
 0x3dd   :  { %v4823_v37 = vmul.f32 -1.442695, %v717_v26 }
 0x3de   :  { %v662_v39 = vpop.f32.mrb[4].mxu1 }
 0x3df   :  { %5986 = vpow2.f32 %v4823_v37  ;;  %v718_v40 = vadd.f32 %v4810_v31, %v662_v39  ;;  %v664_v20 = vpop.f32.mrb[5].mxu1  ;;  %v4809_v37 = vld [vmem:[%s8904_s29 + $0x118] sm:$0xff] }
 0x3e1   :  { %v4824_v33 = vmul.f32 -1.442695, %v718_v40 }
 0x3e2   :  { %v668_v42 = vpop.f32.mrb[6].mxu1 }
 0x3e3   :  { %5988 = vpow2.f32 %v4824_v33  ;;  %v719_v1 = vadd.f32 %v4812_v48, %v668_v42  ;;  %v6971_v50 = vpop.f32.mrb[7].mxu1 }
 0x3e5   :  { %v5985_v38 = vpop.eup %5984  ;;  %v4825_v27 = vmul.f32 -1.442695, %v719_v1  ;;  %v774_v1 = vadd.f32 %v6575_v32, %v664_v20  ;;  %v4813_v20 = vld [vmem:[%s8904_s29 + $0x138] sm:$0xff] }
 0x3e6   :  { %v748_v46 = vadd.f32 1.0, %v5985_v38  ;;  %v674_v28 = vpop.f32.mrb[8].mxu1 }
 0x3e7   :  { %5990 = vpow2.f32 %v4825_v27  ;;  %v720_v57 = vadd.f32 %v4814_v17, %v674_v28  ;;  %v6976_v58 = vpop.f32.mrb[9].mxu1  ;;  %v4811_v17 = vld [vmem:[%s8904_s29 + $0x128] sm:$0xff] }
 0x3e8   :  { %5992 = vrcp.f32 %v748_v46 }
 0x3e9   :  { %v5987_v44 = vpop.eup %5986  ;;  %v4826_v60 = vmul.f32 -1.442695, %v720_v57  ;;  %v775_v57 = vadd.f32 %v6575_v32, %v6971_v50  ;;  %v4815_v50 = vld [vmem:[%s8904_s29 + $0x148] sm:$0xff] }
 0x3ea   :  { %v749_v61 = vadd.f32 1.0, %v5987_v44  ;;  %v680_v63 = vpop.f32.mrb[10].mxu1 }
 0x3eb   :  { %5994 = vpow2.f32 %v4826_v60  ;;  %v721_v54 = vadd.f32 %v4816_v35, %v680_v63  ;;  %v6981_v41 = vpop.f32.mrb[11].mxu1 }
 0x3ec   :  { %5996 = vrcp.f32 %v749_v61 }
 0x3ed   :  { %v5989_v3 = vpop.eup %5988  ;;  %v4827_v45 = vmul.f32 -1.442695, %v721_v54  ;;  %v776_v54 = vadd.f32 %v6575_v32, %v6976_v58  ;;  %v4817_v58 = vld [vmem:[%s8904_s29 + $0x158] sm:$0xff] }
 0x3ee   :  { %v750_v62 = vadd.f32 1.0, %v5989_v3  ;;  %v686_v53 = vpop.f32.mrb[12].mxu1 }
 0x3ef   :  { %5998 = vpow2.f32 %v4827_v45  ;;  %v722_v59 = vadd.f32 %v4818_v0, %v686_v53  ;;  %v6986_v4 = vpop.f32.mrb[13].mxu1 }
 0x3f0   :  { %6000 = vrcp.f32 %v750_v62 }
 0x3f1   :  { %v5991_v52 = vpop.eup %5990  ;;  %v4828_v10 = vmul.f32 -1.442695, %v722_v59 }
 0x3f2   :  { %v6989_v12 = vpop.eup %5992  ;;  %v751_v56 = vadd.f32 1.0, %v5991_v52  ;;  %v777_v52 = vadd.f32 %v6575_v32, %v6981_v41  ;;  %v4819_v41 = vld [vmem:[%s8904_s29 + $0x168] sm:$0xff] }
 0x3f3   :  { %v780_v18 = vmul.f32 %v6989_v12, %v772_v7  ;;  %6002 = vpow2.f32 %v4828_v10 }
 0x3f4   :  { %6004 = vrcp.f32 %v751_v56  ;;  %v692_v19 = vpop.f32.mrb[14].mxu1 }
 0x3f5   :  { %v5995_v23 = vpop.eup %5994  ;;  %v788_v25 = vadd.f32 %v4807_v14, %v780_v18  ;;  %v723_v8 = vadd.f32 %v4820_v6, %v692_v19  ;;  %v694_v26 = vpop.f32.mrb[15].mxu1  ;;  %v778_v6 = vadd.f32 %v6575_v32, %v6986_v4  ;;  %v4821_v4 = vld [vmem:[%s8904_s29 + $0x178] sm:$0xff] }
 0x3f6   :  { %v6999_v31 = vpop.eup %5996  ;;  %v752_v39 = vadd.f32 1.0, %v5995_v23 }
 0x3f7   :  { %6006 = vtanh.f32 %v788_v25  ;;  %v781_v40 = vmul.f32 %v6999_v31, %v773_v21  ;;  %v4829_v48 = vmul.f32 -1.442695, %v723_v8  ;;  %v779_v21 = vadd.f32 %v6575_v32, %v694_v26 }
 0x3f8   :  { %6008 = vrcp.f32 %v752_v39  ;;  %v804_v32 = vsub.f32 1.0, %v6989_v12 }
 0x3f9   :  { %v5999_v33 = vpop.eup %5998  ;;  %v789_v42 = vadd.f32 %v4809_v37, %v781_v40  ;;  %6010 = vpow2.f32 %v4829_v48 }
 0x3fa   :  { %v7006_v13 = vpop.eup %6000  ;;  %v753_v38 = vadd.f32 1.0, %v5999_v33 }
 0x3fb   :  { %6012 = vtanh.f32 %v789_v42  ;;  %v782_v27 = vmul.f32 %v7006_v13, %v774_v1  ;;  %v852_v1 = vmul.f32 %v6989_v12, %v6886_v34  ;;  %v854_v34 = vmul.f32 %v7006_v13, %v6900_v51 }
 0x3fc   :  { %6014 = vrcp.f32 %v753_v38 }
 0x3fd   :  { %v6003_v46 = vpop.eup %6002  ;;  %v790_v28 = vadd.f32 %v4811_v17, %v782_v27  ;;  %v805_v27 = vsub.f32 1.0, %v6999_v31 }
 0x3fe   :  { %v7014_v35 = vpop.eup %6004  ;;  %v754_v44 = vadd.f32 1.0, %v6003_v46 }
 0x3ff   :  { %6016 = vtanh.f32 %v790_v28  ;;  %v783_v60 = vmul.f32 %v7014_v35, %v775_v57  ;;  %v853_v28 = vmul.f32 %v6999_v31, %v6893_v47  ;;  %v807_v47 = vsub.f32 1.0, %v7014_v35 }
 0x400   :  { %6018 = vrcp.f32 %v754_v44  ;;  %v806_v44 = vsub.f32 1.0, %v7006_v13 }
 0x401   :  { %v6007_v61 = vpop.eup %6006  ;;  %v791_v63 = vadd.f32 %v4813_v20, %v783_v60 }
 0x402   :  { %v7022_v0 = vpop.eup %6008  ;;  %820 = vrot.lane.b32.xlu0 %v6007_v61, %s6450_s22 }
 0x403   :  { %v6011_v3 = vpop.eup %6010  ;;  %6020 = vtanh.f32 %v791_v63  ;;  %v784_v45 = vmul.f32 %v7022_v0, %v776_v54  ;;  %v855_v63 = vmul.f32 %v7014_v35, %v6907_v55  ;;  %v808_v51 = vsub.f32 1.0, %v7022_v0 }
 0x404   :  { %v755_v62 = vadd.f32 1.0, %v6011_v3  ;;  %v856_v3 = vmul.f32 %v7022_v0, %v6914_v49 }
 0x405   :  { %v6013_v53 = vpop.eup %6012  ;;  %v792_v59 = vadd.f32 %v4815_v50, %v784_v45 }
 0x406   :  { %v7031_v7 = vpop.eup %6014  ;;  %6022 = vrcp.f32 %v755_v62  ;;  %822 = vrot.lane.b32.xlu1 %v6013_v53, %s6450_s22 }
 0x407   :  { %6024 = vtanh.f32 %v792_v59  ;;  %v785_v10 = vmul.f32 %v7031_v7, %v777_v52  ;;  %v809_v55 = vsub.f32 1.0, %v7031_v7  ;;  %v857_v53 = vmul.f32 %v7031_v7, %v6921_v43 }
 0x409   :  { %v6017_v14 = vpop.eup %6016  ;;  %v793_v56 = vadd.f32 %v4817_v58, %v785_v10 }
 0x40a   :  { %v6019_v18 = vpop.eup %6018  ;;  %824 = vrot.lane.b32.xlu0 %v6017_v14, %s6450_s22 }
 0x40b   :  { %6026 = vtanh.f32 %v793_v56  ;;  %v786_v19 = vmul.f32 %v6019_v18, %v778_v6  ;;  %v810_v58 = vsub.f32 1.0, %v6019_v18  ;;  %v858_v0 = vmul.f32 %v6019_v18, %v6926_v2 }
 0x40d   :  { %v6021_v23 = vpop.eup %6020  ;;  %v794_v25 = vadd.f32 %v4819_v41, %v786_v19 }
 0x40e   :  { %826 = vrot.lane.b32.xlu1 %v6021_v23, %s6450_s22 }
 0x40f   :  { %6028 = vtanh.f32 %v794_v25 }
 0x410   :  { %v6023_v8 = vpop.eup %6022 }
 0x411   :  { %v6025_v37 = vpop.eup %6024  ;;  %v787_v39 = vmul.f32 %v6023_v8, %v779_v21  ;;  %v811_v56 = vsub.f32 1.0, %v6023_v8  ;;  %v859_v7 = vmul.f32 %v6023_v8, %v6931_v5 }
 0x412   :  { %828 = vrot.lane.b32.xlu0 %v6025_v37, %s6450_s22 }
 0x413   :  { %v795_v40 = vadd.f32 %v4821_v4, %v787_v39 }
 0x415   :  { %v6027_v48 = vpop.eup %6026  ;;  %6030 = vtanh.f32 %v795_v40  ;;  %v4840_v40 = vld [vmem:[%s8904_s29 + $0x190] sm:$0xff] }
 0x416   :  { %830 = vrot.lane.b32.xlu1 %v6027_v48, %s6450_s22 }
 0x419   :  { %v6029_v33 = vpop.eup %6028 }
 0x41a   :  { %832 = vrot.lane.b32.xlu0 %v6029_v33, %s6450_s22 }
 0x41f   :  { %v6031_v42 = vpop.eup %6030 }
 0x420   :  { %834 = vrot.lane.b32.xlu1 %v6031_v42, %s6450_s22 }
 0x474   :  { %v821_v26 = vpop.permute.xlu0 %820 }
 0x475   :  { %v844_v17 = vmul.f32 %v821_v26, %v804_v32  ;;  %v4842_v26 = vld [vmem:[%s8904_s29 + $0x1a0] sm:$0xff] }
 0x477   :  { %v7056_v38 = vadd.f32 %v852_v1, %v844_v17 }
 0x478   :  { %v823_v46 = vpop.permute.xlu1 %822 }
 0x479   :  { %v845_v57 = vmul.f32 %v823_v46, %v805_v27  ;;  %876 = vrot.lane.b32.xlu0 %v7056_v38, %s6450_s22 }
 0x47b   :  { %v7063_v20 = vadd.f32 %v853_v28, %v845_v57  ;;  %v4844_v28 = vld [vmem:[%s8904_s29 + $0x1b0] sm:$0xff] }
 0x47c   :  { %v825_v60 = vpop.permute.xlu0 %824 }
 0x47d   :  { %v846_v12 = vmul.f32 %v825_v60, %v806_v44  ;;  %878 = vrot.lane.b32.xlu1 %v7063_v20, %s6450_s22 }
 0x47f   :  { %v7070_v61 = vadd.f32 %v854_v34, %v846_v12  ;;  %v4846_v12 = vld [vmem:[%s8904_s29 + $0x1c0] sm:$0xff] }
 0x480   :  { %v827_v31 = vpop.permute.xlu1 %826 }
 0x481   :  { %v847_v54 = vmul.f32 %v827_v31, %v807_v47  ;;  %880 = vrot.lane.b32.xlu0 %v7070_v61, %s6450_s22 }
 0x483   :  { %v7077_v50 = vadd.f32 %v855_v63, %v847_v54 }
 0x484   :  { %v829_v13 = vpop.permute.xlu0 %828 }
 0x485   :  { %v848_v45 = vmul.f32 %v829_v13, %v808_v51  ;;  %882 = vrot.lane.b32.xlu1 %v7077_v50, %s6450_s22 }
 0x487   :  { %v7084_v62 = vadd.f32 %v856_v3, %v848_v45  ;;  %v4848_v3 = vld [vmem:[%s8904_s29 + $0x1d0] sm:$0xff] }
 0x488   :  { %v831_v35 = vpop.permute.xlu1 %830 }
 0x489   :  { %v849_v59 = vmul.f32 %v831_v35, %v809_v55  ;;  %884 = vrot.lane.b32.xlu0 %v7084_v62, %s6450_s22 }
 0x48b   :  { %v7091_v52 = vadd.f32 %v857_v53, %v849_v59 }
 0x48c   :  { %v833_v49 = vpop.permute.xlu0 %832 }
 0x48d   :  { %v850_v10 = vmul.f32 %v833_v49, %v810_v58  ;;  %886 = vrot.lane.b32.xlu1 %v7091_v52, %s6450_s22  ;;  %v4850_v49 = vld [vmem:[%s8904_s29 + $0x1e0] sm:$0xff] }
 0x48f   :  { %v7096_v14 = vadd.f32 %v858_v0, %v850_v10 }
 0x491   :  { %888 = vrot.lane.b32.xlu0 %v7096_v14, %s6450_s22 }
 0x492   :  { %v835_v43 = vpop.permute.xlu1 %834 }
 0x493   :  { %v851_v6 = vmul.f32 %v835_v43, %v811_v56 }
 0x495   :  { %v7101_v41 = vadd.f32 %v859_v7, %v851_v6 }
 0x497   :  { %890 = vrot.lane.b32.xlu1 %v7101_v41, %s6450_s22 }
 0x4eb   :  { %v877_v2 = vpop.permute.xlu0 %876 }
 0x4ec   :  { %4830 = vmatmul.mubr.msk.f32.vlgmr.msra.gmra.mrb[16].mxu0 %vm243_vm0, %v877_v2 }
 0x4ed   :  { %978 = vmatprep.mubr.f32.mxu0 %v6451_v9  ;;  %5650 = vmatpush1.bf16.msra.mxu0 %v6660_v15 }
 0x4ee   :  { %5652 = vmatprep.subr.bf16.mxu0 %v6662_v16 }
 0x4ef   :  { %v879_v18 = vpop.permute.xlu1 %878 }
 0x4f0   :  { %4831 = vmatmul.mubr.msk.f32.gmra.mrb[18].mxu0 %vm243_vm0, %v879_v18  ;;  %v7161_v18 = vld [vmem:[%s8905_s19] ss:$0 sm:$0xff] }
 0x4f1   :  { %984 = vmatprep.mubr.f32.mxu0 %v6451_v9  ;;  %5654 = vmatpush1.bf16.msra.mxu0 %v6680_v22 }
 0x4f2   :  { %5656 = vmatprep.subr.bf16.mxu0 %v6683_v24 }
 0x4f3   :  { %v881_v5 = vpop.permute.xlu0 %880 }
 0x4f4   :  { %4832 = vmatmul.mubr.msk.f32.gmra.mrb[20].mxu0 %vm243_vm0, %v881_v5 }
 0x4f5   :  { %990 = vmatprep.mubr.f32.mxu0 %v6451_v9  ;;  %5658 = vmatpush1.bf16.msra.mxu0 %v6702_v29 }
 0x4f6   :  { %5660 = vmatprep.subr.bf16.mxu0 %v6705_v30 }
 0x4f7   :  { %v883_v19 = vpop.permute.xlu1 %882 }
 0x4f8   :  { %4833 = vmatmul.mubr.msk.f32.gmra.mrb[22].mxu0 %vm243_vm0, %v883_v19 }
 0x4f9   :  { %996 = vmatprep.mubr.f32.mxu0 %v6451_v9  ;;  %5662 = vmatpush1.bf16.msra.mxu0 %v6716_v36 }
 0x4fa   :  { %5680 = vmatprep.subr.bf16.mxu0 %v6647_v11  ;;  %v4838_v11 = vld [vmem:[%s8904_s29 + $0x180] sm:$0xff] }
 0x4fb   :  { %v885_v23 = vpop.permute.xlu0 %884 }
 0x4fc   :  { %4834 = vmatmul.mubr.msk.f32.gmra.mrb[24].mxu0 %vm243_vm0, %v885_v23 }
 0x4fd   :  { %1002 = vmatprep.mubr.f32.mxu0 %v6451_v9 }
 0x4ff   :  { %v887_v25 = vpop.permute.xlu1 %886 }
 0x500   :  { %4835 = vmatmul.mubr.msk.f32.gmra.mrb[26].mxu0 %vm243_vm0, %v887_v25  ;;  %v4839_v25 = vld [vmem:[%s8904_s29 + $0x188] sm:$0xff] }
 0x501   :  { %1008 = vmatprep.mubr.f32.mxu0 %v6451_v9 }
 0x503   :  { %v889_v21 = vpop.permute.xlu0 %888 }
 0x504   :  { %4836 = vmatmul.mubr.msk.f32.gmra.mrb[28].mxu0 %vm243_vm0, %v889_v21 }
 0x505   :  { %1014 = vmatprep.mubr.f32.mxu0 %v6451_v9 }
 0x509   :  { %v891_v8 = vpop.permute.xlu1 %890 }
 0x50a   :  { %4837 = vmatmul.mubr.msk.f32.gmra.mrb[30].mxu0 %vm243_vm0, %v891_v8  ;;  %v4852_v8 = vld [vmem:[%s8904_s29 + $0x1f0] sm:$0xff] }
 0x50b   :  { %1620 = vmatprep.mubr.f32.mxu0 %v6451_v9 }
 0x5bf   :  { %v974_v4 = vpop.f32.mrb[16].mxu0 }
 0x5c0   :  { %v1040_v37 = vadd.f32 %v4838_v11, %v974_v4  ;;  %v976_v39 = vpop.f32.mrb[17].mxu0 }
 0x5c1   :  { %v1096_v5 = vadd.f32 %v7161_v18, %v976_v39 }
 0x5c2   :  { %v4854_v48 = vmul.f32 -1.442695, %v1040_v37 }
 0x5c3   :  { %v980_v33 = vpop.f32.mrb[18].mxu0 }
 0x5c4   :  { %6032 = vpow2.f32 %v4854_v48  ;;  %v1041_v42 = vadd.f32 %v4840_v40, %v980_v33  ;;  %v982_v32 = vpop.f32.mrb[19].mxu0 }
 0x5c5   :  { %v1097_v39 = vadd.f32 %v7161_v18, %v982_v32 }
 0x5c6   :  { %v4855_v1 = vmul.f32 -1.442695, %v1041_v42 }
 0x5c7   :  { %v986_v17 = vpop.f32.mrb[20].mxu0 }
 0x5c8   :  { %6034 = vpow2.f32 %v4855_v1  ;;  %v1042_v27 = vadd.f32 %v4842_v26, %v986_v17  ;;  %v988_v46 = vpop.f32.mrb[21].mxu0  ;;  %v4841_v26 = vld [vmem:[%s8904_s29 + $0x198] sm:$0xff] }
 0x5ca   :  { %v4856_v57 = vmul.f32 -1.442695, %v1042_v27 }
 0x5cb   :  { %v992_v44 = vpop.f32.mrb[22].mxu0 }
 0x5cc   :  { %6036 = vpow2.f32 %v4856_v57  ;;  %v1043_v60 = vadd.f32 %v4844_v28, %v992_v44  ;;  %v7141_v34 = vpop.f32.mrb[23].mxu0  ;;  %v1098_v44 = vadd.f32 %v7161_v18, %v988_v46  ;;  %v4845_v46 = vld [vmem:[%s8904_s29 + $0x1b8] sm:$0xff] }
 0x5ce   :  { %v6033_v47 = vpop.eup %6032  ;;  %v4857_v31 = vmul.f32 -1.442695, %v1043_v60  ;;  %v4843_v60 = vld [vmem:[%s8904_s29 + $0x1a8] sm:$0xff] }
 0x5cf   :  { %v1072_v63 = vadd.f32 1.0, %v6033_v47  ;;  %v998_v54 = vpop.f32.mrb[24].mxu0 }
 0x5d0   :  { %6038 = vpow2.f32 %v4857_v31  ;;  %v1044_v51 = vadd.f32 %v4846_v12, %v998_v54  ;;  %v7146_v13 = vpop.f32.mrb[25].mxu0  ;;  %v1099_v54 = vadd.f32 %v7161_v18, %v7141_v34  ;;  %v4847_v34 = vld [vmem:[%s8904_s29 + $0x1c8] sm:$0xff] }
 0x5d1   :  { %6040 = vrcp.f32 %v1072_v63 }
 0x5d2   :  { %v6035_v45 = vpop.eup %6034  ;;  %v4858_v55 = vmul.f32 -1.442695, %v1044_v51 }
 0x5d3   :  { %v1073_v35 = vadd.f32 1.0, %v6035_v45  ;;  %v1004_v53 = vpop.f32.mrb[26].mxu0 }
 0x5d4   :  { %6042 = vpow2.f32 %v4858_v55  ;;  %v1045_v59 = vadd.f32 %v4848_v3, %v1004_v53  ;;  %v7151_v58 = vpop.f32.mrb[27].mxu0  ;;  %v1100_v53 = vadd.f32 %v7161_v18, %v7146_v13  ;;  %v4849_v13 = vld [vmem:[%s8904_s29 + $0x1d8] sm:$0xff] }
 0x5d5   :  { %6044 = vrcp.f32 %v1073_v35 }
 0x5d6   :  { %v6037_v0 = vpop.eup %6036  ;;  %v4859_v10 = vmul.f32 -1.442695, %v1045_v59 }
 0x5d7   :  { %v1074_v56 = vadd.f32 1.0, %v6037_v0  ;;  %v1010_v43 = vpop.f32.mrb[28].mxu0 }
 0x5d8   :  { %6046 = vpow2.f32 %v4859_v10  ;;  %v1046_v7 = vadd.f32 %v4850_v49, %v1010_v43  ;;  %v7156_v6 = vpop.f32.mrb[29].mxu0 }
 0x5d9   :  { %6048 = vrcp.f32 %v1074_v56 }
 0x5da   :  { %v6039_v2 = vpop.eup %6038  ;;  %v4860_v19 = vmul.f32 -1.442695, %v1046_v7  ;;  %v1101_v7 = vadd.f32 %v7161_v18, %v7151_v58  ;;  %v4851_v58 = vld [vmem:[%s8904_s29 + $0x1e8] sm:$0xff] }
 0x5db   :  { %v7164_v23 = vpop.eup %6040  ;;  %v1075_v21 = vadd.f32 1.0, %v6039_v2 }
 0x5dc   :  { %v1104_v11 = vmul.f32 %v7164_v23, %v1096_v5  ;;  %6050 = vpow2.f32 %v4860_v19 }
 0x5dd   :  { %6052 = vrcp.f32 %v1075_v21  ;;  %v1016_v4 = vpop.f32.mrb[30].mxu0  ;;  %v1102_v21 = vadd.f32 %v7161_v18, %v7156_v6  ;;  %v4853_v6 = vld [vmem:[%s8904_s29 + $0x1f8] sm:$0xff] }
 0x5de   :  { %v6043_v37 = vpop.eup %6042  ;;  %v1112_v40 = vadd.f32 %v4839_v25, %v1104_v11  ;;  %v1047_v48 = vadd.f32 %v4852_v8, %v1016_v4  ;;  %v1018_v33 = vpop.f32.mrb[31].mxu0 }
 0x5df   :  { %v7174_v42 = vpop.eup %6044  ;;  %v1076_v1 = vadd.f32 1.0, %v6043_v37 }
 0x5e0   :  { %6054 = vtanh.f32 %v1112_v40  ;;  %v1105_v17 = vmul.f32 %v7174_v42, %v1097_v39  ;;  %v4861_v27 = vmul.f32 -1.442695, %v1047_v48  ;;  %v1103_v40 = vadd.f32 %v7161_v18, %v1018_v33 }
 0x5e1   :  { %6056 = vrcp.f32 %v1076_v1  ;;  %v1128_v33 = vsub.f32 1.0, %v7164_v23 }
 0x5e2   :  { %v6047_v28 = vpop.eup %6046  ;;  %v1113_v57 = vadd.f32 %v4841_v26, %v1105_v17  ;;  %6058 = vpow2.f32 %v4861_v27 }
 0x5e3   :  { %v7181_v32 = vpop.eup %6048  ;;  %v1077_v12 = vadd.f32 1.0, %v6047_v28 }
 0x5e4   :  { %6060 = vtanh.f32 %v1113_v57  ;;  %v1106_v47 = vmul.f32 %v7181_v32, %v1098_v44  ;;  %v1176_v44 = vmul.f32 %v7164_v23, %v7056_v38  ;;  %v1178_v38 = vmul.f32 %v7181_v32, %v7070_v61 }
 0x5e5   :  { %6062 = vrcp.f32 %v1077_v12 }
 0x5e6   :  { %v6051_v31 = vpop.eup %6050  ;;  %v1114_v63 = vadd.f32 %v4843_v60, %v1106_v47  ;;  %v1129_v47 = vsub.f32 1.0, %v7174_v42 }
 0x5e7   :  { %v7189_v51 = vpop.eup %6052  ;;  %v1078_v3 = vadd.f32 1.0, %v6051_v31 }
 0x5e8   :  { %6064 = vtanh.f32 %v1114_v63  ;;  %v1107_v45 = vmul.f32 %v7189_v51, %v1099_v54  ;;  %v1177_v63 = vmul.f32 %v7174_v42, %v7063_v20  ;;  %v1131_v20 = vsub.f32 1.0, %v7189_v51 }
 0x5e9   :  { %6066 = vrcp.f32 %v1078_v3  ;;  %v1130_v3 = vsub.f32 1.0, %v7181_v32 }
 0x5ea   :  { %v6055_v55 = vpop.eup %6054  ;;  %v1115_v35 = vadd.f32 %v4845_v46, %v1107_v45 }
 0x5eb   :  { %v7197_v59 = vpop.eup %6056  ;;  %1144 = vrot.lane.b32.xlu0 %v6055_v55, %s6450_s22 }
 0x5ec   :  { %v6059_v49 = vpop.eup %6058  ;;  %6068 = vtanh.f32 %v1115_v35  ;;  %v1108_v0 = vmul.f32 %v7197_v59, %v1100_v53  ;;  %v1179_v35 = vmul.f32 %v7189_v51, %v7077_v50  ;;  %v1132_v61 = vsub.f32 1.0, %v7197_v59 }
 0x5ed   :  { %v1079_v10 = vadd.f32 1.0, %v6059_v49  ;;  %v1180_v49 = vmul.f32 %v7197_v59, %v7084_v62 }
 0x5ee   :  { %v6061_v56 = vpop.eup %6060  ;;  %v1116_v43 = vadd.f32 %v4847_v34, %v1108_v0 }
 0x5ef   :  { %v7206_v2 = vpop.eup %6062  ;;  %6070 = vrcp.f32 %v1079_v10  ;;  %1146 = vrot.lane.b32.xlu1 %v6061_v56, %s6450_s22 }
 0x5f0   :  { %6072 = vtanh.f32 %v1116_v43  ;;  %v1109_v5 = vmul.f32 %v7206_v2, %v1101_v7  ;;  %v1133_v50 = vsub.f32 1.0, %v7206_v2  ;;  %v1181_v56 = vmul.f32 %v7206_v2, %v7091_v52 }
 0x5f2   :  { %v6065_v19 = vpop.eup %6064  ;;  %v1117_v25 = vadd.f32 %v4849_v13, %v1109_v5 }
 0x5f3   :  { %v6067_v8 = vpop.eup %6066  ;;  %1148 = vrot.lane.b32.xlu0 %v6065_v19, %s6450_s22 }
 0x5f4   :  { %6074 = vtanh.f32 %v1117_v25  ;;  %v1110_v11 = vmul.f32 %v6067_v8, %v1102_v21  ;;  %v1134_v13 = vsub.f32 1.0, %v6067_v8  ;;  %v1182_v59 = vmul.f32 %v6067_v8, %v7096_v14 }
 0x5f6   :  { %v6069_v4 = vpop.eup %6068  ;;  %v1118_v37 = vadd.f32 %v4851_v58, %v1110_v11 }
 0x5f7   :  { %1150 = vrot.lane.b32.xlu1 %v6069_v4, %s6450_s22 }
 0x5f8   :  { %6076 = vtanh.f32 %v1118_v37 }
 0x5f9   :  { %v6071_v39 = vpop.eup %6070 }
 0x5fa   :  { %v6073_v48 = vpop.eup %6072  ;;  %v1111_v26 = vmul.f32 %v6071_v39, %v1103_v40  ;;  %v1135_v25 = vsub.f32 1.0, %v6071_v39  ;;  %v1183_v2 = vmul.f32 %v6071_v39, %v7101_v41 }
 0x5fb   :  { %1152 = vrot.lane.b32.xlu0 %v6073_v48, %s6450_s22 }
 0x5fc   :  { %v1119_v1 = vadd.f32 %v4853_v6, %v1111_v26  ;;  %v4870_v6 = vld [vmem:[%s8904_s29 + $0x200] sm:$0xff] }
 0x5fe   :  { %v6075_v17 = vpop.eup %6074  ;;  %6078 = vtanh.f32 %v1119_v1 }
 0x5ff   :  { %1154 = vrot.lane.b32.xlu1 %v6075_v17, %s6450_s22  ;;  %v4872_v17 = vld [vmem:[%s8904_s29 + $0x210] sm:$0xff] }
 0x602   :  { %v6077_v27 = vpop.eup %6076 }
 0x603   :  { %1156 = vrot.lane.b32.xlu0 %v6077_v27, %s6450_s22 }
 0x608   :  { %v6079_v28 = vpop.eup %6078 }
 0x609   :  { %1158 = vrot.lane.b32.xlu1 %v6079_v28, %s6450_s22 }
 0x65d   :  { %v1145_v57 = vpop.permute.xlu0 %1144 }
 0x65e   :  { %v1168_v60 = vmul.f32 %v1145_v57, %v1128_v33 }
 0x660   :  { %v7231_v12 = vadd.f32 %v1176_v44, %v1168_v60  ;;  %v4874_v44 = vld [vmem:[%s8904_s29 + $0x220] sm:$0xff] }
 0x661   :  { %v1147_v31 = vpop.permute.xlu1 %1146 }
 0x662   :  { %v1169_v54 = vmul.f32 %v1147_v31, %v1129_v47  ;;  %1200 = vrot.lane.b32.xlu0 %v7231_v12, %s6450_s22 }
 0x664   :  { %v7238_v46 = vadd.f32 %v1177_v63, %v1169_v54  ;;  %v4876_v54 = vld [vmem:[%s8904_s29 + $0x230] sm:$0xff] }
 0x665   :  { %v1149_v45 = vpop.permute.xlu0 %1148 }
 0x666   :  { %v1170_v23 = vmul.f32 %v1149_v45, %v1130_v3  ;;  %1202 = vrot.lane.b32.xlu1 %v7238_v46, %s6450_s22 }
 0x668   :  { %v7245_v55 = vadd.f32 %v1178_v38, %v1170_v23 }
 0x669   :  { %v1151_v42 = vpop.permute.xlu1 %1150 }
 0x66a   :  { %v1171_v53 = vmul.f32 %v1151_v42, %v1131_v20  ;;  %1204 = vrot.lane.b32.xlu0 %v7245_v55, %s6450_s22  ;;  %v4878_v20 = vld [vmem:[%s8904_s29 + $0x240] sm:$0xff] }
 0x66c   :  { %v7252_v34 = vadd.f32 %v1179_v35, %v1171_v53 }
 0x66d   :  { %v1153_v32 = vpop.permute.xlu0 %1152 }
 0x66e   :  { %v1172_v0 = vmul.f32 %v1153_v32, %v1132_v61  ;;  %1206 = vrot.lane.b32.xlu1 %v7252_v34, %s6450_s22 }
 0x670   :  { %v7259_v10 = vadd.f32 %v1180_v49, %v1172_v0  ;;  %v4880_v0 = vld [vmem:[%s8904_s29 + $0x250] sm:$0xff] }
 0x671   :  { %v1155_v51 = vpop.permute.xlu1 %1154 }
 0x672   :  { %v1173_v43 = vmul.f32 %v1155_v51, %v1133_v50  ;;  %1208 = vrot.lane.b32.xlu0 %v7259_v10, %s6450_s22 }
 0x674   :  { %v7266_v7 = vadd.f32 %v1181_v56, %v1173_v43 }
 0x675   :  { %v1157_v62 = vpop.permute.xlu0 %1156 }
 0x676   :  { %v1174_v5 = vmul.f32 %v1157_v62, %v1134_v13  ;;  %1210 = vrot.lane.b32.xlu1 %v7266_v7, %s6450_s22 }
 0x678   :  { %v7271_v19 = vadd.f32 %v1182_v59, %v1174_v5  ;;  %v4882_v59 = vld [vmem:[%s8904_s29 + $0x260] sm:$0xff] }
 0x67a   :  { %1212 = vrot.lane.b32.xlu0 %v7271_v19, %s6450_s22 }
 0x67b   :  { %v1159_v52 = vpop.permute.xlu1 %1158 }
 0x67c   :  { %v1175_v21 = vmul.f32 %v1159_v52, %v1135_v25 }
 0x67e   :  { %v7276_v58 = vadd.f32 %v1183_v2, %v1175_v21 }
 0x680   :  { %1214 = vrot.lane.b32.xlu1 %v7276_v58, %s6450_s22 }
 0x6d4   :  { %v1201_v14 = vpop.permute.xlu0 %1200 }
 0x6d5   :  { %4862 = vmatmul.mubr.msk.f32.vlgmr.msra.gmra.mrb[16].mxu1 %vm243_vm0, %v1201_v14 }
 0x6d6   :  { %1302 = vmatprep.mubr.f32.mxu1 %v6451_v9  ;;  %5666 = vmatpush1.bf16.msra.mxu1 %v6660_v15 }
 0x6d7   :  { %5668 = vmatprep.subr.bf16.mxu1 %v6662_v16 }
 0x6d8   :  { %v1203_v8 = vpop.permute.xlu1 %1202 }
 0x6d9   :  { %4863 = vmatmul.mubr.msk.f32.gmra.mrb[18].mxu1 %vm243_vm0, %v1203_v8 }
 0x6da   :  { %1308 = vmatprep.mubr.f32.mxu1 %v6451_v9  ;;  %5670 = vmatpush1.bf16.msra.mxu1 %v6680_v22 }
 0x6db   :  { %5672 = vmatprep.subr.bf16.mxu1 %v6683_v24 }
 0x6dc   :  { %v1205_v41 = vpop.permute.xlu0 %1204 }
 0x6dd   :  { %4864 = vmatmul.mubr.msk.f32.gmra.mrb[20].mxu1 %vm243_vm0, %v1205_v41 }
 0x6de   :  { %1314 = vmatprep.mubr.f32.mxu1 %v6451_v9  ;;  %5674 = vmatpush1.bf16.msra.mxu1 %v6702_v29 }
 0x6df   :  { %5676 = vmatprep.subr.bf16.mxu1 %v6705_v30 }
 0x6e0   :  { %v1207_v11 = vpop.permute.xlu1 %1206 }
 0x6e1   :  { %4865 = vmatmul.mubr.msk.f32.gmra.mrb[22].mxu1 %vm243_vm0, %v1207_v11 }
 0x6e2   :  { %1320 = vmatprep.mubr.f32.mxu1 %v6451_v9  ;;  %5678 = vmatpush1.bf16.msra.mxu1 %v6716_v36 }
 0x6e4   :  { %v1209_v4 = vpop.permute.xlu0 %1208 }
 0x6e5   :  { %4866 = vmatmul.mubr.msk.f32.gmra.mrb[24].mxu1 %vm243_vm0, %v1209_v4 }
 0x6e6   :  { %1326 = vmatprep.mubr.f32.mxu1 %v6451_v9 }
 0x6e8   :  { %v1211_v37 = vpop.permute.xlu1 %1210 }
 0x6e9   :  { %4867 = vmatmul.mubr.msk.f32.gmra.mrb[26].mxu1 %vm243_vm0, %v1211_v37  ;;  %v4871_v37 = vld [vmem:[%s8904_s29 + $0x208] sm:$0xff] }
 0x6ea   :  { %1332 = vmatprep.mubr.f32.mxu1 %v6451_v9 }
 0x6ec   :  { %v1213_v40 = vpop.permute.xlu0 %1212 }
 0x6ed   :  { %4868 = vmatmul.mubr.msk.f32.gmra.mrb[28].mxu1 %vm243_vm0, %v1213_v40 }
 0x6ee   :  { %1338 = vmatprep.mubr.f32.mxu1 %v6451_v9 }
 0x6f2   :  { %v1215_v39 = vpop.permute.xlu1 %1214 }
 0x6f3   :  { %4869 = vmatmul.mubr.msk.f32.gmra.mrb[30].mxu1 %vm243_vm0, %v1215_v39  ;;  %v4884_v39 = vld [vmem:[%s8904_s29 + $0x270] sm:$0xff] }
 0x6f4   :  { %1944 = vmatprep.mubr.f32.mxu1 %v6451_v9 }
 0x7a8   :  { %v1298_v48 = vpop.f32.mrb[16].mxu1 }
 0x7a9   :  { %v1364_v26 = vadd.f32 %v4870_v6, %v1298_v48  ;;  %v1300_v1 = vpop.f32.mrb[17].mxu1 }
 0x7aa   :  { %v1420_v41 = vadd.f32 %v7161_v18, %v1300_v1 }
 0x7ab   :  { %v4886_v27 = vmul.f32 -1.442695, %v1364_v26 }
 0x7ac   :  { %v1304_v28 = vpop.f32.mrb[18].mxu1 }
 0x7ad   :  { %6080 = vpow2.f32 %v4886_v27  ;;  %v1365_v33 = vadd.f32 %v4872_v17, %v1304_v28  ;;  %v1306_v57 = vpop.f32.mrb[19].mxu1 }
 0x7ae   :  { %v1421_v1 = vadd.f32 %v7161_v18, %v1306_v57 }
 0x7af   :  { %v4887_v60 = vmul.f32 -1.442695, %v1365_v33 }
 0x7b0   :  { %v1310_v47 = vpop.f32.mrb[20].mxu1 }
 0x7b1   :  { %6082 = vpow2.f32 %v4887_v60  ;;  %v1366_v31 = vadd.f32 %v4874_v44, %v1310_v47  ;;  %v1312_v63 = vpop.f32.mrb[21].mxu1  ;;  %v4873_v44 = vld [vmem:[%s8904_s29 + $0x218] sm:$0xff] }
 0x7b3   :  { %v4888_v3 = vmul.f32 -1.442695, %v1366_v31 }
 0x7b4   :  { %v1316_v45 = vpop.f32.mrb[22].mxu1 }
 0x7b5   :  { %6084 = vpow2.f32 %v4888_v3  ;;  %v1367_v38 = vadd.f32 %v4876_v54, %v1316_v45  ;;  %v7315_v23 = vpop.f32.mrb[23].mxu1  ;;  %v1422_v45 = vadd.f32 %v7161_v18, %v1312_v63  ;;  %v4877_v63 = vld [vmem:[%s8904_s29 + $0x238] sm:$0xff] }
 0x7b7   :  { %v6081_v42 = vpop.eup %6080  ;;  %v4889_v35 = vmul.f32 -1.442695, %v1367_v38  ;;  %v4875_v38 = vld [vmem:[%s8904_s29 + $0x228] sm:$0xff] }
 0x7b8   :  { %v1396_v53 = vadd.f32 1.0, %v6081_v42  ;;  %v1322_v61 = vpop.f32.mrb[24].mxu1 }
 0x7b9   :  { %6086 = vpow2.f32 %v4889_v35  ;;  %v1368_v32 = vadd.f32 %v4878_v20, %v1322_v61  ;;  %v7320_v49 = vpop.f32.mrb[25].mxu1  ;;  %v1423_v61 = vadd.f32 %v7161_v18, %v7315_v23  ;;  %v4879_v23 = vld [vmem:[%s8904_s29 + $0x248] sm:$0xff] }
 0x7ba   :  { %6088 = vrcp.f32 %v1396_v53 }
 0x7bb   :  { %v6083_v50 = vpop.eup %6082  ;;  %v4890_v51 = vmul.f32 -1.442695, %v1368_v32 }
 0x7bc   :  { %v1397_v56 = vadd.f32 1.0, %v6083_v50  ;;  %v1328_v43 = vpop.f32.mrb[26].mxu1 }
 0x7bd   :  { %6090 = vpow2.f32 %v4890_v51  ;;  %v1369_v13 = vadd.f32 %v4880_v0, %v1328_v43  ;;  %v7325_v62 = vpop.f32.mrb[27].mxu1  ;;  %v1424_v43 = vadd.f32 %v7161_v18, %v7320_v49  ;;  %v4881_v49 = vld [vmem:[%s8904_s29 + $0x258] sm:$0xff] }
 0x7be   :  { %6092 = vrcp.f32 %v1397_v56 }
 0x7bf   :  { %v6085_v5 = vpop.eup %6084  ;;  %v4891_v25 = vmul.f32 -1.442695, %v1369_v13 }
 0x7c0   :  { %v1398_v52 = vadd.f32 1.0, %v6085_v5  ;;  %v1334_v2 = vpop.f32.mrb[28].mxu1 }
 0x7c1   :  { %6094 = vpow2.f32 %v4891_v25  ;;  %v1370_v21 = vadd.f32 %v4882_v59, %v1334_v2  ;;  %v7330_v14 = vpop.f32.mrb[29].mxu1 }
 0x7c2   :  { %6096 = vrcp.f32 %v1398_v52 }
 0x7c3   :  { %v6087_v8 = vpop.eup %6086  ;;  %v4892_v11 = vmul.f32 -1.442695, %v1370_v21  ;;  %v1425_v21 = vadd.f32 %v7161_v18, %v7325_v62  ;;  %v4883_v62 = vld [vmem:[%s8904_s29 + $0x268] sm:$0xff] }
 0x7c4   :  { %v7333_v4 = vpop.eup %6088  ;;  %v1399_v40 = vadd.f32 1.0, %v6087_v8 }
 0x7c5   :  { %v1428_v6 = vmul.f32 %v7333_v4, %v1420_v41  ;;  %6098 = vpow2.f32 %v4892_v11 }
 0x7c6   :  { %6100 = vrcp.f32 %v1399_v40  ;;  %v1340_v48 = vpop.f32.mrb[30].mxu1  ;;  %v1426_v40 = vadd.f32 %v7161_v18, %v7330_v14  ;;  %v4885_v14 = vld [vmem:[%s8904_s29 + $0x278] sm:$0xff] }
 0x7c7   :  { %v6091_v26 = vpop.eup %6090  ;;  %v1436_v17 = vadd.f32 %v4871_v37, %v1428_v6  ;;  %v1371_v27 = vadd.f32 %v4884_v39, %v1340_v48  ;;  %v1342_v28 = vpop.f32.mrb[31].mxu1 }
 0x7c8   :  { %v7343_v33 = vpop.eup %6092  ;;  %v1400_v60 = vadd.f32 1.0, %v6091_v26 }
 0x7c9   :  { %6102 = vtanh.f32 %v1436_v17  ;;  %v1429_v47 = vmul.f32 %v7343_v33, %v1421_v1  ;;  %v4893_v31 = vmul.f32 -1.442695, %v1371_v27  ;;  %v1427_v17 = vadd.f32 %v7161_v18, %v1342_v28 }
 0x7ca   :  { %6104 = vrcp.f32 %v1400_v60  ;;  %v1452_v28 = vsub.f32 1.0, %v7333_v4 }
 0x7cb   :  { %v6095_v54 = vpop.eup %6094  ;;  %v1437_v3 = vadd.f32 %v4873_v44, %v1429_v47  ;;  %6106 = vpow2.f32 %v4893_v31 }
 0x7cc   :  { %v7350_v57 = vpop.eup %6096  ;;  %v1401_v20 = vadd.f32 1.0, %v6095_v54 }
 0x7cd   :  { %6108 = vtanh.f32 %v1437_v3  ;;  %v1430_v42 = vmul.f32 %v7350_v57, %v1422_v45  ;;  %v1500_v45 = vmul.f32 %v7333_v4, %v7231_v12  ;;  %v1502_v12 = vmul.f32 %v7350_v57, %v7245_v55 }
 0x7ce   :  { %6110 = vrcp.f32 %v1401_v20 }
 0x7cf   :  { %v6099_v35 = vpop.eup %6098  ;;  %v1438_v53 = vadd.f32 %v4875_v38, %v1430_v42  ;;  %v1453_v42 = vsub.f32 1.0, %v7343_v33 }
 0x7d0   :  { %v7358_v32 = vpop.eup %6100  ;;  %v1402_v0 = vadd.f32 1.0, %v6099_v35 }
 0x7d1   :  { %6112 = vtanh.f32 %v1438_v53  ;;  %v1431_v50 = vmul.f32 %v7358_v32, %v1423_v61  ;;  %v1501_v53 = vmul.f32 %v7343_v33, %v7238_v46  ;;  %v1455_v46 = vsub.f32 1.0, %v7358_v32 }
 0x7d2   :  { %6114 = vrcp.f32 %v1402_v0  ;;  %v1454_v0 = vsub.f32 1.0, %v7350_v57 }
 0x7d3   :  { %v6103_v51 = vpop.eup %6102  ;;  %v1439_v56 = vadd.f32 %v4877_v63, %v1431_v50 }
 0x7d4   :  { %v7366_v13 = vpop.eup %6104  ;;  %1468 = vrot.lane.b32.xlu0 %v6103_v51, %s6450_s22 }
 0x7d5   :  { %v6107_v59 = vpop.eup %6106  ;;  %6116 = vtanh.f32 %v1439_v56  ;;  %v1432_v5 = vmul.f32 %v7366_v13, %v1424_v43  ;;  %v1503_v56 = vmul.f32 %v7358_v32, %v7252_v34  ;;  %v1456_v55 = vsub.f32 1.0, %v7366_v13 }
 0x7d6   :  { %v1403_v25 = vadd.f32 1.0, %v6107_v59  ;;  %v1504_v59 = vmul.f32 %v7366_v13, %v7259_v10 }
 0x7d7   :  { %v6109_v52 = vpop.eup %6108  ;;  %v1440_v2 = vadd.f32 %v4879_v23, %v1432_v5 }
 0x7d8   :  { %v7375_v8 = vpop.eup %6110  ;;  %6118 = vrcp.f32 %v1403_v25  ;;  %1470 = vrot.lane.b32.xlu1 %v6109_v52, %s6450_s22 }
 0x7d9   :  { %6120 = vtanh.f32 %v1440_v2  ;;  %v1433_v41 = vmul.f32 %v7375_v8, %v1425_v21  ;;  %v1457_v34 = vsub.f32 1.0, %v7375_v8  ;;  %v1505_v52 = vmul.f32 %v7375_v8, %v7266_v7 }
 0x7db   :  { %v6113_v11 = vpop.eup %6112  ;;  %v1441_v37 = vadd.f32 %v4881_v49, %v1433_v41 }
 0x7dc   :  { %v6115_v39 = vpop.eup %6114  ;;  %1472 = vrot.lane.b32.xlu0 %v6113_v11, %s6450_s22 }
 0x7dd   :  { %6122 = vtanh.f32 %v1441_v37  ;;  %v1434_v6 = vmul.f32 %v6115_v39, %v1426_v40  ;;  %v1458_v49 = vsub.f32 1.0, %v6115_v39  ;;  %v1506_v13 = vmul.f32 %v6115_v39, %v7271_v19 }
 0x7df   :  { %v6117_v48 = vpop.eup %6116  ;;  %v1442_v26 = vadd.f32 %v4883_v62, %v1434_v6 }
 0x7e0   :  { %1474 = vrot.lane.b32.xlu1 %v6117_v48, %s6450_s22 }
 0x7e1   :  { %6124 = vtanh.f32 %v1442_v26  ;;  %v4904_v26 = vld [vmem:[%s8904_s29 + $0x290] sm:$0xff] }
 0x7e2   :  { %v6119_v1 = vpop.eup %6118 }
 0x7e3   :  { %v6121_v27 = vpop.eup %6120  ;;  %v1435_v44 = vmul.f32 %v6119_v1, %v1427_v17  ;;  %v1459_v37 = vsub.f32 1.0, %v6119_v1  ;;  %v1507_v8 = vmul.f32 %v6119_v1, %v7276_v58 }
 0x7e4   :  { %1476 = vrot.lane.b32.xlu0 %v6121_v27, %s6450_s22 }
 0x7e5   :  { %v1443_v60 = vadd.f32 %v4885_v14, %v1435_v44  ;;  %v4906_v44 = vld [vmem:[%s8904_s29 + $0x2a0] sm:$0xff] }
 0x7e7   :  { %v6123_v47 = vpop.eup %6122  ;;  %6126 = vtanh.f32 %v1443_v60 }
 0x7e8   :  { %1478 = vrot.lane.b32.xlu1 %v6123_v47, %s6450_s22 }
 0x7eb   :  { %v6125_v31 = vpop.eup %6124 }
 0x7ec   :  { %1480 = vrot.lane.b32.xlu0 %v6125_v31, %s6450_s22 }
 0x7f1   :  { %v6127_v54 = vpop.eup %6126 }
 0x7f2   :  { %1482 = vrot.lane.b32.xlu1 %v6127_v54, %s6450_s22 }
 0x846   :  { %v1469_v3 = vpop.permute.xlu0 %1468 }
 0x847   :  { %v1492_v38 = vmul.f32 %v1469_v3, %v1452_v28  ;;  %v4908_v28 = vld [vmem:[%s8904_s29 + $0x2b0] sm:$0xff] }
 0x849   :  { %v7400_v20 = vadd.f32 %v1500_v45, %v1492_v38 }
 0x84a   :  { %v1471_v35 = vpop.permute.xlu1 %1470 }
 0x84b   :  { %v1493_v61 = vmul.f32 %v1471_v35, %v1453_v42  ;;  %1524 = vrot.lane.b32.xlu0 %v7400_v20, %s6450_s22  ;;  %v4910_v35 = vld [vmem:[%s8904_s29 + $0x2c0] sm:$0xff] }
 0x84d   :  { %v7407_v63 = vadd.f32 %v1501_v53, %v1493_v61 }
 0x84e   :  { %v1473_v50 = vpop.permute.xlu0 %1472 }
 0x84f   :  { %v1494_v4 = vmul.f32 %v1473_v50, %v1454_v0  ;;  %1526 = vrot.lane.b32.xlu1 %v7407_v63, %s6450_s22 }
 0x851   :  { %v7414_v51 = vadd.f32 %v1502_v12, %v1494_v4 }
 0x852   :  { %v1475_v33 = vpop.permute.xlu1 %1474 }
 0x853   :  { %v1495_v43 = vmul.f32 %v1475_v33, %v1455_v46  ;;  %1528 = vrot.lane.b32.xlu0 %v7414_v51, %s6450_s22  ;;  %v4912_v46 = vld [vmem:[%s8904_s29 + $0x2d0] sm:$0xff] }
 0x855   :  { %v7421_v23 = vadd.f32 %v1503_v56, %v1495_v43 }
 0x856   :  { %v1477_v57 = vpop.permute.xlu0 %1476 }
 0x857   :  { %v1496_v5 = vmul.f32 %v1477_v57, %v1456_v55  ;;  %1530 = vrot.lane.b32.xlu1 %v7421_v23, %s6450_s22 }
 0x859   :  { %v7428_v25 = vadd.f32 %v1504_v59, %v1496_v5  ;;  %v4914_v5 = vld [vmem:[%s8904_s29 + $0x2e0] sm:$0xff] }
 0x85a   :  { %v1479_v32 = vpop.permute.xlu1 %1478 }
 0x85b   :  { %v1497_v2 = vmul.f32 %v1479_v32, %v1457_v34  ;;  %1532 = vrot.lane.b32.xlu0 %v7428_v25, %s6450_s22 }
 0x85d   :  { %v7435_v21 = vadd.f32 %v1505_v52, %v1497_v2 }
 0x85e   :  { %v1481_v10 = vpop.permute.xlu0 %1480 }
 0x85f   :  { %v1498_v41 = vmul.f32 %v1481_v10, %v1458_v49  ;;  %1534 = vrot.lane.b32.xlu1 %v7435_v21, %s6450_s22 }
 0x861   :  { %v7440_v11 = vadd.f32 %v1506_v13, %v1498_v41 }
 0x863   :  { %1536 = vrot.lane.b32.xlu0 %v7440_v11, %s6450_s22 }
 0x864   :  { %v1483_v7 = vpop.permute.xlu1 %1482 }
 0x865   :  { %v1499_v40 = vmul.f32 %v1483_v7, %v1459_v37 }
 0x867   :  { %v7445_v62 = vadd.f32 %v1507_v8, %v1499_v40  ;;  %v4903_v8 = vld [vmem:[%s8904_s29 + $0x288] sm:$0xff] }
 0x869   :  { %1538 = vrot.lane.b32.xlu1 %v7445_v62, %s6450_s22 }
 0x8bd   :  { %v1525_v19 = vpop.permute.xlu0 %1524 }
 0x8be   :  { %4894 = vmatmul.mubr.msk.f32.vlgmr.msra.gmra.mrb[32].mxu0 %vm243_vm0, %v1525_v19  ;;  %v4916_v19 = vld [vmem:[%s8904_s29 + $0x2f0] sm:$0xff] }
 0x8bf   :  { %1626 = vmatprep.mubr.f32.mxu0 %v6451_v9  ;;  %5682 = vmatpush1.bf16.msra.mxu0 %v6660_v15 }
 0x8c0   :  { %5684 = vmatprep.subr.bf16.mxu0 %v6662_v16 }
 0x8c1   :  { %v1527_v39 = vpop.permute.xlu1 %1526 }
 0x8c2   :  { %4895 = vmatmul.mubr.msk.f32.gmra.mrb[34].mxu0 %vm243_vm0, %v1527_v39 }
 0x8c3   :  { %1632 = vmatprep.mubr.f32.mxu0 %v6451_v9  ;;  %5686 = vmatpush1.bf16.msra.mxu0 %v6680_v22 }
 0x8c4   :  { %5688 = vmatprep.subr.bf16.mxu0 %v6683_v24 }
 0x8c5   :  { %v1529_v58 = vpop.permute.xlu0 %1528 }
 0x8c6   :  { %4896 = vmatmul.mubr.msk.f32.gmra.mrb[36].mxu0 %vm243_vm0, %v1529_v58 }
 0x8c7   :  { %1638 = vmatprep.mubr.f32.mxu0 %v6451_v9  ;;  %5690 = vmatpush1.bf16.msra.mxu0 %v6702_v29 }
 0x8c8   :  { %5692 = vmatprep.subr.bf16.mxu0 %v6705_v30  ;;  %v4902_v30 = vld [vmem:[%s8904_s29 + $0x280] sm:$0xff] }
 0x8c9   :  { %v1531_v15 = vpop.permute.xlu1 %1530 }
 0x8ca   :  { %4897 = vmatmul.mubr.msk.f32.gmra.mrb[38].mxu0 %vm243_vm0, %v1531_v15 }
 0x8cb   :  { %1644 = vmatprep.mubr.f32.mxu0 %v6451_v9  ;;  %5694 = vmatpush1.bf16.msra.mxu0 %v6716_v36 }
 0x8cd   :  { %v1533_v16 = vpop.permute.xlu0 %1532 }
 0x8ce   :  { %4898 = vmatmul.mubr.msk.f32.gmra.mrb[40].mxu0 %vm243_vm0, %v1533_v16 }
 0x8cf   :  { %1650 = vmatprep.mubr.f32.mxu0 %v6451_v9 }
 0x8d1   :  { %v1535_v22 = vpop.permute.xlu1 %1534 }
 0x8d2   :  { %4899 = vmatmul.mubr.msk.f32.gmra.mrb[42].mxu0 %vm243_vm0, %v1535_v22 }
 0x8d3   :  { %1656 = vmatprep.mubr.f32.mxu0 %v6451_v9 }
 0x8d5   :  { %v1537_v24 = vpop.permute.xlu0 %1536 }
 0x8d6   :  { %4900 = vmatmul.mubr.msk.f32.gmra.mrb[44].mxu0 %vm243_vm0, %v1537_v24 }
 0x8d7   :  { %1662 = vmatprep.mubr.f32.mxu0 %v6451_v9 }
 0x8db   :  { %v1539_v29 = vpop.permute.xlu1 %1538 }
 0x8dc   :  { %4901 = vmatmul.mubr.msk.f32.gmra.mrb[46].mxu0 %vm243_vm0, %v1539_v29 }
 0x8dd   :  { %2268 = vmatprep.mubr.f32.mxu0 %v6451_v9 }
 0x991   :  { %v1622_v36 = vpop.f32.mrb[32].mxu0 }
 0x992   :  { %v1688_v6 = vadd.f32 %v4902_v30, %v1622_v36  ;;  %v1624_v48 = vpop.f32.mrb[33].mxu0  ;;  %v4905_v36 = vld [vmem:[%s8904_s29 + $0x298] sm:$0xff] }
 0x993   :  { %v1744_v41 = vadd.f32 %v7161_v18, %v1624_v48 }
 0x994   :  { %v4918_v17 = vmul.f32 -1.442695, %v1688_v6 }
 0x995   :  { %v1628_v1 = vpop.f32.mrb[34].mxu0 }
 0x996   :  { %6128 = vpow2.f32 %v4918_v17  ;;  %v1689_v14 = vadd.f32 %v4904_v26, %v1628_v1  ;;  %v1630_v27 = vpop.f32.mrb[35].mxu0 }
 0x997   :  { %v1745_v22 = vadd.f32 %v7161_v18, %v1630_v27 }
 0x998   :  { %v4919_v60 = vmul.f32 -1.442695, %v1689_v14 }
 0x999   :  { %v1634_v47 = vpop.f32.mrb[36].mxu0 }
 0x99a   :  { %6130 = vpow2.f32 %v4919_v60  ;;  %v1690_v31 = vadd.f32 %v4906_v44, %v1634_v47  ;;  %v1636_v54 = vpop.f32.mrb[37].mxu0  ;;  %v4907_v44 = vld [vmem:[%s8904_s29 + $0x2a8] sm:$0xff] }
 0x99b   :  { %v1746_v14 = vadd.f32 %v7161_v18, %v1636_v54  ;;  %v4909_v54 = vld [vmem:[%s8904_s29 + $0x2b8] sm:$0xff] }
 0x99c   :  { %v4920_v3 = vmul.f32 -1.442695, %v1690_v31 }
 0x99d   :  { %v1640_v45 = vpop.f32.mrb[38].mxu0 }
 0x99e   :  { %6132 = vpow2.f32 %v4920_v3  ;;  %v1691_v38 = vadd.f32 %v4908_v28, %v1640_v45  ;;  %v7484_v42 = vpop.f32.mrb[39].mxu0 }
 0x99f   :  { %v1747_v3 = vadd.f32 %v7161_v18, %v7484_v42  ;;  %v4911_v42 = vld [vmem:[%s8904_s29 + $0x2c8] sm:$0xff] }
 0x9a0   :  { %v6129_v53 = vpop.eup %6128  ;;  %v4921_v61 = vmul.f32 -1.442695, %v1691_v38 }
 0x9a1   :  { %v1720_v0 = vadd.f32 1.0, %v6129_v53  ;;  %v1646_v50 = vpop.f32.mrb[40].mxu0 }
 0x9a2   :  { %6134 = vpow2.f32 %v4921_v61  ;;  %v1692_v12 = vadd.f32 %v4910_v35, %v1646_v50  ;;  %v7489_v4 = vpop.f32.mrb[41].mxu0 }
 0x9a3   :  { %6136 = vrcp.f32 %v1720_v0  ;;  %v1748_v0 = vadd.f32 %v7161_v18, %v7489_v4  ;;  %v4913_v4 = vld [vmem:[%s8904_s29 + $0x2d8] sm:$0xff] }
 0x9a4   :  { %v6131_v33 = vpop.eup %6130  ;;  %v4922_v56 = vmul.f32 -1.442695, %v1692_v12 }
 0x9a5   :  { %v1721_v43 = vadd.f32 1.0, %v6131_v33  ;;  %v1652_v55 = vpop.f32.mrb[42].mxu0 }
 0x9a6   :  { %6138 = vpow2.f32 %v4922_v56  ;;  %v1693_v57 = vadd.f32 %v4912_v46, %v1652_v55  ;;  %v7494_v59 = vpop.f32.mrb[43].mxu0 }
 0x9a7   :  { %6140 = vrcp.f32 %v1721_v43  ;;  %v1749_v55 = vadd.f32 %v7161_v18, %v7494_v59  ;;  %v4915_v59 = vld [vmem:[%s8904_s29 + $0x2e8] sm:$0xff] }
 0x9a8   :  { %v6133_v34 = vpop.eup %6132  ;;  %v4923_v32 = vmul.f32 -1.442695, %v1693_v57 }
 0x9a9   :  { %v1722_v52 = vadd.f32 1.0, %v6133_v34  ;;  %v1658_v2 = vpop.f32.mrb[44].mxu0 }
 0x9aa   :  { %6142 = vpow2.f32 %v4923_v32  ;;  %v1694_v49 = vadd.f32 %v4914_v5, %v1658_v2  ;;  %v7499_v10 = vpop.f32.mrb[45].mxu0 }
 0x9ab   :  { %6144 = vrcp.f32 %v1722_v52  ;;  %v1750_v52 = vadd.f32 %v7161_v18, %v7499_v10  ;;  %v4917_v10 = vld [vmem:[%s8904_s29 + $0x2f8] sm:$0xff] }
 0x9ac   :  { %v6135_v13 = vpop.eup %6134  ;;  %v4924_v37 = vmul.f32 -1.442695, %v1694_v49 }
 0x9ad   :  { %v7502_v7 = vpop.eup %6136  ;;  %v1723_v40 = vadd.f32 1.0, %v6135_v13 }
 0x9ae   :  { %v1752_v39 = vmul.f32 %v7502_v7, %v1744_v41  ;;  %6146 = vpow2.f32 %v4924_v37 }
 0x9af   :  { %6148 = vrcp.f32 %v1723_v40  ;;  %v1664_v58 = vpop.f32.mrb[46].mxu0 }
 0x9b0   :  { %v6139_v15 = vpop.eup %6138  ;;  %v1760_v16 = vadd.f32 %v4903_v8, %v1752_v39  ;;  %v1695_v24 = vadd.f32 %v4916_v19, %v1664_v58  ;;  %v1666_v29 = vpop.f32.mrb[47].mxu0 }
 0x9b1   :  { %v7512_v30 = vpop.eup %6140  ;;  %v1724_v6 = vadd.f32 1.0, %v6139_v15  ;;  %v1751_v37 = vadd.f32 %v7161_v18, %v1666_v29  ;;  %v1776_v18 = vsub.f32 1.0, %v7502_v7 }
 0x9b2   :  { %6150 = vtanh.f32 %v1760_v16  ;;  %v1753_v48 = vmul.f32 %v7512_v30, %v1745_v22  ;;  %v4925_v26 = vmul.f32 -1.442695, %v1695_v24  ;;  %v1824_v24 = vmul.f32 %v7502_v7, %v7400_v20 }
 0x9b3   :  { %6152 = vrcp.f32 %v1724_v6  ;;  %v1777_v6 = vsub.f32 1.0, %v7512_v30 }
 0x9b4   :  { %v6143_v17 = vpop.eup %6142  ;;  %v1761_v1 = vadd.f32 %v4905_v36, %v1753_v48  ;;  %6154 = vpow2.f32 %v4925_v26  ;;  %v1825_v26 = vmul.f32 %v7512_v30, %v7407_v63 }
 0x9b5   :  { %v7519_v27 = vpop.eup %6144  ;;  %v1725_v60 = vadd.f32 1.0, %v6143_v17 }
 0x9b6   :  { %6156 = vtanh.f32 %v1761_v1  ;;  %v1754_v47 = vmul.f32 %v7519_v27, %v1746_v14  ;;  %v1778_v14 = vsub.f32 1.0, %v7519_v27  ;;  %v1826_v20 = vmul.f32 %v7519_v27, %v7414_v51 }
 0x9b7   :  { %6158 = vrcp.f32 %v1725_v60 }
 0x9b8   :  { %v6147_v31 = vpop.eup %6146  ;;  %v1762_v28 = vadd.f32 %v4907_v44, %v1754_v47 }
 0x9b9   :  { %v7527_v45 = vpop.eup %6148  ;;  %v1726_v38 = vadd.f32 1.0, %v6147_v31 }
 0x9ba   :  { %6160 = vtanh.f32 %v1762_v28  ;;  %v1755_v35 = vmul.f32 %v7527_v45, %v1747_v3  ;;  %v1779_v63 = vsub.f32 1.0, %v7527_v45  ;;  %v1827_v47 = vmul.f32 %v7527_v45, %v7421_v23 }
 0x9bb   :  { %6162 = vrcp.f32 %v1726_v38 }
 0x9bc   :  { %v6151_v53 = vpop.eup %6150  ;;  %v1763_v61 = vadd.f32 %v4909_v54, %v1755_v35 }
 0x9bd   :  { %v7535_v50 = vpop.eup %6152  ;;  %1792 = vrot.lane.b32.xlu0 %v6151_v53, %s6450_s22 }
 0x9be   :  { %v6155_v12 = vpop.eup %6154  ;;  %6164 = vtanh.f32 %v1763_v61  ;;  %v1756_v46 = vmul.f32 %v7535_v50, %v1748_v0  ;;  %v1780_v51 = vsub.f32 1.0, %v7535_v50  ;;  %v1828_v3 = vmul.f32 %v7535_v50, %v7428_v25 }
 0x9bf   :  { %v1727_v33 = vadd.f32 1.0, %v6155_v12 }
 0x9c0   :  { %v6157_v56 = vpop.eup %6156  ;;  %v1764_v43 = vadd.f32 %v4911_v42, %v1756_v46 }
 0x9c1   :  { %v7544_v57 = vpop.eup %6158  ;;  %6166 = vrcp.f32 %v1727_v33  ;;  %1794 = vrot.lane.b32.xlu1 %v6157_v56, %s6450_s22 }
 0x9c2   :  { %6168 = vtanh.f32 %v1764_v43  ;;  %v1757_v5 = vmul.f32 %v7544_v57, %v1749_v55  ;;  %v1781_v23 = vsub.f32 1.0, %v7544_v57  ;;  %v1829_v35 = vmul.f32 %v7544_v57, %v7435_v21 }
 0x9c4   :  { %v6161_v34 = vpop.eup %6160  ;;  %v1765_v32 = vadd.f32 %v4913_v4, %v1757_v5 }
 0x9c5   :  { %v6163_v2 = vpop.eup %6162  ;;  %1796 = vrot.lane.b32.xlu0 %v6161_v34, %s6450_s22 }
 0x9c6   :  { %6170 = vtanh.f32 %v1765_v32  ;;  %v1758_v49 = vmul.f32 %v6163_v2, %v1750_v52  ;;  %v1782_v0 = vsub.f32 1.0, %v6163_v2  ;;  %v1830_v50 = vmul.f32 %v6163_v2, %v7440_v11  ;;  %v4934_v52 = vld [vmem:[%s8904_s29 + $0x300] sm:$0xff] }
 0x9c8   :  { %v6165_v13 = vpop.eup %6164  ;;  %v1766_v41 = vadd.f32 %v4915_v59, %v1758_v49 }
 0x9c9   :  { %1798 = vrot.lane.b32.xlu1 %v6165_v13, %s6450_s22  ;;  %v4936_v13 = vld [vmem:[%s8904_s29 + $0x310] sm:$0xff] }
 0x9ca   :  { %6172 = vtanh.f32 %v1766_v41 }
 0x9cb   :  { %v6167_v8 = vpop.eup %6166 }
 0x9cc   :  { %v6169_v40 = vpop.eup %6168  ;;  %v1759_v19 = vmul.f32 %v6167_v8, %v1751_v37  ;;  %v1783_v46 = vsub.f32 1.0, %v6167_v8  ;;  %v1831_v33 = vmul.f32 %v6167_v8, %v7445_v62 }
 0x9cd   :  { %1800 = vrot.lane.b32.xlu0 %v6169_v40, %s6450_s22  ;;  %v4938_v40 = vld [vmem:[%s8904_s29 + $0x320] sm:$0xff] }
 0x9ce   :  { %v1767_v39 = vadd.f32 %v4917_v10, %v1759_v19 }
 0x9d0   :  { %v6171_v58 = vpop.eup %6170  ;;  %6174 = vtanh.f32 %v1767_v39 }
 0x9d1   :  { %1802 = vrot.lane.b32.xlu1 %v6171_v58, %s6450_s22 }
 0x9d4   :  { %v6173_v15 = vpop.eup %6172 }
 0x9d5   :  { %1804 = vrot.lane.b32.xlu0 %v6173_v15, %s6450_s22 }
 0x9da   :  { %v6175_v16 = vpop.eup %6174 }
 0x9db   :  { %1806 = vrot.lane.b32.xlu1 %v6175_v16, %s6450_s22  ;;  %v4940_v16 = vld [vmem:[%s8904_s29 + $0x330] sm:$0xff] }
 0xa2f   :  { %v1793_v22 = vpop.permute.xlu0 %1792 }
 0xa30   :  { %v1816_v29 = vmul.f32 %v1793_v22, %v1776_v18 }
 0xa32   :  { %v7569_v36 = vadd.f32 %v1824_v24, %v1816_v29 }
 0xa33   :  { %v1795_v48 = vpop.permute.xlu1 %1794 }
 0xa34   :  { %v1817_v17 = vmul.f32 %v1795_v48, %v1777_v6  ;;  %1848 = vrot.lane.b32.xlu0 %v7569_v36, %s6450_s22  ;;  %v4942_v6 = vld [vmem:[%s8904_s29 + $0x340] sm:$0xff] }
 0xa36   :  { %v7576_v1 = vadd.f32 %v1825_v26, %v1817_v17 }
 0xa37   :  { %v1797_v44 = vpop.permute.xlu0 %1796 }
 0xa38   :  { %v1818_v7 = vmul.f32 %v1797_v44, %v1778_v14  ;;  %1850 = vrot.lane.b32.xlu1 %v7576_v1, %s6450_s22 }
 0xa3a   :  { %v7583_v60 = vadd.f32 %v1826_v20, %v1818_v7  ;;  %v4944_v7 = vld [vmem:[%s8904_s29 + $0x350] sm:$0xff] }
 0xa3b   :  { %v1799_v30 = vpop.permute.xlu1 %1798 }
 0xa3c   :  { %v1819_v31 = vmul.f32 %v1799_v30, %v1779_v63  ;;  %1852 = vrot.lane.b32.xlu0 %v7583_v60, %s6450_s22 }
 0xa3e   :  { %v7590_v28 = vadd.f32 %v1827_v47, %v1819_v31 }
 0xa3f   :  { %v1801_v27 = vpop.permute.xlu0 %1800 }
 0xa40   :  { %v1820_v54 = vmul.f32 %v1801_v27, %v1780_v51  ;;  %1854 = vrot.lane.b32.xlu1 %v7590_v28, %s6450_s22 }
 0xa42   :  { %v7597_v38 = vadd.f32 %v1828_v3, %v1820_v54  ;;  %v4946_v3 = vld [vmem:[%s8904_s29 + $0x360] sm:$0xff] }
 0xa43   :  { %v1803_v45 = vpop.permute.xlu1 %1802 }
 0xa44   :  { %v1821_v53 = vmul.f32 %v1803_v45, %v1781_v23  ;;  %1856 = vrot.lane.b32.xlu0 %v7597_v38, %s6450_s22 }
 0xa46   :  { %v7604_v61 = vadd.f32 %v1829_v35, %v1821_v53 }
 0xa47   :  { %v1805_v25 = vpop.permute.xlu0 %1804 }
 0xa48   :  { %v1822_v42 = vmul.f32 %v1805_v25, %v1782_v0  ;;  %1858 = vrot.lane.b32.xlu1 %v7604_v61, %s6450_s22 }
 0xa4a   :  { %v7609_v12 = vadd.f32 %v1830_v50, %v1822_v42  ;;  %v7666_v50 = vld [vmem:[%s8905_s19] ss:$0 sm:$0xff] }
 0xa4c   :  { %1860 = vrot.lane.b32.xlu0 %v7609_v12, %s6450_s22 }
 0xa4d   :  { %v1807_v21 = vpop.permute.xlu1 %1806 }
 0xa4e   :  { %v1823_v56 = vmul.f32 %v1807_v21, %v1783_v46 }
 0xa50   :  { %v7614_v43 = vadd.f32 %v1831_v33, %v1823_v56  ;;  %v4935_v33 = vld [vmem:[%s8904_s29 + $0x308] sm:$0xff] }
 0xa52   :  { %1862 = vrot.lane.b32.xlu1 %v7614_v43, %s6450_s22 }
 0xaa6   :  { %v1849_v11 = vpop.permute.xlu0 %1848 }
 0xaa7   :  { %4926 = vmatmul.mubr.msk.f32.vlgmr.msra.gmra.mrb[32].mxu1 %vm243_vm0, %v1849_v11  ;;  %v4948_v11 = vld [vmem:[%s8904_s29 + $0x370] sm:$0xff] }
 0xaa8   :  { %1950 = vmatprep.mubr.f32.mxu1 %v6451_v9 }
 0xaaa   :  { %v1851_v55 = vpop.permute.xlu1 %1850 }
 0xaab   :  { %4927 = vmatmul.mubr.msk.f32.gmra.mrb[34].mxu1 %vm243_vm0, %v1851_v55 }
 0xaac   :  { %1956 = vmatprep.mubr.f32.mxu1 %v6451_v9 }
 0xaae   :  { %v1853_v57 = vpop.permute.xlu0 %1852 }
 0xaaf   :  { %4928 = vmatmul.mubr.msk.f32.gmra.mrb[36].mxu1 %vm243_vm0, %v1853_v57 }
 0xab0   :  { %1962 = vmatprep.mubr.f32.mxu1 %v6451_v9 }
 0xab2   :  { %v1855_v62 = vpop.permute.xlu1 %1854 }
 0xab3   :  { %4929 = vmatmul.mubr.msk.f32.gmra.mrb[38].mxu1 %vm243_vm0, %v1855_v62 }
 0xab4   :  { %1968 = vmatprep.mubr.f32.mxu1 %v6451_v9 }
 0xab6   :  { %v1857_v4 = vpop.permute.xlu0 %1856 }
 0xab7   :  { %4930 = vmatmul.mubr.msk.f32.gmra.mrb[40].mxu1 %vm243_vm0, %v1857_v4 }
 0xab8   :  { %1974 = vmatprep.mubr.f32.mxu1 %v6451_v9 }
 0xaba   :  { %v1859_v5 = vpop.permute.xlu1 %1858 }
 0xabb   :  { %4931 = vmatmul.mubr.msk.f32.gmra.mrb[42].mxu1 %vm243_vm0, %v1859_v5 }
 0xabc   :  { %1980 = vmatprep.mubr.f32.mxu1 %v6451_v9 }
 0xabe   :  { %v1861_v34 = vpop.permute.xlu0 %1860 }
 0xabf   :  { %4932 = vmatmul.mubr.msk.f32.gmra.mrb[44].mxu1 %vm243_vm0, %v1861_v34 }
 0xac0   :  { %1986 = vmatprep.mubr.f32.mxu1 %v6451_v9 }
 0xac4   :  { %v1863_v32 = vpop.permute.xlu1 %1862 }
 0xac5   :  { %4933 = vmatmul.mubr.msk.f32.gmra.mrb[46].mxu1 %vm243_vm0, %v1863_v32 }
 0xac6   :  { %2728 = vmatprep.mubr.f32.mxu1 %v6451_v9 }
 0xb7a   :  { %v1946_v2 = vpop.f32.mrb[32].mxu1 }
 0xb7b   :  { %v2012_v59 = vadd.f32 %v4934_v52, %v1946_v2  ;;  %v1948_v49 = vpop.f32.mrb[33].mxu1  ;;  %v4937_v2 = vld [vmem:[%s8904_s29 + $0x318] sm:$0xff] }
 0xb7c   :  { %v2068_v42 = vadd.f32 %v7666_v50, %v1948_v49 }
 0xb7d   :  { %v4950_v41 = vmul.f32 -1.442695, %v2012_v59 }
 0xb7e   :  { %v1952_v37 = vpop.f32.mrb[34].mxu1 }
 0xb7f   :  { %6176 = vpow2.f32 %v4950_v41  ;;  %v2013_v8 = vadd.f32 %v4936_v13, %v1952_v37  ;;  %v1954_v10 = vpop.f32.mrb[35].mxu1 }
 0xb80   :  { %v2069_v5 = vadd.f32 %v7666_v50, %v1954_v10 }
 0xb81   :  { %v4951_v19 = vmul.f32 -1.442695, %v2013_v8 }
 0xb82   :  { %v1958_v39 = vpop.f32.mrb[36].mxu1 }
 0xb83   :  { %6178 = vpow2.f32 %v4951_v19  ;;  %v2014_v58 = vadd.f32 %v4938_v40, %v1958_v39  ;;  %v1960_v15 = vpop.f32.mrb[37].mxu1  ;;  %v4939_v40 = vld [vmem:[%s8904_s29 + $0x328] sm:$0xff] }
 0xb84   :  { %v2070_v8 = vadd.f32 %v7666_v50, %v1960_v15  ;;  %v4941_v15 = vld [vmem:[%s8904_s29 + $0x338] sm:$0xff] }
 0xb85   :  { %v4952_v18 = vmul.f32 -1.442695, %v2014_v58 }
 0xb86   :  { %v1964_v22 = vpop.f32.mrb[38].mxu1 }
 0xb87   :  { %6180 = vpow2.f32 %v4952_v18  ;;  %v2015_v24 = vadd.f32 %v4940_v16, %v1964_v22  ;;  %v7646_v29 = vpop.f32.mrb[39].mxu1 }
 0xb88   :  { %v2071_v18 = vadd.f32 %v7666_v50, %v7646_v29  ;;  %v4943_v29 = vld [vmem:[%s8904_s29 + $0x348] sm:$0xff] }
 0xb89   :  { %v6177_v48 = vpop.eup %6176  ;;  %v4953_v26 = vmul.f32 -1.442695, %v2015_v24 }
 0xb8a   :  { %v2044_v17 = vadd.f32 1.0, %v6177_v48  ;;  %v1970_v14 = vpop.f32.mrb[40].mxu1 }
 0xb8b   :  { %6182 = vpow2.f32 %v4953_v26  ;;  %v2016_v44 = vadd.f32 %v4942_v6, %v1970_v14  ;;  %v7651_v20 = vpop.f32.mrb[41].mxu1 }
 0xb8c   :  { %6184 = vrcp.f32 %v2044_v17  ;;  %v2072_v17 = vadd.f32 %v7666_v50, %v7651_v20  ;;  %v4945_v20 = vld [vmem:[%s8904_s29 + $0x358] sm:$0xff] }
 0xb8d   :  { %v6179_v63 = vpop.eup %6178  ;;  %v4954_v30 = vmul.f32 -1.442695, %v2016_v44 }
 0xb8e   :  { %v2045_v47 = vadd.f32 1.0, %v6179_v63  ;;  %v1976_v31 = vpop.f32.mrb[42].mxu1 }
 0xb8f   :  { %6186 = vpow2.f32 %v4954_v30  ;;  %v2017_v51 = vadd.f32 %v4944_v7, %v1976_v31  ;;  %v7656_v27 = vpop.f32.mrb[43].mxu1 }
 0xb90   :  { %6188 = vrcp.f32 %v2045_v47  ;;  %v2073_v31 = vadd.f32 %v7666_v50, %v7656_v27  ;;  %v4947_v27 = vld [vmem:[%s8904_s29 + $0x368] sm:$0xff] }
 0xb91   :  { %v6181_v54 = vpop.eup %6180  ;;  %v4955_v23 = vmul.f32 -1.442695, %v2017_v51 }
 0xb92   :  { %v2046_v45 = vadd.f32 1.0, %v6181_v54  ;;  %v1982_v35 = vpop.f32.mrb[44].mxu1 }
 0xb93   :  { %6190 = vpow2.f32 %v4955_v23  ;;  %v2018_v53 = vadd.f32 %v4946_v3, %v1982_v35  ;;  %v7661_v0 = vpop.f32.mrb[45].mxu1 }
 0xb94   :  { %6192 = vrcp.f32 %v2046_v45  ;;  %v2074_v45 = vadd.f32 %v7666_v50, %v7661_v0  ;;  %v4949_v0 = vld [vmem:[%s8904_s29 + $0x378] sm:$0xff] }
 0xb95   :  { %v6183_v25 = vpop.eup %6182  ;;  %v4956_v46 = vmul.f32 -1.442695, %v2018_v53 }
 0xb96   :  { %v7669_v21 = vpop.eup %6184  ;;  %v2047_v56 = vadd.f32 1.0, %v6183_v25 }
 0xb97   :  { %v2076_v55 = vmul.f32 %v7669_v21, %v2068_v42  ;;  %6194 = vpow2.f32 %v4956_v46 }
 0xb98   :  { %6196 = vrcp.f32 %v2047_v56  ;;  %v1988_v57 = vpop.f32.mrb[46].mxu1 }
 0xb99   :  { %v6187_v62 = vpop.eup %6186  ;;  %v2084_v4 = vadd.f32 %v4935_v33, %v2076_v55  ;;  %v2019_v34 = vadd.f32 %v4948_v11, %v1988_v57  ;;  %v1990_v32 = vpop.f32.mrb[47].mxu1 }
 0xb9a   :  { %v7679_v52 = vpop.eup %6188  ;;  %v2048_v59 = vadd.f32 1.0, %v6187_v62  ;;  %v2075_v46 = vadd.f32 %v7666_v50, %v1990_v32  ;;  %v2148_v32 = vmul.f32 %v7669_v21, %v7569_v36 }
 0xb9b   :  { %6198 = vtanh.f32 %v2084_v4  ;;  %v2077_v49 = vmul.f32 %v7679_v52, %v2069_v5  ;;  %v4957_v13 = vmul.f32 -1.442695, %v2019_v34  ;;  %v2100_v5 = vsub.f32 1.0, %v7669_v21 }
 0xb9c   :  { %6200 = vrcp.f32 %v2048_v59 }
 0xb9d   :  { %v6191_v41 = vpop.eup %6190  ;;  %v2085_v37 = vadd.f32 %v4937_v2, %v2077_v49  ;;  %6202 = vpow2.f32 %v4957_v13  ;;  %v2101_v49 = vsub.f32 1.0, %v7679_v52 }
 0xb9e   :  { %v7686_v10 = vpop.eup %6192  ;;  %v2049_v19 = vadd.f32 1.0, %v6191_v41  ;;  %v2149_v41 = vmul.f32 %v7679_v52, %v7576_v1 }
 0xb9f   :  { %6204 = vtanh.f32 %v2085_v37  ;;  %v2078_v39 = vmul.f32 %v7686_v10, %v2070_v8  ;;  %v2150_v36 = vmul.f32 %v7686_v10, %v7583_v60 }
 0xba0   :  { %6206 = vrcp.f32 %v2049_v19 }
 0xba1   :  { %v6195_v58 = vpop.eup %6194  ;;  %v2086_v16 = vadd.f32 %v4939_v40, %v2078_v39  ;;  %v2102_v40 = vsub.f32 1.0, %v7686_v10 }
 0xba2   :  { %v7694_v22 = vpop.eup %6196  ;;  %v2050_v24 = vadd.f32 1.0, %v6195_v58 }
 0xba3   :  { %6208 = vtanh.f32 %v2086_v16  ;;  %v2079_v6 = vmul.f32 %v7694_v22, %v2071_v18  ;;  %v2103_v1 = vsub.f32 1.0, %v7694_v22  ;;  %v2151_v58 = vmul.f32 %v7694_v22, %v7590_v28 }
 0xba4   :  { %6210 = vrcp.f32 %v2050_v24 }
 0xba5   :  { %v6199_v48 = vpop.eup %6198  ;;  %v2087_v26 = vadd.f32 %v4941_v15, %v2079_v6 }
 0xba6   :  { %v7702_v14 = vpop.eup %6200  ;;  %2116 = vrot.lane.b32.xlu0 %v6199_v48, %s6450_s22 }
 0xba7   :  { %v6203_v44 = vpop.eup %6202  ;;  %6212 = vtanh.f32 %v2087_v26  ;;  %v2080_v7 = vmul.f32 %v7702_v14, %v2072_v17  ;;  %v2104_v60 = vsub.f32 1.0, %v7702_v14  ;;  %v2152_v15 = vmul.f32 %v7702_v14, %v7597_v38 }
 0xba8   :  { %v2051_v63 = vadd.f32 1.0, %v6203_v44 }
 0xba9   :  { %v6205_v30 = vpop.eup %6204  ;;  %v2088_v47 = vadd.f32 %v4943_v29, %v2080_v7 }
 0xbaa   :  { %v7711_v51 = vpop.eup %6206  ;;  %6214 = vrcp.f32 %v2051_v63  ;;  %2118 = vrot.lane.b32.xlu1 %v6205_v30, %s6450_s22 }
 0xbab   :  { %6216 = vtanh.f32 %v2088_v47  ;;  %v2081_v3 = vmul.f32 %v7711_v51, %v2073_v31  ;;  %v2105_v28 = vsub.f32 1.0, %v7711_v51  ;;  %v2153_v48 = vmul.f32 %v7711_v51, %v7604_v61 }
 0xbad   :  { %v6209_v54 = vpop.eup %6208  ;;  %v2089_v23 = vadd.f32 %v4945_v20, %v2081_v3 }
 0xbae   :  { %v6211_v35 = vpop.eup %6210  ;;  %2120 = vrot.lane.b32.xlu0 %v6209_v54, %s6450_s22 }
 0xbaf   :  { %6218 = vtanh.f32 %v2089_v23  ;;  %v2082_v53 = vmul.f32 %v6211_v35, %v2074_v45  ;;  %v2106_v29 = vsub.f32 1.0, %v6211_v35  ;;  %v2154_v14 = vmul.f32 %v6211_v35, %v7609_v12  ;;  %v4966_v35 = vld [vmem:[%s8904_s29 + $0x380] sm:$0xff] }
 0xbb1   :  { %v6213_v25 = vpop.eup %6212  ;;  %v2090_v42 = vadd.f32 %v4947_v27, %v2082_v53 }
 0xbb2   :  { %2122 = vrot.lane.b32.xlu1 %v6213_v25, %s6450_s22 }
 0xbb3   :  { %6220 = vtanh.f32 %v2090_v42  ;;  %v4968_v42 = vld [vmem:[%s8904_s29 + $0x390] sm:$0xff] }
 0xbb4   :  { %v6215_v33 = vpop.eup %6214 }
 0xbb5   :  { %v6217_v56 = vpop.eup %6216  ;;  %v2083_v11 = vmul.f32 %v6215_v33, %v2075_v46  ;;  %v2107_v63 = vsub.f32 1.0, %v6215_v33  ;;  %v2155_v30 = vmul.f32 %v6215_v33, %v7614_v43 }
 0xbb6   :  { %2124 = vrot.lane.b32.xlu0 %v6217_v56, %s6450_s22 }
 0xbb7   :  { %v2091_v55 = vadd.f32 %v4949_v0, %v2083_v11  ;;  %v4970_v11 = vld [vmem:[%s8904_s29 + $0x3a0] sm:$0xff] }
 0xbb9   :  { %v6219_v57 = vpop.eup %6218  ;;  %6222 = vtanh.f32 %v2091_v55 }
 0xbba   :  { %2126 = vrot.lane.b32.xlu1 %v6219_v57, %s6450_s22 }
 0xbbd   :  { %v6221_v62 = vpop.eup %6220 }
 0xbbe   :  { %2128 = vrot.lane.b32.xlu0 %v6221_v62, %s6450_s22 }
 0xbc3   :  { %v6223_v4 = vpop.eup %6222 }
 0xbc4   :  { %2130 = vrot.lane.b32.xlu1 %v6223_v4, %s6450_s22 }
 0xc18   :  { %v2117_v34 = vpop.permute.xlu0 %2116 }
 0xc19   :  { %v2140_v2 = vmul.f32 %v2117_v34, %v2100_v5  ;;  %v4972_v5 = vld [vmem:[%s8904_s29 + $0x3b0] sm:$0xff] }
 0xc1b   :  { %v7736_v59 = vadd.f32 %v2148_v32, %v2140_v2 }
 0xc1c   :  { %v2119_v13 = vpop.permute.xlu1 %2118 }
 0xc1d   :  { %v2141_v37 = vmul.f32 %v2119_v13, %v2101_v49  ;;  %2172 = vrot.lane.b32.xlu0 %v7736_v59, %s6450_s22  ;;  %v4974_v13 = vld [vmem:[%s8904_s29 + $0x3c0] sm:$0xff] }
 0xc1f   :  { %v7743_v8 = vadd.f32 %v2149_v41, %v2141_v37 }
 0xc20   :  { %v2121_v19 = vpop.permute.xlu0 %2120 }
 0xc21   :  { %v2142_v21 = vmul.f32 %v2121_v19, %v2102_v40  ;;  %2174 = vrot.lane.b32.xlu1 %v7743_v8, %s6450_s22 }
 0xc23   :  { %v7750_v39 = vadd.f32 %v2150_v36, %v2142_v21 }
 0xc24   :  { %v2123_v52 = vpop.permute.xlu1 %2122 }
 0xc25   :  { %v2143_v16 = vmul.f32 %v2123_v52, %v2103_v1  ;;  %2176 = vrot.lane.b32.xlu0 %v7750_v39, %s6450_s22  ;;  %v4976_v1 = vld [vmem:[%s8904_s29 + $0x3d0] sm:$0xff] }
 0xc27   :  { %v7757_v18 = vadd.f32 %v2151_v58, %v2143_v16 }
 0xc28   :  { %v2125_v10 = vpop.permute.xlu0 %2124 }
 0xc29   :  { %v2144_v24 = vmul.f32 %v2125_v10, %v2104_v60  ;;  %2178 = vrot.lane.b32.xlu1 %v7757_v18, %s6450_s22 }
 0xc2b   :  { %v7764_v6 = vadd.f32 %v2152_v15, %v2144_v24  ;;  %v4978_v24 = vld [vmem:[%s8904_s29 + $0x3e0] sm:$0xff] }
 0xc2c   :  { %v2127_v22 = vpop.permute.xlu1 %2126 }
 0xc2d   :  { %v2145_v26 = vmul.f32 %v2127_v22, %v2105_v28  ;;  %2180 = vrot.lane.b32.xlu0 %v7764_v6, %s6450_s22 }
 0xc2f   :  { %v7771_v17 = vadd.f32 %v2153_v48, %v2145_v26 }
 0xc30   :  { %v2129_v38 = vpop.permute.xlu0 %2128 }
 0xc31   :  { %v2146_v44 = vmul.f32 %v2129_v38, %v2106_v29  ;;  %2182 = vrot.lane.b32.xlu1 %v7771_v17, %s6450_s22 }
 0xc33   :  { %v7776_v7 = vadd.f32 %v2154_v14, %v2146_v44 }
 0xc35   :  { %2184 = vrot.lane.b32.xlu0 %v7776_v7, %s6450_s22 }
 0xc36   :  { %v2131_v61 = vpop.permute.xlu1 %2130 }
 0xc37   :  { %v2147_v47 = vmul.f32 %v2131_v61, %v2107_v63 }
 0xc39   :  { %v7781_v31 = vadd.f32 %v2155_v30, %v2147_v47  ;;  %v4967_v30 = vld [vmem:[%s8904_s29 + $0x388] sm:$0xff] }
 0xc3b   :  { %2186 = vrot.lane.b32.xlu1 %v7781_v31, %s6450_s22 }
 0xc8f   :  { %v2173_v12 = vpop.permute.xlu0 %2172 }
 0xc90   :  { %4958 = vmatmul.mubr.msk.f32.vlgmr.msra.gmra.mrb[48].mxu0 %vm243_vm0, %v2173_v12  ;;  %v4980_v12 = vld [vmem:[%s8904_s29 + $0x3f0] sm:$0xff] }
 0xc91   :  { %2274 = vmatprep.mubr.f32.mxu0 %v6451_v9 }
 0xc93   :  { %v2175_v51 = vpop.permute.xlu1 %2174 }
 0xc94   :  { %4959 = vmatmul.mubr.msk.f32.gmra.mrb[50].mxu0 %vm243_vm0, %v2175_v51 }
 0xc95   :  { %2280 = vmatprep.mubr.f32.mxu0 %v6451_v9 }
 0xc97   :  { %v2177_v20 = vpop.permute.xlu0 %2176 }
 0xc98   :  { %4960 = vmatmul.mubr.msk.f32.gmra.mrb[52].mxu0 %vm243_vm0, %v2177_v20 }
 0xc99   :  { %2286 = vmatprep.mubr.f32.mxu0 %v6451_v9 }
 0xc9b   :  { %v2179_v43 = vpop.permute.xlu1 %2178 }
 0xc9c   :  { %4961 = vmatmul.mubr.msk.f32.gmra.mrb[54].mxu0 %vm243_vm0, %v2179_v43 }
 0xc9d   :  { %2292 = vmatprep.mubr.f32.mxu0 %v6451_v9 }
 0xc9f   :  { %v2181_v3 = vpop.permute.xlu0 %2180 }
 0xca0   :  { %4962 = vmatmul.mubr.msk.f32.gmra.mrb[56].mxu0 %vm243_vm0, %v2181_v3 }
 0xca1   :  { %2298 = vmatprep.mubr.f32.mxu0 %v6451_v9 }
 0xca3   :  { %v2183_v54 = vpop.permute.xlu1 %2182 }
 0xca4   :  { %4963 = vmatmul.mubr.msk.f32.gmra.mrb[58].mxu0 %vm243_vm0, %v2183_v54 }
 0xca5   :  { %2304 = vmatprep.mubr.f32.mxu0 %v6451_v9 }
 0xca7   :  { %v2185_v23 = vpop.permute.xlu0 %2184 }
 0xca8   :  { %4964 = vmatmul.mubr.msk.f32.gmra.mrb[60].mxu0 %vm243_vm0, %v2185_v23 }
 0xca9   :  { %2310 = vmatprep.mubr.f32.mxu0 %v6451_v9 }
 0xcad   :  { %v2187_v45 = vpop.permute.xlu1 %2186 }
 0xcae   :  { %4965 = vmatmul.mubr.msk.f32.gmra.mrb[62].mxu0 %vm243_vm0, %v2187_v45 }
 0xd63   :  { %v2270_v27 = vpop.f32.mrb[48].mxu0 }
 0xd64   :  { %v2336_v53 = vadd.f32 %v4966_v35, %v2270_v27  ;;  %v2272_v25 = vpop.f32.mrb[49].mxu0  ;;  %v4969_v27 = vld [vmem:[%s8904_s29 + $0x398] sm:$0xff] }
 0xd65   :  { %v2392_v44 = vadd.f32 %v7666_v50, %v2272_v25 }
 0xd66   :  { %v4982_v46 = vmul.f32 -1.442695, %v2336_v53 }
 0xd67   :  { %v2276_v33 = vpop.f32.mrb[50].mxu0 }
 0xd68   :  { %6224 = vpow2.f32 %v4982_v46  ;;  %v2337_v0 = vadd.f32 %v4968_v42, %v2276_v33  ;;  %v2278_v56 = vpop.f32.mrb[51].mxu0 }
 0xd69   :  { %v2393_v54 = vadd.f32 %v7666_v50, %v2278_v56 }
 0xd6a   :  { %v4983_v55 = vmul.f32 -1.442695, %v2337_v0 }
 0xd6b   :  { %v2282_v57 = vpop.f32.mrb[52].mxu0 }
 0xd6c   :  { %6226 = vpow2.f32 %v4983_v55  ;;  %v2338_v62 = vadd.f32 %v4970_v11, %v2282_v57  ;;  %v2284_v4 = vpop.f32.mrb[53].mxu0  ;;  %v4971_v11 = vld [vmem:[%s8904_s29 + $0x3a8] sm:$0xff] }
 0xd6d   :  { %v2394_v0 = vadd.f32 %v7666_v50, %v2284_v4  ;;  %v4973_v4 = vld [vmem:[%s8904_s29 + $0x3b8] sm:$0xff] }
 0xd6e   :  { %v4984_v34 = vmul.f32 -1.442695, %v2338_v62 }
 0xd6f   :  { %v2288_v32 = vpop.f32.mrb[54].mxu0 }
 0xd70   :  { %6228 = vpow2.f32 %v4984_v34  ;;  %v2339_v2 = vadd.f32 %v4972_v5, %v2288_v32  ;;  %v7812_v49 = vpop.f32.mrb[55].mxu0 }
 0xd71   :  { %v2395_v34 = vadd.f32 %v7666_v50, %v7812_v49  ;;  %v4975_v49 = vld [vmem:[%s8904_s29 + $0x3c8] sm:$0xff] }
 0xd72   :  { %v6225_v41 = vpop.eup %6224  ;;  %v4985_v37 = vmul.f32 -1.442695, %v2339_v2 }
 0xd73   :  { %v2368_v40 = vadd.f32 1.0, %v6225_v41  ;;  %v2294_v19 = vpop.f32.mrb[56].mxu0 }
 0xd74   :  { %6230 = vpow2.f32 %v4985_v37  ;;  %v2340_v36 = vadd.f32 %v4974_v13, %v2294_v19  ;;  %v7817_v21 = vpop.f32.mrb[57].mxu0 }
 0xd75   :  { %6232 = vrcp.f32 %v2368_v40  ;;  %v2396_v40 = vadd.f32 %v7666_v50, %v7817_v21  ;;  %v4977_v21 = vld [vmem:[%s8904_s29 + $0x3d8] sm:$0xff] }
 0xd76   :  { %v6227_v52 = vpop.eup %6226  ;;  %v4986_v58 = vmul.f32 -1.442695, %v2340_v36 }
 0xd77   :  { %v2369_v16 = vadd.f32 1.0, %v6227_v52  ;;  %v2300_v60 = vpop.f32.mrb[58].mxu0 }
 0xd78   :  { %6234 = vpow2.f32 %v4986_v58  ;;  %v2341_v10 = vadd.f32 %v4976_v1, %v2300_v60  ;;  %v7822_v15 = vpop.f32.mrb[59].mxu0 }
 0xd79   :  { %6236 = vrcp.f32 %v2369_v16  ;;  %v2397_v60 = vadd.f32 %v7666_v50, %v7822_v15  ;;  %v4979_v15 = vld [vmem:[%s8904_s29 + $0x3e8] sm:$0xff] }
 0xd7a   :  { %v6229_v28 = vpop.eup %6228  ;;  %v4987_v22 = vmul.f32 -1.442695, %v2341_v10 }
 0xd7b   :  { %v2370_v48 = vadd.f32 1.0, %v6229_v28  ;;  %v2306_v26 = vpop.f32.mrb[60].mxu0 }
 0xd7c   :  { %6238 = vpow2.f32 %v4987_v22  ;;  %v2342_v29 = vadd.f32 %v4978_v24, %v2306_v26  ;;  %v7827_v38 = vpop.f32.mrb[61].mxu0 }
 0xd7d   :  { %6240 = vrcp.f32 %v2370_v48  ;;  %v2398_v48 = vadd.f32 %v7666_v50, %v7827_v38  ;;  %v4981_v38 = vld [vmem:[%s8904_s29 + $0x3f8] sm:$0xff] }
 0xd7e   :  { %v6231_v14 = vpop.eup %6230  ;;  %v4988_v63 = vmul.f32 -1.442695, %v2342_v29 }
 0xd7f   :  { %v7830_v61 = vpop.eup %6232  ;;  %v2371_v47 = vadd.f32 1.0, %v6231_v14 }
 0xd80   :  { %v2400_v51 = vmul.f32 %v7830_v61, %v2392_v44  ;;  %6242 = vpow2.f32 %v4988_v63 }
 0xd81   :  { %6244 = vrcp.f32 %v2371_v47  ;;  %v2312_v20 = vpop.f32.mrb[62].mxu0 }
 0xd82   :  { %v6235_v43 = vpop.eup %6234  ;;  %v2408_v3 = vadd.f32 %v4967_v30, %v2400_v51  ;;  %v2343_v23 = vadd.f32 %v4980_v12, %v2312_v20  ;;  %v2314_v45 = vpop.f32.mrb[63].mxu0 }
 0xd83   :  { %v7840_v35 = vpop.eup %6236  ;;  %v2372_v53 = vadd.f32 1.0, %v6235_v43  ;;  %v2399_v63 = vadd.f32 %v7666_v50, %v2314_v45  ;;  %v2601_v50 = vld [vmem:[%s8881_s6 + $0x8] sm:$0xff]  ;;  %v2604_v43 = vld [vmem:[%s8881_s6 + $0x20] sm:$0xff]  ;;  %v2603_v45 = vld [vmem:[%s8881_s6 + $0x18] sm:$0xff] }
 0xd84   :  { %6246 = vtanh.f32 %v2408_v3  ;;  %v2401_v25 = vmul.f32 %v7840_v35, %v2393_v54  ;;  %v4989_v42 = vmul.f32 -1.442695, %v2343_v23  ;;  %v2600_v3 = vld [vmem:[%s8881_s6] sm:$0xff]  ;;  %v5695_v23 = vpack.c.bf16 %v2604_v43, %v2601_v50 }
 0xd85   :  { %6248 = vrcp.f32 %v2372_v53  ;;  %v2610_v53 = vld [vmem:[%s8881_s6 + $0x50] sm:$0xff] }
 0xd86   :  { %v6239_v46 = vpop.eup %6238  ;;  %v2409_v33 = vadd.f32 %v4969_v27, %v2401_v25  ;;  %6250 = vpow2.f32 %v4989_v42  ;;  %v2607_v27 = vld [vmem:[%s8881_s6 + $0x38] sm:$0xff]  ;;  %v5697_v25 = vpack.c.bf16 %v2603_v45, %v2600_v3  ;;  %5696 = vmatprep.subr.bf16.mxu1 %v5695_v23 }
 0xd87   :  { %v7847_v56 = vpop.eup %6240  ;;  %v2373_v55 = vadd.f32 1.0, %v6239_v46  ;;  %v5699_v42 = vpack.c.bf16 %v2610_v53, %v2607_v27  ;;  %v2606_v46 = vld [vmem:[%s8881_s6 + $0x30] sm:$0xff] }
 0xd88   :  { %6252 = vtanh.f32 %v2409_v33  ;;  %v2402_v57 = vmul.f32 %v7847_v56, %v2394_v0  ;;  %v2609_v33 = vld [vmem:[%s8881_s6 + $0x48] sm:$0xff]  ;;  %v2602_v0 = vld [vmem:[%s8881_s6 + $0x10] sm:$0xff]  ;;  %5698 = vmatpush1.bf16.msra.mxu1 %v5697_v25  ;;  %v2426_v43 = vsub.f32 1.0, %v7847_v56 }
 0xd89   :  { %6254 = vrcp.f32 %v2373_v55  ;;  %v2613_v55 = vld [vmem:[%s8881_s6 + $0x68] sm:$0xff]  ;;  %5700 = vmatprep.subr.bf16.mxu1 %v5699_v42 }
 0xd8a   :  { %v6243_v62 = vpop.eup %6242  ;;  %v2410_v5 = vadd.f32 %v4971_v11, %v2402_v57  ;;  %v2605_v11 = vld [vmem:[%s8881_s6 + $0x28] sm:$0xff]  ;;  %v2616_v57 = vld [vmem:[%s8881_s6 + $0x80] sm:$0xff] }
 0xd8b   :  { %v7855_v32 = vpop.eup %6244  ;;  %v2374_v2 = vadd.f32 1.0, %v6243_v62  ;;  %v5701_v62 = vpack.c.bf16 %v2609_v33, %v2606_v46 }
 0xd8c   :  { %6256 = vtanh.f32 %v2410_v5  ;;  %v2403_v13 = vmul.f32 %v7855_v32, %v2395_v34  ;;  %v5711_v5 = vpack.c.bf16 %v2605_v11, %v2602_v0  ;;  %v2608_v34 = vld [vmem:[%s8881_s6 + $0x40] sm:$0xff] }
 0xd8d   :  { %6258 = vrcp.f32 %v2374_v2  ;;  %v5703_v2 = vpack.c.bf16 %v2616_v57, %v2613_v55  ;;  %5702 = vmatpush1.bf16.msra.mxu1 %v5701_v62 }
 0xd8e   :  { %v6247_v41 = vpop.eup %6246  ;;  %v2411_v37 = vadd.f32 %v4973_v4, %v2403_v13  ;;  %v2611_v4 = vld [vmem:[%s8881_s6 + $0x58] sm:$0xff]  ;;  %5712 = vmatprep.subr.bf16.mxu0 %v5711_v5 }
 0xd8f   :  { %v7863_v19 = vpop.eup %6248  ;;  %2440 = vrot.lane.b32.xlu0 %v6247_v41, %s6450_s22  ;;  %v5715_v13 = vpack.c.bf16 %v2611_v4, %v2608_v34  ;;  %v2612_v41 = vld [vmem:[%s8881_s6 + $0x60] sm:$0xff]  ;;  %5714 = vmatpush3.bf16.msra.mxu0 %v5711_v5  ;;  %v8014_v4 = vld [vmem:[%s8882_s1 + $0x10] sm:$0xff] }
 0xd90   :  { %v6251_v36 = vpop.eup %6250  ;;  %6260 = vtanh.f32 %v2411_v37  ;;  %v2404_v1 = vmul.f32 %v7863_v19, %v2396_v40  ;;  %v2615_v37 = vld [vmem:[%s8881_s6 + $0x78] sm:$0xff]  ;;  %5704 = vmatprep.subr.bf16.mxu1 %v5703_v2  ;;  %v2428_v53 = vsub.f32 1.0, %v7863_v19  ;;  %v8026_v2 = vld [vmem:[%s8882_s1 + $0x8] sm:$0xff] }
 0xd91   :  { %v2375_v52 = vadd.f32 1.0, %v6251_v36  ;;  %v2619_v40 = vld [vmem:[%s8881_s6 + $0x98] sm:$0xff]  ;;  %v2614_v36 = vld [vmem:[%s8881_s6 + $0x70] sm:$0xff]  ;;  %5716 = vmatprep.subr.bf16.mxu0 %v5715_v13 }
 0xd92   :  { %v6253_v58 = vpop.eup %6252  ;;  %v2412_v16 = vadd.f32 %v4975_v49, %v2404_v1  ;;  %v2622_v49 = vld [vmem:[%s8881_s6 + $0xb0] sm:$0xff]  ;;  %v2617_v1 = vld [vmem:[%s8881_s6 + $0x88] sm:$0xff] }
 0xd93   :  { %v7872_v10 = vpop.eup %6254  ;;  %6262 = vrcp.f32 %v2375_v52  ;;  %2442 = vrot.lane.b32.xlu1 %v6253_v58, %s6450_s22  ;;  %v5705_v58 = vpack.c.bf16 %v2615_v37, %v2612_v41  ;;  %5718 = vmatpush3.bf16.msra.mxu0 %v5715_v13  ;;  %v8033_v41 = vld [vmem:[%s8882_s1 + $0x28] sm:$0xff]  ;;  %v2507_v37 = vsel %vm243_vm0, %v8026_v2, 0.0 }
 0xd94   :  { %6264 = vtanh.f32 %v2412_v16  ;;  %v2405_v24 = vmul.f32 %v7872_v10, %v2397_v60  ;;  %v5719_v16 = vpack.c.bf16 %v2617_v1, %v2614_v36  ;;  %v5707_v60 = vpack.c.bf16 %v2622_v49, %v2619_v40  ;;  %v8040_v40 = vld [vmem:[%s8882_s1 + $0x20] sm:$0xff]  ;;  %v8047_v36 = vld [vmem:[%s8882_s1 + $0x38] sm:$0xff] }
 0xd95   :  { %5706 = vmatpush1.bf16.msra.mxu1 %v5705_v58  ;;  %v2429_v46 = vsub.f32 1.0, %v7872_v10  ;;  %v2519_v49 = vsel %vm243_vm0, %v8033_v41, 0.0  ;;  %v2516_v1 = vsel %vm243_vm0, %v8040_v40, 0.0  ;;  %v2525_v58 = vsel %vm243_vm0, %v8047_v36, 0.0 }
 0xd96   :  { %v6257_v28 = vpop.eup %6256  ;;  %v2413_v22 = vadd.f32 %v4977_v21, %v2405_v24  ;;  %v2618_v21 = vld [vmem:[%s8881_s6 + $0x90] sm:$0xff]  ;;  %v2621_v24 = vld [vmem:[%s8881_s6 + $0xa8] sm:$0xff]  ;;  %5720 = vmatprep.subr.bf16.mxu0 %v5719_v16  ;;  %5708 = vmatprep.subr.bf16.mxu1 %v5707_v60 }
 0xd97   :  { %v7881_v26 = vpop.eup %6258  ;;  %2444 = vrot.lane.b32.xlu0 %v6257_v28, %s6450_s22  ;;  %v5709_v28 = vpack.c.bf16 %v2621_v24, %v2618_v21  ;;  %5722 = vmatpush3.bf16.msra.mxu0 %v5719_v16  ;;  %v8061_v16 = vld [vmem:[%s8883_s2 + $0x8] sm:$0xff]  ;;  %v8068_v21 = vld [vmem:[%s8883_s2] sm:$0xff] }
 0xd98   :  { %6266 = vtanh.f32 %v2413_v22  ;;  %v2406_v29 = vmul.f32 %v7881_v26, %v2398_v48  ;;  %v2620_v22 = vld [vmem:[%s8881_s6 + $0xa0] sm:$0xff]  ;;  %v2623_v48 = vld [vmem:[%s8881_s6 + $0xb8] sm:$0xff]  ;;  %v2430_v11 = vsub.f32 1.0, %v7881_v26  ;;  %v2555_v24 = vsel %vm243_vm0, %v8061_v16, 0.0 }
 0xd99   :  { %5710 = vmatpush1.bf16.msra.mxu1 %v5709_v28  ;;  %v8075_v28 = vld [vmem:[%s8883_s2 + $0x18] sm:$0xff] }
 0xd9a   :  { %v6261_v14 = vpop.eup %6260  ;;  %v2414_v44 = vadd.f32 %v4979_v15, %v2406_v29  ;;  %v5723_v15 = vpack.c.bf16 %v2623_v48, %v2620_v22  ;;  %v2424_v29 = vsub.f32 1.0, %v7830_v61  ;;  %v2552_v22 = vsel %vm243_vm0, %v8068_v21, 0.0  ;;  %v8082_v48 = vld [vmem:[%s8883_s2 + $0x10] sm:$0xff] }
 0xd9b   :  { %2446 = vrot.lane.b32.xlu1 %v6261_v14, %s6450_s22 }
 0xd9c   :  { %6268 = vtanh.f32 %v2414_v44  ;;  %5724 = vmatprep.subr.bf16.mxu0 %v5723_v15  ;;  %v2472_v44 = vmul.f32 %v7830_v61, %v7736_v59  ;;  %v2427_v61 = vsub.f32 1.0, %v7855_v32 }
 0xd9d   :  { %v7890_v30 = vpop.eup %6262  ;;  %5726 = vmatpush3.bf16.msra.mxu0 %v5723_v15  ;;  %v2561_v15 = vsel %vm243_vm0, %v8075_v28, 0.0 }
 0xd9e   :  { %v6265_v47 = vpop.eup %6264  ;;  %v2407_v12 = vmul.f32 %v7890_v30, %v2399_v63  ;;  %v2431_v62 = vsub.f32 1.0, %v7890_v30 }
 0xd9f   :  { %2448 = vrot.lane.b32.xlu0 %v6265_v47, %s6450_s22  ;;  %v2425_v47 = vsub.f32 1.0, %v7840_v35 }
 0xda0   :  { %v2415_v51 = vadd.f32 %v4981_v38, %v2407_v12 }
 0xda2   :  { %v6267_v20 = vpop.eup %6266  ;;  %6270 = vtanh.f32 %v2415_v51  ;;  %v2473_v51 = vmul.f32 %v7840_v35, %v7743_v8  ;;  %v2475_v8 = vmul.f32 %v7855_v32, %v7757_v18  ;;  %v2477_v18 = vmul.f32 %v7872_v10, %v7771_v17 }
 0xda3   :  { %2450 = vrot.lane.b32.xlu1 %v6267_v20, %s6450_s22  ;;  %v2479_v17 = vmul.f32 %v7890_v30, %v7781_v31  ;;  %v2510_v31 = vsel %vm243_vm0, %v8014_v4, 0.0  ;;  %v8021_v30 = vld [vmem:[%s8882_s1 + $0x18] sm:$0xff] }
 0xda4   :  { %v2513_v13 = vsel %vm243_vm0, %v8021_v30, 0.0 }
 0xda6   :  { %v6269_v54 = vpop.eup %6268 }
 0xda7   :  { %2452 = vrot.lane.b32.xlu0 %v6269_v54, %s6450_s22  ;;  %v2474_v54 = vmul.f32 %v7847_v56, %v7750_v39  ;;  %v2476_v39 = vmul.f32 %v7863_v19, %v7764_v6  ;;  %v2478_v6 = vmul.f32 %v7881_v26, %v7776_v7  ;;  %v8007_v7 = vld [vmem:[%s8882_s1] sm:$0xff] }
 0xda8   :  { %v2504_v26 = vsel %vm243_vm0, %v8007_v7, 0.0 }
 0xdac   :  { %v6271_v52 = vpop.eup %6270 }
 0xdad   :  { %2454 = vrot.lane.b32.xlu1 %v6271_v52, %s6450_s22  ;;  %v8054_v52 = vld [vmem:[%s8882_s1 + $0x30] sm:$0xff] }
 0xdae   :  { %v2522_v60 = vsel %vm243_vm0, %v8054_v52, 0.0 }
 0xe01   :  { %v2441_v14 = vpop.permute.xlu0 %2440 }
 0xe02   :  { %v2464_v63 = vmul.f32 %v2441_v14, %v2424_v29  ;;  %v8089_v29 = vld [vmem:[%s8883_s2 + $0x28] sm:$0xff]  ;;  %v2558_v14 = vsel %vm243_vm0, %v8082_v48, 0.0 }
 0xe04   :  { %v2480_v38 = vadd.f32 %v2472_v44, %v2464_v63  ;;  %v8096_v44 = vld [vmem:[%s8883_s2 + $0x20] sm:$0xff]  ;;  %v2567_v63 = vsel %vm243_vm0, %v8089_v29, 0.0 }
 0xe05   :  { %v2443_v12 = vpop.permute.xlu1 %2442 }
 0xe06   :  { %v2465_v20 = vmul.f32 %v2443_v12, %v2425_v47  ;;  %2632 = vrot.lane.b32.xlu0 %v2480_v38, %s6450_s22  ;;  %v2564_v38 = vsel %vm243_vm0, %v8096_v44, 0.0  ;;  %v8105_v47 = vld [vmem:[%s8883_s2 + $0x30] sm:$0xff] }
 0xe07   :  { %v2570_v12 = vsel %vm243_vm0, %v8105_v47, 0.0 }
 0xe08   :  { %v2481_v50 = vadd.f32 %v2473_v51, %v2465_v20  ;;  %v8112_v51 = vld [vmem:[%s8883_s2 + $0x38] sm:$0xff] }
 0xe09   :  { %v2445_v3 = vpop.permute.xlu0 %2444  ;;  %v2573_v20 = vsel %vm243_vm0, %v8112_v51, 0.0 }
 0xe0a   :  { %v2466_v23 = vmul.f32 %v2445_v3, %v2426_v43  ;;  %2634 = vrot.lane.b32.xlu1 %v2481_v50, %s6450_s22 }
 0xe0c   :  { %v2482_v59 = vadd.f32 %v2474_v54, %v2466_v23 }
 0xe0d   :  { %v2447_v45 = vpop.permute.xlu1 %2446 }
 0xe0e   :  { %v2467_v35 = vmul.f32 %v2447_v45, %v2427_v61  ;;  %2636 = vrot.lane.b32.xlu0 %v2482_v59, %s6450_s22 }
 0xe10   :  { %v2483_v27 = vadd.f32 %v2475_v8, %v2467_v35 }
 0xe11   :  { %v2449_v25 = vpop.permute.xlu0 %2448 }
 0xe12   :  { %v2468_v56 = vmul.f32 %v2449_v25, %v2428_v53  ;;  %2638 = vrot.lane.b32.xlu1 %v2483_v27, %s6450_s22 }
 0xe14   :  { %v2484_v42 = vadd.f32 %v2476_v39, %v2468_v56 }
 0xe15   :  { %v2451_v33 = vpop.permute.xlu1 %2450 }
 0xe16   :  { %v2469_v32 = vmul.f32 %v2451_v33, %v2429_v46  ;;  %2640 = vrot.lane.b32.xlu0 %v2484_v42, %s6450_s22 }
 0xe18   :  { %v2485_v0 = vadd.f32 %v2477_v18, %v2469_v32 }
 0xe19   :  { %v2453_v55 = vpop.permute.xlu0 %2452 }
 0xe1a   :  { %v2470_v19 = vmul.f32 %v2453_v55, %v2430_v11  ;;  %2642 = vrot.lane.b32.xlu1 %v2485_v0, %s6450_s22 }
 0xe1c   :  { %v2486_v57 = vadd.f32 %v2478_v6, %v2470_v19 }
 0xe1e   :  { %2644 = vrot.lane.b32.xlu0 %v2486_v57, %s6450_s22 }
 0xe1f   :  { %v2455_v5 = vpop.permute.xlu1 %2454 }
 0xe20   :  { %v2471_v10 = vmul.f32 %v2455_v5, %v2431_v62 }
 0xe22   :  { %v2487_v34 = vadd.f32 %v2479_v17, %v2471_v10 }
 0xe24   :  { %2646 = vrot.lane.b32.xlu1 %v2487_v34, %s6450_s22 }
 0xe3d   :  { %2505 = vadd.xlane.f32.xlu0 %v2504_v26 }
 0xe41   :  { %2511 = vadd.xlane.f32.xlu0 %v2510_v31 }
 0xe45   :  { %2514 = vadd.xlane.f32.xlu0 %v2513_v13 }
 0xe48   :  { %2508 = vadd.xlane.f32.xlu1 %v2507_v37 }
 0xe49   :  { %2520 = vadd.xlane.f32.xlu0 %v2519_v49 }
 0xe4c   :  { %2517 = vadd.xlane.f32.xlu1 %v2516_v1 }
 0xe4d   :  { %2526 = vadd.xlane.f32.xlu0 %v2525_v58 }
 0xe50   :  { %2523 = vadd.xlane.f32.xlu1 %v2522_v60 }
 0xe51   :  { %2556 = vadd.xlane.f32.xlu0 %v2555_v24 }
 0xe54   :  { %2553 = vadd.xlane.f32.xlu1 %v2552_v22 }
 0xe55   :  { %2562 = vadd.xlane.f32.xlu0 %v2561_v15 }
 0xe58   :  { %2559 = vadd.xlane.f32.xlu1 %v2558_v14 }
 0xe59   :  { %2568 = vadd.xlane.f32.xlu0 %v2567_v63 }
 0xe5c   :  { %2565 = vadd.xlane.f32.xlu1 %v2564_v38 }
 0xe60   :  { %2571 = vadd.xlane.f32.xlu1 %v2570_v12 }
 0xe64   :  { %2574 = vadd.xlane.f32.xlu1 %v2573_v20 }
 0xe78   :  { %v2633_v50 = vpop.permute.xlu0 %2632 }
 0xe79   :  { %4990 = vmatmul.mubr.msk.f32.vlgmr.msra.gmra.mrb[48].mxu1 %vm243_vm0, %v2633_v50  ;;  %5299 = vmatprep.mubr.msk.f32.mxu0 %vm243_vm0, %v2633_v50 }
 0xe7a   :  { %2734 = vmatprep.mubr.f32.mxu1 %v6451_v9 }
 0xe7c   :  { %v2635_v43 = vpop.permute.xlu1 %2634 }
 0xe7d   :  { %4991 = vmatmul.mubr.msk.f32.gmra.mrb[50].mxu1 %vm243_vm0, %v2635_v43  ;;  %5300 = vmatmul.mubr.msk.f32.vlgmr.msra.gmra.mrb[64].mxu0 %vm243_vm0, %v2635_v43 }
 0xe7e   :  { %2740 = vmatprep.mubr.f32.mxu1 %v6451_v9 }
 0xe80   :  { %v2637_v3 = vpop.permute.xlu0 %2636 }
 0xe81   :  { %4992 = vmatmul.mubr.msk.f32.gmra.mrb[52].mxu1 %vm243_vm0, %v2637_v3  ;;  %5302 = vmatprep.mubr.msk.f32.mxu0 %vm243_vm0, %v2637_v3 }
 0xe82   :  { %2746 = vmatprep.mubr.f32.mxu1 %v6451_v9 }
 0xe84   :  { %v2639_v54 = vpop.permute.xlu1 %2638 }
 0xe85   :  { %4993 = vmatmul.mubr.msk.f32.gmra.mrb[54].mxu1 %vm243_vm0, %v2639_v54  ;;  %5303 = vmatmul.mubr.msk.f32.gmra.mrb[66].mxu0 %vm243_vm0, %v2639_v54 }
 0xe86   :  { %2752 = vmatprep.mubr.f32.mxu1 %v6451_v9 }
 0xe88   :  { %v2641_v23 = vpop.permute.xlu0 %2640 }
 0xe89   :  { %4994 = vmatmul.mubr.msk.f32.gmra.mrb[56].mxu1 %vm243_vm0, %v2641_v23  ;;  %5305 = vmatprep.mubr.msk.f32.mxu0 %vm243_vm0, %v2641_v23 }
 0xe8a   :  { %2758 = vmatprep.mubr.f32.mxu1 %v6451_v9 }
 0xe8c   :  { %v2643_v59 = vpop.permute.xlu1 %2642 }
 0xe8d   :  { %4995 = vmatmul.mubr.msk.f32.gmra.mrb[58].mxu1 %vm243_vm0, %v2643_v59  ;;  %5306 = vmatmul.mubr.msk.f32.gmra.mrb[68].mxu0 %vm243_vm0, %v2643_v59 }
 0xe8e   :  { %2764 = vmatprep.mubr.f32.mxu1 %v6451_v9 }
 0xe90   :  { %v2645_v61 = vpop.permute.xlu0 %2644 }
 0xe91   :  { %4996 = vmatmul.mubr.msk.f32.gmra.mrb[60].mxu1 %vm243_vm0, %v2645_v61  ;;  %5308 = vmatprep.mubr.msk.f32.mxu0 %vm243_vm0, %v2645_v61 }
 0xe92   :  { %2770 = vmatprep.mubr.f32.mxu1 %v6451_v9 }
 0xe96   :  { %v2647_v45 = vpop.permute.xlu1 %2646 }
 0xe97   :  { %4997 = vmatmul.mubr.msk.f32.gmra.mrb[62].mxu1 %vm243_vm0, %v2647_v45  ;;  %5309 = vmatmul.mubr.msk.f32.gmra.mrb[70].mxu0 %vm243_vm0, %v2647_v45 }
 0xeca   :  { %v2506_v8 = vpop.xlane.xlu0 %2505 }
 0xecb   :  { %v2528_v35 = vadd.f32 1e-08, %v2506_v8 }
 0xecd   :  { %6272 = vrcp.f32 %v2528_v35 }
 0xece   :  { %v2512_v56 = vpop.xlane.xlu0 %2511 }
 0xecf   :  { %v2530_v13 = vadd.f32 1e-08, %v2512_v56 }
 0xed2   :  { %v2515_v6 = vpop.xlane.xlu0 %2514 }
 0xed3   :  { %v2531_v58 = vadd.f32 1e-08, %v2515_v6 }
 0xed5   :  { %v2509_v55 = vpop.xlane.xlu1 %2508 }
 0xed6   :  { %v2521_v37 = vpop.xlane.xlu0 %2520 }
 0xed7   :  { %v6273_v27 = vpop.eup %6272  ;;  %v2533_v12 = vadd.f32 1e-08, %v2521_v37 }
 0xed8   :  { %v2544_v53 = vmul.f32 %v6273_v27, %v8007_v7  ;;  %v2529_v7 = vadd.f32 1e-08, %v2509_v55 }
 0xed9   :  { %v2518_v26 = vpop.xlane.xlu1 %2517 }
 0xeda   :  { %5327 = vmatprep.mubr.msk.f32.mxu1 %vm243_vm0, %v2544_v53  ;;  %6274 = vrcp.f32 %v2529_v7  ;;  %v2532_v14 = vadd.f32 1e-08, %v2518_v26  ;;  %v2527_v43 = vpop.xlane.xlu0 %2526  ;;  %v3030_v26 = vld [vmem:[%s8884_s8 + $0x20] sm:$0xff] }
 0xedb   :  { %6276 = vrcp.f32 %v2530_v13  ;;  %v2535_v3 = vadd.f32 1e-08, %v2527_v43  ;;  %v3031_v13 = vld [vmem:[%s8884_s8 + $0x28] sm:$0xff] }
 0xedc   :  { %6278 = vrcp.f32 %v2531_v58  ;;  %v5751_v37 = vpack.c.bf16 %v3031_v13, %v3030_v26 }
 0xedd   :  { %v2524_v63 = vpop.xlane.xlu1 %2523  ;;  %6280 = vrcp.f32 %v2532_v14 }
 0xede   :  { %v2534_v50 = vadd.f32 1e-08, %v2524_v63  ;;  %6282 = vrcp.f32 %v2533_v12  ;;  %v3033_v12 = vld [vmem:[%s8884_s8 + $0x38] sm:$0xff] }
 0xee0   :  { %6284 = vrcp.f32 %v2534_v50 }
 0xee1   :  { %v2554_v54 = vpop.xlane.xlu1 %2553  ;;  %6286 = vrcp.f32 %v2535_v3 }
 0xee2   :  { %v2576_v23 = vadd.f32 1e-08, %v2554_v54 }
 0xee4   :  { %v6275_v59 = vpop.eup %6274  ;;  %6288 = vrcp.f32 %v2576_v23 }
 0xee5   :  { %v6277_v8 = vpop.eup %6276  ;;  %v2545_v56 = vmul.f32 %v6275_v59, %v8026_v2  ;;  %v2560_v58 = vpop.xlane.xlu1 %2559 }
 0xf4c   :  { %v2730_v25 = vpop.f32.mrb[48].mxu1 }
 0xf4d   :  { %v8141_v39 = vpop.f32.mrb[49].mxu1 }
 0xf50   :  { %v2736_v42 = vpop.f32.mrb[50].mxu1  ;;  %v8143_v46 = vpop.f32.mrb[64].mxu0 }
 0xf51   :  { %v5866_v9 = vpack.i.bf16 %v2736_v42, %v2730_v25  ;;  %v5727_v33 = vpack.c.bf16 %v2736_v42, %v2730_v25  ;;  %v8145_v18 = vpop.f32.mrb[51].mxu1  ;;  %v8147_v32 = vpop.f32.mrb[65].mxu0 }
 0xf52   :  { %v6279_v42 = vpop.eup %6278 }
 0xf53   :  { %5867 = vrot.lane.b32.xlu0 %v5866_v9, %s6450_s22  ;;  %5728 = vmatprep.subr.bf16.mxu1 %v5727_v33  ;;  %v2546_v9 = vmul.f32 %v6277_v8, %v8014_v4 }
 0xf54   :  { %v2742_v0 = vpop.f32.mrb[52].mxu1  ;;  %5730 = vmatpush3.bf16.msra.mxu1 %v5727_v33  ;;  %v6281_v33 = vpop.eup %6280 }
 0xf55   :  { %v8150_v11 = vpop.f32.mrb[53].mxu1  ;;  %v6283_v2 = vpop.eup %6282  ;;  %v2548_v55 = vmul.f32 %v6281_v33, %v8040_v40 }
 0xf56   :  { %v6285_v6 = vpop.eup %6284  ;;  %v2549_v4 = vmul.f32 %v6283_v2, %v8033_v41  ;;  %v3026_v41 = vld [vmem:[%s8884_s8] sm:$0xff] }
 0xf57   :  { %v3363_v2 = vld [vmem:[%s8885_s10] sm:$0xff] }
 0xf58   :  { %v2748_v19 = vpop.f32.mrb[54].mxu1  ;;  %v8152_v57 = vpop.f32.mrb[66].mxu0 }
 0xf59   :  { %v5871_v62 = vpack.i.bf16 %v2748_v19, %v2742_v0  ;;  %v5731_v5 = vpack.c.bf16 %v2748_v19, %v2742_v0  ;;  %v8154_v17 = vpop.f32.mrb[55].mxu1  ;;  %v8156_v10 = vpop.f32.mrb[67].mxu0  ;;  %v2547_v0 = vmul.f32 %v6279_v42, %v8021_v30  ;;  %v2550_v30 = vmul.f32 %v6285_v6, %v8054_v52  ;;  %v3027_v52 = vld [vmem:[%s8884_s8 + $0x8] sm:$0xff] }
 0xf5a   :  { %v6287_v19 = vpop.eup %6286 }
 0xf5b   :  { %5872 = vrot.lane.b32.xlu1 %v5871_v62, %s6450_s22  ;;  %5732 = vmatprep.subr.bf16.mxu1 %v5731_v5  ;;  %v6289_v62 = vpop.eup %6288  ;;  %v2551_v40 = vmul.f32 %v6287_v19, %v8047_v36  ;;  %v3028_v36 = vld [vmem:[%s8884_s8 + $0x10] sm:$0xff] }
 0xf5c   :  { %v2754_v34 = vpop.f32.mrb[56].mxu1  ;;  %5734 = vmatpush3.bf16.msra.mxu1 %v5731_v5  ;;  %v2592_v5 = vmul.f32 %v6289_v62, %v8068_v21  ;;  %v5743_v21 = vpack.c.bf16 %v3027_v52, %v3026_v41  ;;  %v3507_v41 = vld [vmem:[%s8886_s12] sm:$0xff]  ;;  %v3508_v52 = vld [vmem:[%s8886_s12 + $0x8] sm:$0xff] }
 0xf5d   :  { %v8159_v31 = vpop.f32.mrb[57].mxu1  ;;  %v5791_v26 = vpack.c.bf16 %v3508_v52, %v3507_v41  ;;  %v3803_v52 = vld [vmem:[%s8888_s14] sm:$0xff] }
 0xf5e   :  { %5744 = vmatprep.subr.bf16.mxu0 %v5743_v21 }
 0xf5f   :  { %5746 = vmatpush3.bf16.msra.mxu0 %v5743_v21 }
 0xf60   :  { %v2760_v49 = vpop.f32.mrb[58].mxu1  ;;  %v8161_v1 = vpop.f32.mrb[68].mxu0 }
 0xf61   :  { %v5876_v60 = vpack.i.bf16 %v2760_v49, %v2754_v34  ;;  %v5735_v24 = vpack.c.bf16 %v2760_v49, %v2754_v34  ;;  %v8163_v22 = vpop.f32.mrb[59].mxu1  ;;  %v8165_v15 = vpop.f32.mrb[69].mxu0  ;;  %v3029_v34 = vld [vmem:[%s8884_s8 + $0x18] sm:$0xff] }
 0xf62   :  { %v5747_v7 = vpack.c.bf16 %v3029_v34, %v3028_v36  ;;  %v2557_v49 = vpop.xlane.xlu0 %2556 }
 0xf63   :  { %5877 = vrot.lane.b32.xlu0 %v5876_v60, %s6450_s22  ;;  %5736 = vmatprep.subr.bf16.mxu1 %v5735_v24 }
 0xf64   :  { %v2766_v38 = vpop.f32.mrb[60].mxu1  ;;  %5738 = vmatpush3.bf16.msra.mxu1 %v5735_v24  ;;  %5748 = vmatprep.subr.bf16.mxu0 %v5747_v7  ;;  %v2566_v24 = vpop.xlane.xlu1 %2565 }
 0xf65   :  { %v8168_v20 = vpop.f32.mrb[61].mxu1  ;;  %5750 = vmatpush3.bf16.msra.mxu0 %v5747_v7 }
 0xf66   :  { %5752 = vmatprep.subr.bf16.mxu0 %v5751_v37  ;;  %v2563_v60 = vpop.xlane.xlu0 %2562 }
 0xf67   :  { %3210 = vrot.lane.b32.xlu0 %v8141_v39, %s6450_s22  ;;  %v2579_v19 = vadd.f32 1e-08, %v2563_v60 }
 0xf68   :  { %v2572_v63 = vpop.xlane.xlu1 %2571 }
 0xf69   :  { %5754 = vmatpush3.bf16.msra.mxu0 %v5751_v37  ;;  %v3509_v37 = vld [vmem:[%s8886_s12 + $0x10] sm:$0xff] }
 0xf6a   :  { %v2772_v61 = vpop.f32.mrb[62].mxu1  ;;  %v8172_v45 = vpop.f32.mrb[70].mxu0 }
 0xf6b   :  { %v5881_v35 = vpack.i.bf16 %v2772_v61, %v2766_v38  ;;  %v5739_v27 = vpack.c.bf16 %v2772_v61, %v2766_v38  ;;  %v8174_v53 = vpop.f32.mrb[63].mxu1  ;;  %v8176_v25 = vpop.f32.mrb[71].mxu0  ;;  %3214 = vrot.lane.b32.xlu0 %v8150_v11, %s6450_s22  ;;  %v3032_v38 = vld [vmem:[%s8884_s8 + $0x30] sm:$0xff] }
 0xf6c   :  { %v2569_v14 = vpop.xlane.xlu0 %2568  ;;  %v5755_v50 = vpack.c.bf16 %v3033_v12, %v3032_v38  ;;  %v2575_v23 = vpop.xlane.xlu1 %2574  ;;  %v3511_v38 = vld [vmem:[%s8886_s12 + $0x20] sm:$0xff]  ;;  %v3512_v12 = vld [vmem:[%s8886_s12 + $0x28] sm:$0xff] }
 0xf6d   :  { %5882 = vrot.lane.b32.xlu1 %v5881_v35, %s6450_s22  ;;  %5740 = vmatprep.subr.bf16.mxu1 %v5739_v27  ;;  %v2581_v62 = vadd.f32 1e-08, %v2569_v14  ;;  %v2583_v34 = vadd.f32 1e-08, %v2575_v23  ;;  %v3514_v23 = vld [vmem:[%s8886_s12 + $0x38] sm:$0xff] }
 0xf6e   :  { %5742 = vmatpush3.bf16.msra.mxu1 %v5739_v27  ;;  %5756 = vmatprep.subr.bf16.mxu0 %v5755_v50 }
 0xf6f   :  { %3218 = vrot.lane.b32.xlu0 %v8159_v31, %s6450_s22  ;;  %5758 = vmatpush3.bf16.msra.mxu0 %v5755_v50 }
 0xf71   :  { %3212 = vrot.lane.b32.xlu1 %v8145_v18, %s6450_s22  ;;  %5328 = vmatmul.mubr.msk.f32.vlgmr.msra.gmra.mrb[64].mxu1 %vm243_vm0, %v2545_v56  ;;  %v2577_v56 = vadd.f32 1e-08, %v2557_v49  ;;  %v3510_v49 = vld [vmem:[%s8886_s12 + $0x18] sm:$0xff] }
 0xf72   :  { %5330 = vmatprep.mubr.msk.f32.mxu1 %vm243_vm0, %v2546_v9  ;;  %v2578_v9 = vadd.f32 1e-08, %v2560_v58 }
 0xf73   :  { %3222 = vrot.lane.b32.xlu0 %v8168_v20, %s6450_s22  ;;  %6290 = vrcp.f32 %v2577_v56 }
 0xf74   :  { %6292 = vrcp.f32 %v2578_v9 }
 0xf75   :  { %3216 = vrot.lane.b32.xlu1 %v8154_v17, %s6450_s22  ;;  %5331 = vmatmul.mubr.msk.f32.gmra.mrb[66].mxu1 %vm243_vm0, %v2547_v0  ;;  %6294 = vrcp.f32 %v2579_v19 }
 0xf76   :  { %5333 = vmatprep.mubr.msk.f32.mxu1 %vm243_vm0, %v2548_v55  ;;  %v3364_v55 = vld [vmem:[%s8885_s10 + $0x8] sm:$0xff] }
 0xf77   :  { %v8239_v6 = vpack.c.bf16 %v3364_v55, %v3363_v2  ;;  %v3367_v2 = vld [vmem:[%s8885_s10 + $0x20] sm:$0xff]  ;;  %v3368_v55 = vld [vmem:[%s8885_s10 + $0x28] sm:$0xff] }
 0xf79   :  { %3220 = vrot.lane.b32.xlu1 %v8163_v22, %s6450_s22  ;;  %5334 = vmatmul.mubr.msk.f32.gmra.mrb[68].mxu1 %vm243_vm0, %v2549_v4 }
 0xf7a   :  { %5336 = vmatprep.mubr.msk.f32.mxu1 %vm243_vm0, %v2550_v30  ;;  %5776 = vmatprep.subr.bf16.mxu0 %v8239_v6  ;;  %v2580_v30 = vadd.f32 1e-08, %v2566_v24  ;;  %v5795_v24 = vpack.c.bf16 %v3510_v49, %v3509_v37 }
 0xf7c   :  { %6296 = vrcp.f32 %v2580_v30 }
 0xf7d   :  { %3224 = vrot.lane.b32.xlu1 %v8174_v53, %s6450_s22  ;;  %5337 = vmatmul.mubr.msk.f32.gmra.mrb[70].mxu1 %vm243_vm0, %v2551_v40  ;;  %v2582_v40 = vadd.f32 1e-08, %v2572_v63  ;;  %6298 = vrcp.f32 %v2581_v62  ;;  %v6291_v13 = vpop.eup %6290  ;;  %v3369_v62 = vld [vmem:[%s8885_s10 + $0x30] sm:$0xff] }
 0xf7e   :  { %5383 = vmatprep.mubr.msk.f32.mxu1 %vm243_vm0, %v2592_v5  ;;  %v6293_v58 = vpop.eup %6292  ;;  %v2593_v60 = vmul.f32 %v6291_v13, %v8061_v16 }
 0xf7f   :  { %6300 = vrcp.f32 %v2582_v40  ;;  %v6295_v14 = vpop.eup %6294  ;;  %v2594_v63 = vmul.f32 %v6293_v58, %v8082_v48 }
 0xf80   :  { %6302 = vrcp.f32 %v2583_v34  ;;  %v2595_v16 = vmul.f32 %v6295_v14, %v8075_v28 }
 0xf86   :  { %v6297_v50 = vpop.eup %6296 }
 0xf87   :  { %v2596_v48 = vmul.f32 %v6297_v50, %v8096_v44 }
 0xfc5   :  { %v5868_v43 = vpop.permute.xlu0 %5867 }
 0xfc6   :  { %v5870_v3 = vunpack.i.h.bf16 %v5868_v43  ;;  %v5869_v54 = vunpack.i.l.bf16 %v5868_v43  ;;  %v5799_v43 = vpack.c.bf16 %v3512_v12, %v3511_v38  ;;  %v3807_v38 = vld [vmem:[%s8888_s14 + $0x20] sm:$0xff]  ;;  %v3808_v12 = vld [vmem:[%s8888_s14 + $0x28] sm:$0xff] }
 0xfc8   :  { %v5759_v59 = vpack.c.bf16 %v5870_v3, %v5869_v54  ;;  %v6299_v3 = vpop.eup %6298  ;;  %v3513_v54 = vld [vmem:[%s8886_s12 + $0x30] sm:$0xff] }
 0xfc9   :  { %v2597_v28 = vmul.f32 %v6299_v3, %v8089_v29 }
 0xfca   :  { %5760 = vmatprep.subr.bf16.mxu1 %v5759_v59 }
 0xfcb   :  { %5762 = vmatpush3.bf16.msra.mxu1 %v5759_v59  ;;  %v6301_v59 = vpop.eup %6300 }
 0xfcc   :  { %v2598_v44 = vmul.f32 %v6301_v59, %v8105_v47  ;;  %v3809_v59 = vld [vmem:[%s8888_s14 + $0x30] sm:$0xff] }
 0xfcd   :  { %v5873_v61 = vpop.permute.xlu1 %5872 }
 0xfce   :  { %v5875_v8 = vunpack.i.h.bf16 %v5873_v61  ;;  %v5874_v35 = vunpack.i.l.bf16 %v5873_v61  ;;  %v5803_v61 = vpack.c.bf16 %v3514_v23, %v3513_v54 }
 0xfd0   :  { %v5763_v27 = vpack.c.bf16 %v5875_v8, %v5874_v35  ;;  %v6303_v8 = vpop.eup %6302  ;;  %v5006_v35 = vld [vmem:[%s8887_s7] ss:$0 sm:$0xff] }
 0xfd1   :  { %v8283_v56 = vadd.f32 %v5006_v35, %v8147_v32  ;;  %v8289_v29 = vadd.f32 %v8143_v46, %v5006_v35  ;;  %v8292_v47 = vadd.f32 %v5006_v35, %v8156_v10  ;;  %v8302_v32 = vadd.f32 %v5006_v35, %v8165_v15 }
 0xfd2   :  { %5764 = vmatprep.subr.bf16.mxu1 %v5763_v27  ;;  %v8309_v46 = vadd.f32 %v8161_v1, %v5006_v35  ;;  %v8312_v10 = vadd.f32 %v5006_v35, %v8176_v25  ;;  %v3365_v1 = vld [vmem:[%s8885_s10 + $0x10] sm:$0xff]  ;;  %v3366_v25 = vld [vmem:[%s8885_s10 + $0x18] sm:$0xff] }
 0xfd3   :  { %5766 = vmatpush3.bf16.msra.mxu1 %v5763_v27  ;;  %v2599_v27 = vmul.f32 %v6303_v8, %v8112_v51  ;;  %v8299_v51 = vadd.f32 %v8152_v57, %v5006_v35  ;;  %v8319_v57 = vadd.f32 %v8172_v45, %v5006_v35 }
 0xfd5   :  { %v5878_v42 = vpop.permute.xlu0 %5877 }
 0xfd6   :  { %v5880_v33 = vunpack.i.h.bf16 %v5878_v42  ;;  %v5879_v0 = vunpack.i.l.bf16 %v5878_v42 }
 0xfd8   :  { %v5767_v4 = vpack.c.bf16 %v5880_v33, %v5879_v0  ;;  %v5779_v0 = vpack.c.bf16 %v3366_v25, %v3365_v1 }
 0xfda   :  { %5768 = vmatprep.subr.bf16.mxu1 %v5767_v4 }
 0xfdb   :  { %5770 = vmatpush3.bf16.msra.mxu1 %v5767_v4 }
 0xfdf   :  { %v5883_v5 = vpop.permute.xlu1 %5882 }
 0xfe0   :  { %v5885_v36 = vunpack.i.h.bf16 %v5883_v5  ;;  %v5884_v21 = vunpack.i.l.bf16 %v5883_v5 }
 0xfe2   :  { %v5771_v7 = vpack.c.bf16 %v5885_v36, %v5884_v21  ;;  %v3804_v36 = vld [vmem:[%s8888_s14 + $0x8] sm:$0xff] }
 0xfe3   :  { %v5807_v34 = vpack.c.bf16 %v3804_v36, %v3803_v52 }
 0xfe4   :  { %5772 = vmatprep.subr.bf16.mxu1 %v5771_v7 }
 0xfe5   :  { %5774 = vmatpush3.bf16.msra.mxu1 %v5771_v7  ;;  %v3211_v7 = vpop.permute.xlu0 %3210 }
 0xfe6   :  { %5792 = vmatprep.subr.bf16.mxu1 %v5791_v26 }
 0xfe8   :  { %5384 = vmatmul.mubr.msk.f32.vlgmr.msra.gmra.mrb[72].mxu1 %vm243_vm0, %v2593_v60 }
 0xfe9   :  { %5386 = vmatprep.mubr.msk.f32.mxu1 %vm243_vm0, %v2594_v63  ;;  %5794 = vmatpush3.bf16.msra.mxu1 %v5791_v26  ;;  %v3213_v26 = vpop.permute.xlu1 %3212  ;;  %v3215_v37 = vpop.permute.xlu0 %3214 }
 0xfea   :  { %5796 = vmatprep.subr.bf16.mxu1 %v5795_v24 }
 0xfec   :  { %5387 = vmatmul.mubr.msk.f32.gmra.mrb[74].mxu1 %vm243_vm0, %v2595_v16 }
 0xfed   :  { %5389 = vmatprep.mubr.msk.f32.mxu1 %vm243_vm0, %v2596_v48  ;;  %5798 = vmatpush3.bf16.msra.mxu1 %v5795_v24  ;;  %v3217_v58 = vpop.permute.xlu1 %3216  ;;  %v5815_v48 = vpack.c.bf16 %v3808_v12, %v3807_v38 }
 0xfee   :  { %5800 = vmatprep.subr.bf16.mxu1 %v5799_v43 }
 0xff0   :  { %5390 = vmatmul.mubr.msk.f32.gmra.mrb[76].mxu1 %vm243_vm0, %v2597_v28  ;;  %v3810_v28 = vld [vmem:[%s8888_s14 + $0x38] sm:$0xff] }
 0xff1   :  { %5392 = vmatprep.mubr.msk.f32.mxu1 %vm243_vm0, %v2598_v44  ;;  %5802 = vmatpush3.bf16.msra.mxu1 %v5799_v43  ;;  %v3219_v43 = vpop.permute.xlu0 %3218  ;;  %v3221_v54 = vpop.permute.xlu1 %3220  ;;  %v5819_v35 = vpack.c.bf16 %v3810_v28, %v3809_v59 }
 0xff2   :  { %5804 = vmatprep.subr.bf16.mxu1 %v5803_v61 }
 0xff4   :  { %5393 = vmatmul.mubr.msk.f32.gmra.mrb[78].mxu1 %vm243_vm0, %v2599_v27 }
 0xff5   :  { %5806 = vmatpush3.bf16.msra.mxu1 %v5803_v61  ;;  %5439 = vmatprep.mubr.msk.f32.mxu1 %vm243_vm0, %v8283_v56  ;;  %v3225_v25 = vpop.permute.xlu1 %3224 }
 0xff8   :  { %5440 = vmatmul.mubr.msk.f32.vlgmr.msra.gmra.mrb[80].mxu1 %vm243_vm0, %v8289_v29 }
 0xff9   :  { %5442 = vmatprep.mubr.msk.f32.mxu1 %vm243_vm0, %v8292_v47 }
 0xffc   :  { %5443 = vmatmul.mubr.msk.f32.gmra.mrb[82].mxu1 %vm243_vm0, %v8299_v51 }
 0xffd   :  { %5445 = vmatprep.mubr.msk.f32.mxu1 %vm243_vm0, %v8302_v32 }
0x1000   :  { %5446 = vmatmul.mubr.msk.f32.gmra.mrb[84].mxu1 %vm243_vm0, %v8309_v46 }
0x1001   :  { %5448 = vmatprep.mubr.msk.f32.mxu1 %vm243_vm0, %v8312_v10 }
0x1004   :  { %5449 = vmatmul.mubr.msk.f32.gmra.mrb[86].mxu1 %vm243_vm0, %v8319_v57 }
0x1044   :  { %v5329_v15 = vpop.f32.mrb[64].mxu1 }
0x1045   :  { %v2993_v42 = vadd.f32 %v5329_v15, %v8145_v18  ;;  %v2987_v9 = vpop.f32.mrb[65].mxu1  ;;  %v3223_v15 = vpop.permute.xlu0 %3222 }
0x1046   :  { %v2988_v33 = vadd.f32 %v2987_v9, %v8141_v39  ;;  %v5783_v39 = vpack.c.bf16 %v3368_v55, %v3367_v2  ;;  %v8391_v9 = vld [vmem:[%s8889_s13] ss:$0 sm:$0xff] }
0x1048   :  { %v5332_v45 = vpop.f32.mrb[66].mxu1  ;;  %5355 = vmatprep.mubr.msk.f32.mxu0 %vm243_vm0, %v2988_v33 }
0x1049   :  { %v3003_v4 = vadd.f32 %v5332_v45, %v8154_v17  ;;  %v2997_v19 = vpop.f32.mrb[67].mxu1  ;;  %5356 = vmatmul.mubr.msk.f32.vlgmr.msra.gmra.mrb[72].mxu0 %vm243_vm0, %v2993_v42  ;;  %v3370_v17 = vld [vmem:[%s8885_s10 + $0x38] sm:$0xff] }
0x104a   :  { %v2998_v18 = vadd.f32 %v2997_v19, %v8150_v11  ;;  %5778 = vmatpush3.bf16.msra.mxu0 %v8239_v6  ;;  %v5787_v6 = vpack.c.bf16 %v3370_v17, %v3369_v62 }
0x104b   :  { %5780 = vmatprep.subr.bf16.mxu0 %v5779_v0 }
0x104c   :  { %v5335_v30 = vpop.f32.mrb[68].mxu1  ;;  %5358 = vmatprep.mubr.msk.f32.mxu0 %vm243_vm0, %v2998_v18 }
0x104d   :  { %v3013_v40 = vadd.f32 %v5335_v30, %v8163_v22  ;;  %v3007_v5 = vpop.f32.mrb[69].mxu1  ;;  %5359 = vmatmul.mubr.msk.f32.gmra.mrb[74].mxu0 %vm243_vm0, %v3003_v4 }
0x104e   :  { %v3008_v11 = vadd.f32 %v3007_v5, %v8159_v31  ;;  %5782 = vmatpush3.bf16.msra.mxu0 %v5779_v0 }
0x104f   :  { %5784 = vmatprep.subr.bf16.mxu0 %v5783_v39 }
0x1050   :  { %v5338_v41 = vpop.f32.mrb[70].mxu1  ;;  %5361 = vmatprep.mubr.msk.f32.mxu0 %vm243_vm0, %v3008_v11 }
0x1051   :  { %v3023_v22 = vadd.f32 %v5338_v41, %v8174_v53  ;;  %v3017_v21 = vpop.f32.mrb[71].mxu1  ;;  %5362 = vmatmul.mubr.msk.f32.gmra.mrb[76].mxu0 %vm243_vm0, %v3013_v40  ;;  %v3805_v53 = vld [vmem:[%s8888_s14 + $0x10] sm:$0xff] }
0x1052   :  { %v3018_v31 = vadd.f32 %v3017_v21, %v8168_v20  ;;  %5786 = vmatpush3.bf16.msra.mxu0 %v5783_v39  ;;  %v3806_v20 = vld [vmem:[%s8888_s14 + $0x18] sm:$0xff] }
0x1053   :  { %5788 = vmatprep.subr.bf16.mxu0 %v5787_v6  ;;  %v5811_v14 = vpack.c.bf16 %v3806_v20, %v3805_v53 }
0x1054   :  { %5364 = vmatprep.mubr.msk.f32.mxu0 %vm243_vm0, %v3018_v31 }
0x1055   :  { %5365 = vmatmul.mubr.msk.f32.gmra.mrb[78].mxu0 %vm243_vm0, %v3023_v22 }
0x1056   :  { %5790 = vmatpush3.bf16.msra.mxu0 %v5787_v6 }
0x1057   :  { %5808 = vmatprep.subr.bf16.mxu0 %v5807_v34 }
0x10bb   :  { %v5385_v13 = vpop.f32.mrb[72].mxu1 }
0x10bc   :  { %v3324_v49 = vpop.f32.mrb[73].mxu1  ;;  %v3330_v24 = vadd.f32 %v5385_v13, %v3213_v26  ;;  %v5015_v13 = vld [vmem:[%s8890_s9] ss:$0 sm:$0xff] }
0x10bd   :  { %v3325_v60 = vadd.f32 %v3324_v49, %v3211_v7 }
0x10bf   :  { %v5388_v63 = vpop.f32.mrb[74].mxu1  ;;  %5411 = vmatprep.mubr.msk.f32.mxu0 %vm243_vm0, %v3325_v60 }
0x10c0   :  { %v3334_v50 = vpop.f32.mrb[75].mxu1  ;;  %5412 = vmatmul.mubr.msk.f32.vlgmr.msra.gmra.mrb[80].mxu0 %vm243_vm0, %v3330_v24  ;;  %v3340_v3 = vadd.f32 %v5388_v63, %v3217_v58 }
0x10c1   :  { %v3335_v16 = vadd.f32 %v3334_v50, %v3215_v37  ;;  %5810 = vmatpush3.bf16.msra.mxu0 %v5807_v34 }
0x10c2   :  { %5812 = vmatprep.subr.bf16.mxu0 %v5811_v14 }
0x10c3   :  { %v5391_v23 = vpop.f32.mrb[76].mxu1  ;;  %5414 = vmatprep.mubr.msk.f32.mxu0 %vm243_vm0, %v3335_v16 }
0x10c4   :  { %v3344_v61 = vpop.f32.mrb[77].mxu1  ;;  %5415 = vmatmul.mubr.msk.f32.gmra.mrb[82].mxu0 %vm243_vm0, %v3340_v3  ;;  %v3350_v44 = vadd.f32 %v5391_v23, %v3221_v54  ;;  %v5032_v54 = vld [vmem:[%s8891_s11] ss:$0 sm:$0xff] }
0x10c5   :  { %v3345_v8 = vadd.f32 %v3344_v61, %v3219_v43  ;;  %5814 = vmatpush3.bf16.msra.mxu0 %v5811_v14 }
0x10c6   :  { %5816 = vmatprep.subr.bf16.mxu0 %v5815_v48 }
0x10c7   :  { %v5394_v27 = vpop.f32.mrb[78].mxu1  ;;  %5417 = vmatprep.mubr.msk.f32.mxu0 %vm243_vm0, %v3345_v8 }
0x10c8   :  { %v3354_v1 = vpop.f32.mrb[79].mxu1  ;;  %5418 = vmatmul.mubr.msk.f32.gmra.mrb[84].mxu0 %vm243_vm0, %v3350_v44  ;;  %v3360_v33 = vadd.f32 %v5394_v27, %v3225_v25 }
0x10c9   :  { %v3355_v42 = vadd.f32 %v3354_v1, %v3223_v15  ;;  %5818 = vmatpush3.bf16.msra.mxu0 %v5815_v48 }
0x10ca   :  { %5820 = vmatprep.subr.bf16.mxu0 %v5819_v35 }
0x10cb   :  { %5420 = vmatprep.mubr.msk.f32.mxu0 %vm243_vm0, %v3355_v42  ;;  %v5441_v0 = vpop.f32.mrb[80].mxu1 }
0x10cc   :  { %v3666_v45 = vadd.f32 %v5441_v0, %v8391_v9  ;;  %5421 = vmatmul.mubr.msk.f32.gmra.mrb[86].mxu0 %vm243_vm0, %v3360_v33  ;;  %v3660_v2 = vpop.f32.mrb[81].mxu1 }
0x10cd   :  { %v3661_v55 = vadd.f32 %v8391_v9, %v3660_v2  ;;  %5822 = vmatpush3.bf16.msra.mxu0 %v5819_v35 }
0x10cf   :  { %6304 = vtanh.f32 %v3661_v55  ;;  %v5444_v4 = vpop.f32.mrb[82].mxu1 }
0x10d0   :  { %6306 = vtanh.f32 %v3666_v45  ;;  %v3676_v19 = vadd.f32 %v5444_v4, %v8391_v9  ;;  %v3670_v18 = vpop.f32.mrb[83].mxu1 }
0x10d1   :  { %v3671_v39 = vadd.f32 %v8391_v9, %v3670_v18 }
0x10d3   :  { %6308 = vtanh.f32 %v3671_v39  ;;  %v5447_v30 = vpop.f32.mrb[84].mxu1 }
0x10d4   :  { %6310 = vtanh.f32 %v3676_v19  ;;  %v3686_v62 = vadd.f32 %v5447_v30, %v8391_v9  ;;  %v3680_v17 = vpop.f32.mrb[85].mxu1 }
0x10d5   :  { %v3681_v40 = vadd.f32 %v8391_v9, %v3680_v17 }
0x10d7   :  { %6312 = vtanh.f32 %v3681_v40  ;;  %v5450_v5 = vpop.f32.mrb[86].mxu1 }
0x10d8   :  { %6314 = vtanh.f32 %v3686_v62  ;;  %v3696_v11 = vadd.f32 %v5450_v5, %v8391_v9  ;;  %v3690_v6 = vpop.f32.mrb[87].mxu1 }
0x10d9   :  { %v6305_v41 = vpop.eup %6304  ;;  %v3691_v52 = vadd.f32 %v8391_v9, %v3690_v6 }
0x10da   :  { %v6307_v36 = vpop.eup %6306  ;;  %5491 = vmatprep.mubr.msk.f32.mxu0 %vm243_vm0, %v6305_v41 }
0x10db   :  { %6316 = vtanh.f32 %v3691_v52  ;;  %5492 = vmatmul.mubr.msk.f32.vlgmr.msra.gmra.mrb[88].mxu0 %vm243_vm0, %v6307_v36 }
0x10dc   :  { %6318 = vtanh.f32 %v3696_v11 }
0x10dd   :  { %v6309_v22 = vpop.eup %6308 }
0x10de   :  { %v6311_v21 = vpop.eup %6310  ;;  %5494 = vmatprep.mubr.msk.f32.mxu0 %vm243_vm0, %v6309_v22 }
0x10df   :  { %5495 = vmatmul.mubr.msk.f32.gmra.mrb[90].mxu0 %vm243_vm0, %v6311_v21 }
0x10e1   :  { %v6313_v31 = vpop.eup %6312 }
0x10e2   :  { %v6315_v34 = vpop.eup %6314  ;;  %5497 = vmatprep.mubr.msk.f32.mxu0 %vm243_vm0, %v6313_v31 }
0x10e3   :  { %5498 = vmatmul.mubr.msk.f32.gmra.mrb[92].mxu0 %vm243_vm0, %v6315_v34 }
0x10e5   :  { %v6317_v7 = vpop.eup %6316 }
0x10e6   :  { %v6319_v26 = vpop.eup %6318  ;;  %5500 = vmatprep.mubr.msk.f32.mxu0 %vm243_vm0, %v6317_v7 }
0x10e7   :  { %5501 = vmatmul.mubr.msk.f32.gmra.mrb[94].mxu0 %vm243_vm0, %v6319_v26 }
0x111c   :  { %v5357_v53 = vpop.f32.mrb[72].mxu0 }
0x111d   :  { %v3131_v20 = vpop.f32.mrb[73].mxu0  ;;  %v8416_v49 = vadd.f32 %v5357_v53, %v5015_v13 }
0x111e   :  { %v8414_v37 = vadd.f32 %v5015_v13, %v3131_v20 }
0x1120   :  { %v5360_v58 = vpop.f32.mrb[74].mxu0  ;;  %5451 = vmatprep.mubr.msk.f32.mxu1 %vm243_vm0, %v8414_v37 }
0x1121   :  { %v3141_v60 = vpop.f32.mrb[75].mxu0  ;;  %5452 = vmatmul.mubr.msk.f32.gmra.mrb[88].mxu1 %vm243_vm0, %v8416_v49  ;;  %v8424_v14 = vadd.f32 %v5360_v58, %v5015_v13 }
0x1122   :  { %v8422_v24 = vadd.f32 %v5015_v13, %v3141_v60 }
0x1124   :  { %v5363_v63 = vpop.f32.mrb[76].mxu0  ;;  %5454 = vmatprep.mubr.msk.f32.mxu1 %vm243_vm0, %v8422_v24 }
0x1125   :  { %v3151_v38 = vpop.f32.mrb[77].mxu0  ;;  %5455 = vmatmul.mubr.msk.f32.gmra.mrb[90].mxu1 %vm243_vm0, %v8424_v14  ;;  %v8432_v50 = vadd.f32 %v5363_v63, %v5015_v13 }
0x1126   :  { %v8430_v12 = vadd.f32 %v5015_v13, %v3151_v38 }
0x1128   :  { %v5366_v16 = vpop.f32.mrb[78].mxu0  ;;  %5457 = vmatprep.mubr.msk.f32.mxu1 %vm243_vm0, %v8430_v12 }
0x1129   :  { %v3161_v43 = vpop.f32.mrb[79].mxu0  ;;  %5458 = vmatmul.mubr.msk.f32.gmra.mrb[92].mxu1 %vm243_vm0, %v8432_v50  ;;  %v8440_v48 = vadd.f32 %v5366_v16, %v5015_v13 }
0x112a   :  { %v8438_v3 = vadd.f32 %v5015_v13, %v3161_v43 }
0x112c   :  { %5460 = vmatprep.mubr.msk.f32.mxu1 %vm243_vm0, %v8438_v3 }
0x112d   :  { %5461 = vmatmul.mubr.msk.f32.gmra.mrb[94].mxu1 %vm243_vm0, %v8440_v48 }
0x1193   :  { %v5413_v23 = vpop.f32.mrb[80].mxu0 }
0x1194   :  { %v3468_v59 = vpop.f32.mrb[81].mxu0  ;;  %v8451_v61 = vadd.f32 %v5413_v23, %v5032_v54 }
0x1195   :  { %v8449_v28 = vadd.f32 %v5032_v54, %v3468_v59 }
0x1197   :  { %v5416_v8 = vpop.f32.mrb[82].mxu0  ;;  %5463 = vmatprep.mubr.msk.f32.mxu1 %vm243_vm0, %v8449_v28 }
0x1198   :  { %v3478_v44 = vpop.f32.mrb[83].mxu0  ;;  %5464 = vmatmul.mubr.msk.f32.gmra.mrb[96].mxu1 %vm243_vm0, %v8451_v61  ;;  %v8459_v27 = vadd.f32 %v5416_v8, %v5032_v54 }
0x1199   :  { %v8457_v35 = vadd.f32 %v5032_v54, %v3478_v44 }
0x119b   :  { %v5419_v15 = vpop.f32.mrb[84].mxu0  ;;  %5466 = vmatprep.mubr.msk.f32.mxu1 %vm243_vm0, %v8457_v35 }
0x119c   :  { %v3488_v1 = vpop.f32.mrb[85].mxu0  ;;  %5467 = vmatmul.mubr.msk.f32.gmra.mrb[98].mxu1 %vm243_vm0, %v8459_v27  ;;  %v8467_v42 = vadd.f32 %v5419_v15, %v5032_v54 }
0x119d   :  { %v8465_v25 = vadd.f32 %v5032_v54, %v3488_v1 }
0x119f   :  { %v5422_v33 = vpop.f32.mrb[86].mxu0  ;;  %5469 = vmatprep.mubr.msk.f32.mxu1 %vm243_vm0, %v8465_v25 }
0x11a0   :  { %v3498_v0 = vpop.f32.mrb[87].mxu0  ;;  %5470 = vmatmul.mubr.msk.f32.gmra.mrb[100].mxu1 %vm243_vm0, %v8467_v42  ;;  %v8475_v2 = vadd.f32 %v5422_v33, %v5032_v54 }
0x11a1   :  { %v8473_v45 = vadd.f32 %v5032_v54, %v3498_v0 }
0x11a3   :  { %8907 = vst [vmem:[#allocation3_spill] sm:$0xff] %v8473_v45  ;;  %5472 = vmatprep.mubr.msk.f32.mxu1 %vm243_vm0, %v8473_v45 }
0x11a4   :  { %5473 = vmatmul.mubr.msk.f32.gmra.mrb[102].mxu1 %vm243_vm0, %v8475_v2 }
0x11ae   :  { %v8481_v55 = vpop.f32.mrb[88].mxu0 }
0x11af   :  { %v8483_v4 = vpop.f32.mrb[89].mxu0 }
0x11b2   :  { %v8485_v19 = vpop.f32.mrb[90].mxu0 }
0x11b3   :  { %v8487_v18 = vpop.f32.mrb[91].mxu0 }
0x11b6   :  { %v8489_v39 = vpop.f32.mrb[92].mxu0 }
0x11b7   :  { %v8491_v30 = vpop.f32.mrb[93].mxu0 }
0x11ba   :  { %v8493_v62 = vpop.f32.mrb[94].mxu0 }
0x11bb   :  { %v8495_v17 = vpop.f32.mrb[95].mxu0 }
0x11f4   :  { %v5453_v40 = vpop.f32.mrb[88].mxu1 }
0x11f5   :  { %v3706_v5 = vadd.f32 %v5453_v40, %v8391_v9  ;;  %v3700_v11 = vpop.f32.mrb[89].mxu1 }
0x11f6   :  { %v3701_v6 = vadd.f32 %v8391_v9, %v3700_v11 }
0x11f8   :  { %6320 = vtanh.f32 %v3701_v6  ;;  %v5456_v41 = vpop.f32.mrb[90].mxu1 }
0x11f9   :  { %6322 = vtanh.f32 %v3706_v5  ;;  %v3716_v52 = vadd.f32 %v5456_v41, %v8391_v9  ;;  %v3710_v36 = vpop.f32.mrb[91].mxu1 }
0x11fa   :  { %v3711_v22 = vadd.f32 %v8391_v9, %v3710_v36 }
0x11fc   :  { %6324 = vtanh.f32 %v3711_v22  ;;  %v5459_v21 = vpop.f32.mrb[92].mxu1 }
0x11fd   :  { %6326 = vtanh.f32 %v3716_v52  ;;  %v3726_v31 = vadd.f32 %v5459_v21, %v8391_v9  ;;  %v3720_v34 = vpop.f32.mrb[93].mxu1 }
0x11fe   :  { %v3721_v7 = vadd.f32 %v8391_v9, %v3720_v34 }
0x1200   :  { %6328 = vtanh.f32 %v3721_v7  ;;  %v5462_v26 = vpop.f32.mrb[94].mxu1 }
0x1201   :  { %6330 = vtanh.f32 %v3726_v31  ;;  %v3736_v13 = vadd.f32 %v5462_v26, %v8391_v9  ;;  %v3730_v53 = vpop.f32.mrb[95].mxu1 }
0x1202   :  { %v6321_v20 = vpop.eup %6320  ;;  %v3731_v58 = vadd.f32 %v8391_v9, %v3730_v53 }
0x1203   :  { %v6323_v60 = vpop.eup %6322  ;;  %5503 = vmatprep.mubr.msk.f32.mxu0 %vm243_vm0, %v6321_v20 }
0x1204   :  { %6332 = vtanh.f32 %v3731_v58  ;;  %5504 = vmatmul.mubr.msk.f32.gmra.mrb[96].mxu0 %vm243_vm0, %v6323_v60 }
0x1205   :  { %6334 = vtanh.f32 %v3736_v13 }
0x1206   :  { %v6325_v63 = vpop.eup %6324 }
0x1207   :  { %v6327_v38 = vpop.eup %6326  ;;  %5506 = vmatprep.mubr.msk.f32.mxu0 %vm243_vm0, %v6325_v63 }
0x1208   :  { %5507 = vmatmul.mubr.msk.f32.gmra.mrb[98].mxu0 %vm243_vm0, %v6327_v38 }
0x120a   :  { %v6329_v16 = vpop.eup %6328 }
0x120b   :  { %v6331_v43 = vpop.eup %6330  ;;  %5509 = vmatprep.mubr.msk.f32.mxu0 %vm243_vm0, %v6329_v16 }
0x120c   :  { %5510 = vmatmul.mubr.msk.f32.gmra.mrb[100].mxu0 %vm243_vm0, %v6331_v43 }
0x120e   :  { %v6333_v54 = vpop.eup %6332 }
0x120f   :  { %v6335_v23 = vpop.eup %6334  ;;  %5512 = vmatprep.mubr.msk.f32.mxu0 %vm243_vm0, %v6333_v54 }
0x1210   :  { %5513 = vmatmul.mubr.msk.f32.gmra.mrb[102].mxu0 %vm243_vm0, %v6335_v23 }
0x126b   :  { %v5465_v59 = vpop.f32.mrb[96].mxu1 }
0x126c   :  { %v3746_v8 = vadd.f32 %v5465_v59, %v8391_v9  ;;  %v3740_v44 = vpop.f32.mrb[97].mxu1 }
0x126d   :  { %v3741_v15 = vadd.f32 %v8391_v9, %v3740_v44 }
0x126f   :  { %6336 = vtanh.f32 %v3741_v15  ;;  %v5468_v1 = vpop.f32.mrb[98].mxu1 }
0x1270   :  { %6338 = vtanh.f32 %v3746_v8  ;;  %v3756_v33 = vadd.f32 %v5468_v1, %v8391_v9  ;;  %v3750_v0 = vpop.f32.mrb[99].mxu1 }
0x1271   :  { %v3751_v40 = vadd.f32 %v8391_v9, %v3750_v0 }
0x1273   :  { %6340 = vtanh.f32 %v3751_v40  ;;  %v5471_v5 = vpop.f32.mrb[100].mxu1 }
0x1274   :  { %6342 = vtanh.f32 %v3756_v33  ;;  %v3766_v11 = vadd.f32 %v5471_v5, %v8391_v9  ;;  %v3760_v6 = vpop.f32.mrb[101].mxu1  ;;  %v6452_v5 = vmov 0  }
0x1275   :  { %v3761_v41 = vadd.f32 %v8391_v9, %v3760_v6  ;;  %5887 = vset.pattern.permute.xlu0 %v6452_v5  ;;  %5886 = vset.pattern.permute.xlu1 %v6452_v5 }
0x1277   :  { %6344 = vtanh.f32 %v3761_v41  ;;  %v5474_v52 = vpop.f32.mrb[102].mxu1 }
0x1278   :  { %6346 = vtanh.f32 %v3766_v11  ;;  %v3776_v36 = vadd.f32 %v5474_v52, %v8391_v9  ;;  %v3770_v22 = vpop.f32.mrb[103].mxu1 }
0x1279   :  { %v6337_v21 = vpop.eup %6336  ;;  %v3771_v31 = vadd.f32 %v8391_v9, %v3770_v22 }
0x127a   :  { %v6339_v34 = vpop.eup %6338  ;;  %5515 = vmatprep.mubr.msk.f32.mxu0 %vm243_vm0, %v6337_v21 }
0x127b   :  { %6348 = vtanh.f32 %v3771_v31  ;;  %5516 = vmatmul.mubr.msk.f32.gmra.mrb[104].mxu0 %vm243_vm0, %v6339_v34 }
0x127c   :  { %6350 = vtanh.f32 %v3776_v36 }
0x127d   :  { %v6341_v7 = vpop.eup %6340 }
0x127e   :  { %v6343_v26 = vpop.eup %6342  ;;  %5518 = vmatprep.mubr.msk.f32.mxu0 %vm243_vm0, %v6341_v7 }
0x127f   :  { %5519 = vmatmul.mubr.msk.f32.gmra.mrb[106].mxu0 %vm243_vm0, %v6343_v26 }
0x1281   :  { %v6345_v13 = vpop.eup %6344 }
0x1282   :  { %v6347_v53 = vpop.eup %6346  ;;  %5521 = vmatprep.mubr.msk.f32.mxu0 %vm243_vm0, %v6345_v13 }
0x1283   :  { %5522 = vmatmul.mubr.msk.f32.gmra.mrb[108].mxu0 %vm243_vm0, %v6347_v53 }
0x1285   :  { %v6349_v9 = vpop.eup %6348 }
0x1286   :  { %v6351_v20 = vpop.eup %6350  ;;  %5524 = vmatprep.mubr.msk.f32.mxu0 %vm243_vm0, %v6349_v9 }
0x1287   :  { %5525 = vmatmul.mubr.msk.f32.gmra.mrb[110].mxu0 %vm243_vm0, %v6351_v20 }
0x12d7   :  { %v5505_v58 = vpop.f32.mrb[96].mxu0 }
0x12d8   :  { %v4069_v60 = vmax.f32 %v8481_v55, %v5505_v58  ;;  %v3989_v63 = vpop.f32.mrb[97].mxu0 }
0x12d9   :  { %v4068_v38 = vmax.f32 %v8483_v4, %v3989_v63 }
0x12db   :  { %v5508_v16 = vpop.f32.mrb[98].mxu0 }
0x12dc   :  { %v4071_v43 = vmax.f32 %v8485_v19, %v5508_v16  ;;  %v3999_v54 = vpop.f32.mrb[99].mxu0 }
0x12dd   :  { %v4070_v23 = vmax.f32 %v8487_v18, %v3999_v54 }
0x12df   :  { %v8533_v59 = vpop.f32.mrb[100].mxu0 }
0x12e0   :  { %v4073_v8 = vmax.f32 %v8489_v39, %v8533_v59  ;;  %v8537_v44 = vpop.f32.mrb[101].mxu0 }
0x12e1   :  { %v4072_v15 = vmax.f32 %v8491_v30, %v8537_v44 }
0x12e3   :  { %v8541_v1 = vpop.f32.mrb[102].mxu0 }
0x12e4   :  { %v8545_v0 = vpop.f32.mrb[103].mxu0 }
0x134e   :  { %v5517_v11 = vpop.f32.mrb[104].mxu0 }
0x134f   :  { %v4077_v6 = vmax.f32 %v4069_v60, %v5517_v11  ;;  %v4029_v41 = vpop.f32.mrb[105].mxu0 }
0x1350   :  { %v4076_v52 = vmax.f32 %v4068_v38, %v4029_v41 }
0x1351   :  { %v4085_v36 = vsub.f32 %v8481_v55, %v4077_v6  ;;  %v4109_v22 = vsub.f32 %v5505_v58, %v4077_v6  ;;  %v4133_v21 = vsub.f32 %v5517_v11, %v4077_v6 }
0x1352   :  { %v4084_v31 = vsub.f32 %v8483_v4, %v4076_v52  ;;  %v4108_v34 = vsub.f32 %v3989_v63, %v4076_v52  ;;  %v4132_v7 = vsub.f32 %v4029_v41, %v4076_v52  ;;  %v5520_v26 = vpop.f32.mrb[106].mxu0 }
0x1353   :  { %v4094_v13 = vmul.f32 1.442695, %v4085_v36  ;;  %v4118_v53 = vmul.f32 1.442695, %v4109_v22  ;;  %v4142_v9 = vmul.f32 1.442695, %v4133_v21  ;;  %v4079_v20 = vmax.f32 %v4071_v43, %v5520_v26 }
0x1354   :  { %v4092_v40 = vmul.f32 1.442695, %v4084_v31  ;;  %v4116_v33 = vmul.f32 1.442695, %v4108_v34  ;;  %v4039_v45 = vpop.f32.mrb[107].mxu0 }
0x1355   :  { %6352 = vpow2.f32 %v4094_v13  ;;  %v4087_v60 = vsub.f32 %v8485_v19, %v4079_v20  ;;  %v4111_v5 = vsub.f32 %v5508_v16, %v4079_v20  ;;  %v4135_v38 = vsub.f32 %v5520_v26, %v4079_v20 }
0x1356   :  { %6354 = vpow2.f32 %v4118_v53  ;;  %v4140_v55 = vmul.f32 1.442695, %v4132_v7  ;;  %v4078_v58 = vmax.f32 %v4070_v23, %v4039_v45  ;;  %v5523_v11 = vpop.f32.mrb[108].mxu0  ;;  %v8909_v53 = vmax.f32 %v8495_v17, %v8545_v0 }
0x1357   :  { %6356 = vpow2.f32 %v4142_v9  ;;  %v4098_v4 = vmul.f32 1.442695, %v4087_v60  ;;  %v4122_v63 = vmul.f32 1.442695, %v4111_v5  ;;  %v4049_v52 = vpop.f32.mrb[109].mxu0  ;;  %v4081_v22 = vmax.f32 %v4073_v8, %v5523_v11 }
0x1358   :  { %6358 = vpow2.f32 %v4092_v40  ;;  %v4086_v6 = vsub.f32 %v8487_v18, %v4078_v58  ;;  %v4110_v41 = vsub.f32 %v3999_v54, %v4078_v58  ;;  %v4134_v43 = vsub.f32 %v4039_v45, %v4078_v58 }
0x1359   :  { %6360 = vpow2.f32 %v4116_v33  ;;  %v4146_v36 = vmul.f32 1.442695, %v4135_v38  ;;  %v4080_v19 = vmax.f32 %v4072_v15, %v4049_v52  ;;  %v4089_v23 = vsub.f32 %v8489_v39, %v4081_v22 }
0x135a   :  { %6362 = vpow2.f32 %v4140_v55  ;;  %v4096_v16 = vmul.f32 1.442695, %v4086_v6  ;;  %v4120_v21 = vmul.f32 1.442695, %v4110_v41  ;;  %v4144_v31 = vmul.f32 1.442695, %v4134_v43 }
0x135b   :  { %6364 = vpow2.f32 %v4098_v4  ;;  %v4113_v34 = vsub.f32 %v8533_v59, %v4081_v22  ;;  %v4137_v7 = vsub.f32 %v5523_v11, %v4081_v22  ;;  %v5526_v40 = vpop.f32.mrb[110].mxu0  ;;  %v4088_v18 = vsub.f32 %v8491_v30, %v4080_v19 }
0x135c   :  { %6366 = vpow2.f32 %v4122_v63  ;;  %v4112_v45 = vsub.f32 %v8537_v44, %v4080_v19  ;;  %v4136_v54 = vsub.f32 %v4049_v52, %v4080_v19  ;;  %v4059_v33 = vpop.f32.mrb[111].mxu0  ;;  %v4102_v8 = vmul.f32 1.442695, %v4089_v23 }
0x135d   :  { %6368 = vpow2.f32 %v4146_v36  ;;  %v4126_v15 = vmul.f32 1.442695, %v4113_v34  ;;  %v4150_v13 = vmul.f32 1.442695, %v4137_v7  ;;  %v8908_v39 = vmax.f32 %v8493_v62, %v8541_v1 }
0x135e   :  { %6370 = vpow2.f32 %v4096_v16  ;;  %v4082_v30 = vmax.f32 %v8909_v53, %v4059_v33  ;;  %v4100_v44 = vmul.f32 1.442695, %v4088_v18  ;;  %v4124_v20 = vmul.f32 1.442695, %v4112_v45 }
0x135f   :  { %v8557_v26 = vpop.eup %6352  ;;  %6372 = vpow2.f32 %v4120_v21  ;;  %v4083_v59 = vmax.f32 %v8908_v39, %v5526_v40  ;;  %v4148_v43 = vmul.f32 1.442695, %v4136_v54 }
0x1360   :  { %v6355_v9 = vpop.eup %6354  ;;  %6374 = vpow2.f32 %v4144_v31  ;;  %v4090_v4 = vsub.f32 %v8495_v17, %v4082_v30  ;;  %v4114_v63 = vsub.f32 %v8545_v0, %v4082_v30 }
0x1361   :  { %v6357_v60 = vpop.eup %6356  ;;  %v4157_v5 = vadd.f32 %v6355_v9, %v8557_v26  ;;  %6376 = vpow2.f32 %v4102_v8  ;;  %v4091_v38 = vsub.f32 %v8493_v62, %v4083_v59  ;;  %v4115_v55 = vsub.f32 %v8541_v1, %v4083_v59 }
0x1362   :  { %v8568_v58 = vpop.eup %6358  ;;  %6378 = vpow2.f32 %v4126_v15  ;;  %v4139_v11 = vsub.f32 %v5526_v40, %v4083_v59  ;;  %v4138_v1 = vsub.f32 %v4059_v33, %v4082_v30  ;;  %v4104_v40 = vmul.f32 1.442695, %v4090_v4 }
0x1363   :  { %v6361_v6 = vpop.eup %6360  ;;  %v4165_v41 = vadd.f32 %v6357_v60, %v4157_v5  ;;  %6380 = vpow2.f32 %v4150_v13  ;;  %v4106_v62 = vmul.f32 1.442695, %v4091_v38  ;;  %v4130_v17 = vmul.f32 1.442695, %v4115_v55 }
0x1364   :  { %v6363_v52 = vpop.eup %6362  ;;  %v4156_v36 = vadd.f32 %v6361_v6, %v8568_v58  ;;  %6382 = vpow2.f32 %v4100_v44  ;;  %v4154_v23 = vmul.f32 1.442695, %v4139_v11  ;;  %v4128_v33 = vmul.f32 1.442695, %v4114_v63 }
0x1365   :  { %v8573_v22 = vpop.eup %6364  ;;  %6384 = vrcp.f32 %v4165_v41  ;;  %v4152_v13 = vmul.f32 1.442695, %v4138_v1 }
0x1366   :  { %v8575_v19 = vpop.eup %6366  ;;  %v4164_v16 = vadd.f32 %v6363_v52, %v4156_v36  ;;  %6386 = vpow2.f32 %v4124_v20 }
0x1367   :  { %v6369_v21 = vpop.eup %6368  ;;  %v4159_v0 = vadd.f32 %v8575_v19, %v8573_v22  ;;  %6388 = vpow2.f32 %v4148_v43 }
0x1368   :  { %v8579_v31 = vpop.eup %6370  ;;  %6390 = vrcp.f32 %v4164_v16 }
0x1369   :  { %v8581_v34 = vpop.eup %6372  ;;  %v4167_v7 = vadd.f32 %v6369_v21, %v4159_v0  ;;  %6392 = vpow2.f32 %v4106_v62 }
0x136a   :  { %v6375_v18 = vpop.eup %6374  ;;  %v4158_v45 = vadd.f32 %v8581_v34, %v8579_v31  ;;  %6394 = vpow2.f32 %v4130_v17 }
0x136b   :  { %v8585_v54 = vpop.eup %6376  ;;  %6396 = vrcp.f32 %v4167_v7 }
0x136c   :  { %v8587_v8 = vpop.eup %6378  ;;  %v4166_v15 = vadd.f32 %v6375_v18, %v4158_v45  ;;  %6398 = vpow2.f32 %v4154_v23 }
0x136d   :  { %v8589_v39 = vpop.eup %6380  ;;  %v4161_v59 = vadd.f32 %v8587_v8, %v8585_v54  ;;  %6400 = vpow2.f32 %v4104_v40 }
0x136e   :  { %v8593_v53 = vpop.eup %6382  ;;  %6402 = vrcp.f32 %v4166_v15 }
0x136f   :  { %v6385_v30 = vpop.eup %6384  ;;  %v4169_v44 = vadd.f32 %v8589_v39, %v4161_v59  ;;  %6404 = vpow2.f32 %v4128_v33 }
0x1370   :  { %v8596_v20 = vpop.eup %6386  ;;  %6406 = vpow2.f32 %v4152_v13  ;;  %v4189_v5 = vmul.f32 %v6385_v30, %v6355_v9  ;;  %v4181_v38 = vmul.f32 %v6385_v30, %v8557_v26  ;;  %v4197_v55 = vmul.f32 %v6385_v30, %v6357_v60 }
0x1371   :  { %v6389_v11 = vpop.eup %6388  ;;  %6408 = vrcp.f32 %v4169_v44  ;;  %v4160_v4 = vadd.f32 %v8596_v20, %v8593_v53 }
0x1372   :  { %v6391_v63 = vpop.eup %6390  ;;  %4259 = vperm.xlu0 %5887, %v4189_v5   ;;  %4727 = vst.msk [vmem:[%s8892_s18 + $0x48] sm:$0xff] %vm4709_vm1, %v4189_v5  ;;  %4211 = vperm.xlu1 %5886, %v4181_v38   ;;  %4719 = vst.msk [vmem:[%s8892_s18 + $0x8] sm:$0xff] %vm4709_vm1, %v4181_v38 }
0x1373   :  { %4735 = vst.msk [vmem:[%s8892_s18 + $0x88] sm:$0xff] %vm4709_vm1, %v4197_v55  ;;  %v6393_v26 = vpop.eup %6392  ;;  %v4168_v9 = vadd.f32 %v6389_v11, %v4160_v4  ;;  %v4188_v60 = vmul.f32 %v6391_v63, %v6361_v6  ;;  %v4196_v41 = vmul.f32 %v6391_v63, %v6363_v52  ;;  %v4180_v43 = vmul.f32 %v6391_v63, %v8568_v58 }
0x1374   :  { %v6395_v36 = vpop.eup %6394 }
0x1375   :  { %v6397_v62 = vpop.eup %6396  ;;  %6410 = vrcp.f32 %v4168_v9  ;;  %v4163_v1 = vadd.f32 %v6395_v36, %v6393_v26  ;;  %4726 = vst.msk [vmem:[%s8892_s18 + $0x40] sm:$0xff] %vm4709_vm1, %v4188_v60  ;;  %4734 = vst.msk [vmem:[%s8892_s18 + $0x80] sm:$0xff] %vm4709_vm1, %v4196_v41 }
0x1376   :  { %4718 = vst.msk [vmem:[%s8892_s18] sm:$0xff] %vm4709_vm1, %v4180_v43  ;;  %v6399_v58 = vpop.eup %6398  ;;  %4315 = vperm.xlu0 %5887, %v4197_v55   ;;  %4254 = vperm.xlu1 %5886, %v4188_v60   ;;  %v4183_v6 = vmul.f32 %v6397_v62, %v8573_v22  ;;  %v4191_v52 = vmul.f32 %v6397_v62, %v8575_v19 }
0x1377   :  { %v4199_v16 = vmul.f32 %v6397_v62, %v6369_v21  ;;  %v6401_v17 = vpop.eup %6400  ;;  %v4171_v0 = vadd.f32 %v6399_v58, %v4163_v1 }
0x1378   :  { %v6403_v23 = vpop.eup %6402  ;;  %4721 = vst.msk [vmem:[%s8892_s18 + $0x18] sm:$0xff] %vm4709_vm1, %v4183_v6  ;;  %4729 = vst.msk [vmem:[%s8892_s18 + $0x58] sm:$0xff] %vm4709_vm1, %v4191_v52 }
0x1379   :  { %4737 = vst.msk [vmem:[%s8892_s18 + $0x98] sm:$0xff] %vm4709_vm1, %v4199_v16  ;;  %v6405_v22 = vpop.eup %6404  ;;  %6412 = vrcp.f32 %v4171_v0  ;;  %v4182_v19 = vmul.f32 %v6403_v23, %v8579_v31  ;;  %v4190_v21 = vmul.f32 %v6403_v23, %v8581_v34  ;;  %v4198_v7 = vmul.f32 %v6403_v23, %v6375_v18 }
0x137a   :  { %v6407_v40 = vpop.eup %6406  ;;  %v4162_v45 = vadd.f32 %v6405_v22, %v6401_v17  ;;  %4310 = vperm.xlu1 %5886, %v4196_v41   ;;  %4206 = vperm.xlu0 %5887, %v4180_v43  }
0x137b   :  { %v6409_v33 = vpop.eup %6408  ;;  %4720 = vst.msk [vmem:[%s8892_s18 + $0x10] sm:$0xff] %vm4709_vm1, %v4182_v19  ;;  %4728 = vst.msk [vmem:[%s8892_s18 + $0x50] sm:$0xff] %vm4709_vm1, %v4190_v21 }
0x137c   :  { %4736 = vst.msk [vmem:[%s8892_s18 + $0x90] sm:$0xff] %vm4709_vm1, %v4198_v7  ;;  %v4170_v31 = vadd.f32 %v6407_v40, %v4162_v45  ;;  %v4185_v34 = vmul.f32 %v6409_v33, %v8585_v54  ;;  %v4193_v18 = vmul.f32 %v6409_v33, %v8587_v8  ;;  %v4201_v15 = vmul.f32 %v6409_v33, %v8589_v39 }
0x137e   :  { %6414 = vrcp.f32 %v4170_v31  ;;  %4221 = vperm.xlu0 %5887, %v4183_v6   ;;  %4216 = vperm.xlu1 %5886, %v4182_v19   ;;  %4723 = vst.msk [vmem:[%s8892_s18 + $0x28] sm:$0xff] %vm4709_vm1, %v4185_v34  ;;  %4731 = vst.msk [vmem:[%s8892_s18 + $0x68] sm:$0xff] %vm4709_vm1, %v4193_v18 }
0x137f   :  { %4739 = vst.msk [vmem:[%s8892_s18 + $0xa8] sm:$0xff] %vm4709_vm1, %v4201_v15  ;;  %v6411_v54 = vpop.eup %6410 }
0x1380   :  { %v4184_v8 = vmul.f32 %v6411_v54, %v8593_v53  ;;  %v4192_v13 = vmul.f32 %v6411_v54, %v8596_v20  ;;  %v4200_v39 = vmul.f32 %v6411_v54, %v6389_v11  ;;  %v4364_v11 = vld [vmem:[%s8893_s3] sm:$0xff] }
0x1381   :  { %5543 = vmatprep.mubr.msk.f32.mxu1 %vm243_vm0, %v4364_v11 }
0x1382   :  { %4269 = vperm.xlu0 %5887, %v4191_v52   ;;  %4264 = vperm.xlu1 %5886, %v4190_v21   ;;  %4722 = vst.msk [vmem:[%s8892_s18 + $0x20] sm:$0xff] %vm4709_vm1, %v4184_v8  ;;  %4730 = vst.msk [vmem:[%s8892_s18 + $0x60] sm:$0xff] %vm4709_vm1, %v4192_v13 }
0x1383   :  { %4738 = vst.msk [vmem:[%s8892_s18 + $0xa0] sm:$0xff] %vm4709_vm1, %v4200_v39  ;;  %v6413_v59 = vpop.eup %6412 }
0x1384   :  { %v4187_v53 = vmul.f32 %v6413_v59, %v6393_v26  ;;  %v4195_v30 = vmul.f32 %v6413_v59, %v6395_v36  ;;  %v4203_v44 = vmul.f32 %v6413_v59, %v6399_v58 }
0x1386   :  { %4325 = vperm.xlu0 %5887, %v4199_v16   ;;  %4320 = vperm.xlu1 %5886, %v4198_v7   ;;  %4725 = vst.msk [vmem:[%s8892_s18 + $0x38] sm:$0xff] %vm4709_vm1, %v4187_v53  ;;  %4733 = vst.msk [vmem:[%s8892_s18 + $0x78] sm:$0xff] %vm4709_vm1, %v4195_v30 }
0x1387   :  { %4741 = vst.msk [vmem:[%s8892_s18 + $0xb8] sm:$0xff] %vm4709_vm1, %v4203_v44 }
0x1388   :  { %v6415_v20 = vpop.eup %6414 }
0x1389   :  { %v4186_v5 = vmul.f32 %v6415_v20, %v6401_v17  ;;  %v4194_v38 = vmul.f32 %v6415_v20, %v6405_v22  ;;  %v4202_v55 = vmul.f32 %v6415_v20, %v6407_v40 }
0x138a   :  { %4231 = vperm.xlu0 %5887, %v4185_v34   ;;  %4226 = vperm.xlu1 %5886, %v4184_v8  }
0x138b   :  { %4724 = vst.msk [vmem:[%s8892_s18 + $0x30] sm:$0xff] %vm4709_vm1, %v4186_v5  ;;  %4732 = vst.msk [vmem:[%s8892_s18 + $0x70] sm:$0xff] %vm4709_vm1, %v4194_v38 }
0x138c   :  { %4740 = vst.msk [vmem:[%s8892_s18 + $0xb0] sm:$0xff] %vm4709_vm1, %v4202_v55 }
0x138e   :  { %4279 = vperm.xlu0 %5887, %v4193_v18   ;;  %4274 = vperm.xlu1 %5886, %v4192_v13  }
0x1392   :  { %4335 = vperm.xlu0 %5887, %v4201_v15   ;;  %4330 = vperm.xlu1 %5886, %v4200_v39  }
0x1396   :  { %4241 = vperm.xlu0 %5887, %v4187_v53   ;;  %4236 = vperm.xlu1 %5886, %v4186_v5  }
0x139a   :  { %4289 = vperm.xlu0 %5887, %v4195_v30   ;;  %4284 = vperm.xlu1 %5886, %v4194_v38  }
0x139e   :  { %4345 = vperm.xlu0 %5887, %v4203_v44   ;;  %4340 = vperm.xlu1 %5886, %v4202_v55  }
0x13f1   :  { %v4260_v4 = vpop.permute.xlu0 %4259  ;;  %v4212_v63 = vpop.permute.xlu1 %4211 }
0x13f2   :  { %v4293_v60 = vmul.f32 %v4260_v4, %v8416_v49  ;;  %v4245_v41 = vmul.f32 %v4212_v63, %v8289_v29 }
0x13f4   :  { %v4301_v6 = vadd.f32 %v4293_v60, %v4245_v41  ;;  %v8910_v41 = vld [vmem:[#allocation3_spill] sm:$0xff] }
0x13f5   :  { %v4316_v26 = vpop.permute.xlu0 %4315  ;;  %v4255_v9 = vpop.permute.xlu1 %4254 }
0x13f6   :  { %v4349_v62 = vmul.f32 %v4316_v26, %v8451_v61  ;;  %v4292_v1 = vmul.f32 %v4255_v9, %v8414_v37 }
0x13f8   :  { %v4357_v23 = vadd.f32 %v4349_v62, %v4301_v6  ;;  %v4371_v6 = vld [vmem:[%s8893_s3 + $0x38] sm:$0xff] }
0x13f9   :  { %v4311_v43 = vpop.permute.xlu1 %4310  ;;  %v4207_v36 = vpop.permute.xlu0 %4206 }
0x13fa   :  { %v4244_v58 = vmul.f32 %v4207_v36, %v8283_v56  ;;  %v4348_v52 = vmul.f32 %v4311_v43, %v8449_v28 }
0x13fc   :  { %v4300_v16 = vadd.f32 %v4292_v1, %v4244_v58  ;;  %v4370_v58 = vld [vmem:[%s8893_s3 + $0x30] sm:$0xff] }
0x13fd   :  { %v4222_v17 = vpop.permute.xlu0 %4221  ;;  %v4217_v0 = vpop.permute.xlu1 %4216 }
0x13fe   :  { %v4356_v22 = vadd.f32 %v4348_v52, %v4300_v16  ;;  %v4247_v37 = vmul.f32 %v4222_v17, %v8299_v51  ;;  %v4246_v56 = vmul.f32 %v4217_v0, %v8292_v47  ;;  %v4557_v52 = vld [vmem:[%s8894_s15] sm:$0xff]  ;;  %v4558_v16 = vld [vmem:[%s8894_s15 + $0x8] sm:$0xff] }
0x13ff   :  { %v5839_v17 = vpack.c.bf16 %v4558_v16, %v4557_v52 }
0x1400   :  { %v5823_v19 = vpack.c.bf16 %v4357_v23, %v4356_v22 }
0x1401   :  { %v4270_v49 = vpop.permute.xlu0 %4269  ;;  %v4265_v21 = vpop.permute.xlu1 %4264  ;;  %5840 = vmatprep.subr.bf16.mxu0 %v5839_v17 }
0x1402   :  { %v4295_v29 = vmul.f32 %v4270_v49, %v8424_v14  ;;  %v4294_v7 = vmul.f32 %v4265_v21, %v8422_v24  ;;  %5824 = vmatprep.subr.bf16.mxu1 %v5823_v19  ;;  %5842 = vmatpush3.bf16.msra.mxu0 %v5839_v17 }
0x1403   :  { %5826 = vmatpush3.bf16.msra.mxu1 %v5823_v19 }
0x1404   :  { %v4303_v40 = vadd.f32 %v4295_v29, %v4247_v37  ;;  %v4302_v45 = vadd.f32 %v4294_v7, %v4246_v56 }
0x1405   :  { %v4326_v61 = vpop.permute.xlu0 %4325  ;;  %v4321_v28 = vpop.permute.xlu1 %4320 }
0x1406   :  { %v4351_v33 = vmul.f32 %v4326_v61, %v8459_v27  ;;  %v4350_v31 = vmul.f32 %v4321_v28, %v8457_v35 }
0x1408   :  { %v4359_v34 = vadd.f32 %v4351_v33, %v4303_v40  ;;  %v4358_v18 = vadd.f32 %v4350_v31, %v4302_v45 }
0x1409   :  { %v4232_v15 = vpop.permute.xlu0 %4231  ;;  %v4227_v14 = vpop.permute.xlu1 %4226 }
0x140a   :  { %v5827_v54 = vpack.c.bf16 %v4359_v34, %v4358_v18  ;;  %v4249_v13 = vmul.f32 %v4232_v15, %v8309_v46  ;;  %v4248_v39 = vmul.f32 %v4227_v14, %v8302_v32 }
0x140c   :  { %5828 = vmatprep.subr.bf16.mxu1 %v5827_v54 }
0x140d   :  { %5830 = vmatpush3.bf16.msra.mxu1 %v5827_v54  ;;  %v4280_v24 = vpop.permute.xlu0 %4279  ;;  %v4275_v8 = vpop.permute.xlu1 %4274 }
0x140e   :  { %v4297_v51 = vmul.f32 %v4280_v24, %v8432_v50  ;;  %v4296_v47 = vmul.f32 %v4275_v8, %v8430_v12 }
0x1410   :  { %v4305_v35 = vadd.f32 %v4297_v51, %v4249_v13  ;;  %v4304_v53 = vadd.f32 %v4296_v47, %v4248_v39  ;;  %v4559_v47 = vld [vmem:[%s8894_s15 + $0x10] sm:$0xff]  ;;  %v4560_v13 = vld [vmem:[%s8894_s15 + $0x18] sm:$0xff] }
0x1411   :  { %v4336_v27 = vpop.permute.xlu0 %4335  ;;  %v4331_v59 = vpop.permute.xlu1 %4330  ;;  %v5843_v39 = vpack.c.bf16 %v4560_v13, %v4559_v47 }
0x1412   :  { %v4353_v30 = vmul.f32 %v4336_v27, %v8467_v42  ;;  %v4352_v44 = vmul.f32 %v4331_v59, %v8465_v25  ;;  %v4561_v27 = vld [vmem:[%s8894_s15 + $0x20] sm:$0xff]  ;;  %v4562_v59 = vld [vmem:[%s8894_s15 + $0x28] sm:$0xff] }
0x1413   :  { %5844 = vmatprep.subr.bf16.mxu0 %v5843_v39 }
0x1414   :  { %v4361_v20 = vadd.f32 %v4353_v30, %v4305_v35  ;;  %v4360_v5 = vadd.f32 %v4352_v44, %v4304_v53  ;;  %5846 = vmatpush3.bf16.msra.mxu0 %v5843_v39  ;;  %v5847_v35 = vpack.c.bf16 %v4562_v59, %v4561_v27  ;;  %v4563_v53 = vld [vmem:[%s8894_s15 + $0x30] sm:$0xff]  ;;  %v4564_v30 = vld [vmem:[%s8894_s15 + $0x38] sm:$0xff] }
0x1415   :  { %v4242_v38 = vpop.permute.xlu0 %4241  ;;  %v4237_v55 = vpop.permute.xlu1 %4236  ;;  %v5851_v44 = vpack.c.bf16 %v4564_v30, %v4563_v53 }
0x1416   :  { %v5831_v11 = vpack.c.bf16 %v4361_v20, %v4360_v5  ;;  %v4251_v4 = vmul.f32 %v4242_v38, %v8319_v57  ;;  %v4250_v63 = vmul.f32 %v4237_v55, %v8312_v10  ;;  %v4366_v10 = vld [vmem:[%s8893_s3 + $0x10] sm:$0xff]  ;;  %v4367_v57 = vld [vmem:[%s8893_s3 + $0x18] sm:$0xff]  ;;  %5848 = vmatprep.subr.bf16.mxu0 %v5847_v35  ;;  %v24_v20 = vstv %s8895_s16 }
0x1417   :  { %25 = vst [vmem:[#allocation2] sm:$0x1] %v24_v20 }
0x1418   :  { %5832 = vmatprep.subr.bf16.mxu1 %v5831_v11  ;;  %5850 = vmatpush3.bf16.msra.mxu0 %v5847_v35 }
0x1419   :  { %5834 = vmatpush3.bf16.msra.mxu1 %v5831_v11  ;;  %v4290_v12 = vpop.permute.xlu0 %4289  ;;  %v4285_v50 = vpop.permute.xlu1 %4284  ;;  %5852 = vmatprep.subr.bf16.mxu0 %v5851_v44 }
0x141a   :  { %v4299_v46 = vmul.f32 %v4290_v12, %v8440_v48  ;;  %v4298_v32 = vmul.f32 %v4285_v50, %v8438_v3  ;;  %v4365_v3 = vld [vmem:[%s8893_s3 + $0x8] sm:$0xff]  ;;  %v4368_v48 = vld [vmem:[%s8893_s3 + $0x20] sm:$0xff] }
0x141c   :  { %v4307_v25 = vadd.f32 %v4299_v46, %v4251_v4  ;;  %v4306_v9 = vadd.f32 %v4298_v32, %v4250_v63  ;;  %5854 = vmatpush3.bf16.msra.mxu0 %v5851_v44 }
0x141d   :  { %v4346_v42 = vpop.permute.xlu0 %4345  ;;  %v4341_v26 = vpop.permute.xlu1 %4340 }
0x141e   :  { %v4355_v60 = vmul.f32 %v4346_v42, %v8475_v2  ;;  %v4354_v43 = vmul.f32 %v4341_v26, %v8910_v41  ;;  %v4369_v2 = vld [vmem:[%s8893_s3 + $0x28] sm:$0xff] }
0x1420   :  { %v4363_v36 = vadd.f32 %v4355_v60, %v4307_v25  ;;  %v4362_v62 = vadd.f32 %v4354_v43, %v4306_v9 }
0x1422   :  { %v5835_v1 = vpack.c.bf16 %v4363_v36, %v4362_v62 }
0x1424   :  { %5836 = vmatprep.subr.bf16.mxu1 %v5835_v1 }
0x1425   :  { %5838 = vmatpush3.bf16.msra.mxu1 %v5835_v1 }
0x1426   :  { %5855 = vmatprep.subr.bf16.mxu1 %v5839_v17 }
0x1428   :  { %5544 = vmatmul.mubr.msk.f32.vlgmr.msra.gmra.mrb[104].mxu1 %vm243_vm0, %v4365_v3 }
0x1429   :  { %5546 = vmatprep.mubr.msk.f32.mxu1 %vm243_vm0, %v4366_v10  ;;  %5859 = vmatpush3.bf16.msra.mxu1 %v5839_v17 }
0x142a   :  { %5856 = vmatprep.subr.bf16.mxu1 %v5843_v39 }
0x142c   :  { %5547 = vmatmul.mubr.msk.f32.gmra.mrb[106].mxu1 %vm243_vm0, %v4367_v57 }
0x142d   :  { %5549 = vmatprep.mubr.msk.f32.mxu1 %vm243_vm0, %v4368_v48  ;;  %5860 = vmatpush3.bf16.msra.mxu1 %v5843_v39 }
0x142e   :  { %5857 = vmatprep.subr.bf16.mxu1 %v5847_v35 }
0x1430   :  { %5550 = vmatmul.mubr.msk.f32.gmra.mrb[108].mxu1 %vm243_vm0, %v4369_v2 }
0x1431   :  { %5552 = vmatprep.mubr.msk.f32.mxu1 %vm243_vm0, %v4370_v58  ;;  %5861 = vmatpush3.bf16.msra.mxu1 %v5847_v35 }
0x1432   :  { %5858 = vmatprep.subr.bf16.mxu1 %v5851_v44 }
0x1434   :  { %5553 = vmatmul.mubr.msk.f32.gmra.mrb[110].mxu1 %vm243_vm0, %v4371_v6 }
0x1435   :  { %5862 = vmatpush3.bf16.msra.mxu1 %v5851_v44 }
0x14fb   :  { %v8769_v0 = vpop.f32.mrb[104].mxu1 }
0x14fc   :  { %v4502_v23 = vmul.f32 %v8769_v0, %v8769_v0  ;;  %v8773_v22 = vpop.f32.mrb[105].mxu1 }
0x14fd   :  { %v4501_v19 = vmul.f32 %v8773_v22, %v8773_v22 }
0x14fe   :  { %v4512_v49 = vsel %vm243_vm0, %v4502_v23, 0.0 }
0x14ff   :  { %4513 = vadd.xlane.f32.xlu0 %v4512_v49  ;;  %v4509_v21 = vsel %vm243_vm0, %v4501_v19, 0.0  ;;  %v8779_v29 = vpop.f32.mrb[106].mxu1 }
0x1500   :  { %4510 = vadd.xlane.f32.xlu1 %v4509_v21  ;;  %v8781_v7 = vpop.f32.mrb[107].mxu1  ;;  %v4504_v15 = vmul.f32 %v8779_v29, %v8779_v29 }
0x1501   :  { %v4503_v45 = vmul.f32 %v8781_v7, %v8781_v7 }
0x1502   :  { %v4518_v8 = vsel %vm243_vm0, %v4504_v15, 0.0 }
0x1503   :  { %v8783_v37 = vpop.f32.mrb[108].mxu1  ;;  %v4515_v54 = vsel %vm243_vm0, %v4503_v45, 0.0 }
0x1504   :  { %v4506_v56 = vmul.f32 %v8783_v37, %v8783_v37  ;;  %v8787_v61 = vpop.f32.mrb[109].mxu1 }
0x1505   :  { %v4505_v28 = vmul.f32 %v8787_v61, %v8787_v61 }
0x1506   :  { %v4524_v40 = vsel %vm243_vm0, %v4506_v56, 0.0 }
0x1507   :  { %4525 = vadd.xlane.f32.xlu1 %v4524_v40  ;;  %v8794_v33 = vpop.f32.mrb[110].mxu1  ;;  %v4521_v31 = vsel %vm243_vm0, %v4505_v28, 0.0 }
0x1508   :  { %4522 = vadd.xlane.f32.xlu0 %v4521_v31  ;;  %v8797_v34 = vpop.f32.mrb[111].mxu1  ;;  %v4508_v14 = vmul.f32 %v8794_v33, %v8794_v33 }
0x1509   :  { %v4507_v18 = vmul.f32 %v8797_v34, %v8797_v34 }
0x150a   :  { %v4530_v51 = vsel %vm243_vm0, %v4508_v14, 0.0 }
0x150b   :  { %v4527_v24 = vsel %vm243_vm0, %v4507_v18, 0.0 }
0x150c   :  { %4516 = vadd.xlane.f32.xlu0 %v4515_v54  ;;  %4528 = vadd.xlane.f32.xlu1 %v4527_v24 }
0x1510   :  { %4519 = vadd.xlane.f32.xlu0 %v4518_v8  ;;  %4531 = vadd.xlane.f32.xlu1 %v4530_v51 }
0x158c   :  { %v4514_v5 = vpop.xlane.xlu0 %4513 }
0x158d   :  { %v4534_v38 = vadd.f32 1e-06, %v4514_v5  ;;  %v4511_v55 = vpop.xlane.xlu1 %4510 }
0x158e   :  { %v4533_v11 = vadd.f32 1e-06, %v4511_v55 }
0x158f   :  { %6416 = vrsqrt.f32 %v4534_v38 }
0x1590   :  { %6418 = vrsqrt.f32 %v4533_v11 }
0x1594   :  { %v4526_v12 = vpop.xlane.xlu1 %4525 }
0x1595   :  { %v4538_v50 = vadd.f32 1e-06, %v4526_v12  ;;  %v4523_v46 = vpop.xlane.xlu0 %4522 }
0x1596   :  { %v4537_v32 = vadd.f32 1e-06, %v4523_v46 }
0x1597   :  { %6420 = vrsqrt.f32 %v4538_v50 }
0x1598   :  { %6422 = vrsqrt.f32 %v4537_v32 }
0x1599   :  { %v6417_v4 = vpop.eup %6416  ;;  %v4517_v63 = vpop.xlane.xlu0 %4516 }
0x159a   :  { %v4529_v42 = vpop.xlane.xlu1 %4528  ;;  %v6419_v26 = vpop.eup %6418  ;;  %v4535_v25 = vadd.f32 1e-06, %v4517_v63  ;;  %v4550_v41 = vmul.f32 %v6417_v4, %v8769_v0 }
0x159b   :  { %v4539_v9 = vadd.f32 1e-06, %v4529_v42  ;;  %v4549_v60 = vmul.f32 %v6419_v26, %v8773_v22  ;;  %v5098_v22 = vld [vmem:[#allocation2] ss:$0 sm:$0xff] }
0x159c   :  { %6424 = vrsqrt.f32 %v4535_v25 }
0x159d   :  { %6426 = vrsqrt.f32 %v4539_v9  ;;  %5571 = vmatprep.mubr.msk.f32.mxu0 %vm243_vm0, %v4549_v60  ;;  %v4520_v43 = vpop.xlane.xlu0 %4519 }
0x159e   :  { %v4532_v36 = vpop.xlane.xlu1 %4531  ;;  %v4536_v62 = vadd.f32 1e-06, %v4520_v43  ;;  %5572 = vmatmul.mubr.msk.f32.vlgmr.msra.gmra.mrb[112].mxu0 %vm243_vm0, %v4550_v41 }
0x159f   :  { %v4540_v1 = vadd.f32 1e-06, %v4532_v36 }
0x15a0   :  { %6428 = vrsqrt.f32 %v4536_v62 }
0x15a1   :  { %v6421_v3 = vpop.eup %6420  ;;  %6430 = vrsqrt.f32 %v4540_v1 }
0x15a2   :  { %v6423_v10 = vpop.eup %6422  ;;  %v4554_v48 = vmul.f32 %v6421_v3, %v8783_v37 }
0x15a3   :  { %v4553_v57 = vmul.f32 %v6423_v10, %v8787_v61 }
0x15a5   :  { %5577 = vmatprep.mubr.msk.f32.mxu1 %vm243_vm0, %v4553_v57 }
0x15a6   :  { %v6425_v2 = vpop.eup %6424  ;;  %5578 = vmatmul.mubr.msk.f32.vlgmr.msra.gmra.mrb[112].mxu1 %vm243_vm0, %v4554_v48 }
0x15a7   :  { %v6427_v58 = vpop.eup %6426  ;;  %v4551_v6 = vmul.f32 %v6425_v2, %v8781_v7 }
0x15a8   :  { %v4555_v52 = vmul.f32 %v6427_v58, %v8797_v34 }
0x15a9   :  { %5574 = vmatprep.mubr.msk.f32.mxu0 %vm243_vm0, %v4551_v6 }
0x15aa   :  { %v6429_v16 = vpop.eup %6428  ;;  %5580 = vmatprep.mubr.msk.f32.mxu1 %vm243_vm0, %v4555_v52 }
0x15ab   :  { %v6431_v17 = vpop.eup %6430  ;;  %v4552_v0 = vmul.f32 %v6429_v16, %v8779_v29 }
0x15ac   :  { %v4556_v23 = vmul.f32 %v6431_v17, %v8794_v33 }
0x15ad   :  { %5575 = vmatmul.mubr.msk.f32.gmra.mrb[114].mxu0 %vm243_vm0, %v4552_v0 }
0x15ae   :  { %5581 = vmatmul.mubr.msk.f32.gmra.mrb[114].mxu1 %vm243_vm0, %v4556_v23 }
0x1671   :  { %v5573_v19 = vpop.f32.mrb[112].mxu0 }
0x1672   :  { %v4668_v49 = vadd.f32 %v5573_v19, %v5098_v22  ;;  %v4662_v21 = vpop.f32.mrb[113].mxu0 }
0x1673   :  { %v4663_v7 = vadd.f32 %v5098_v22, %v4662_v21 }
0x1674   :  { %6432 = vtanh.f32 %v4668_v49 }
0x1675   :  { %6434 = vtanh.f32 %v4663_v7 }
0x1679   :  { %v5579_v37 = vpop.f32.mrb[112].mxu1 }
0x167a   :  { %v4688_v56 = vadd.f32 %v5579_v37, %v5098_v22  ;;  %v4682_v61 = vpop.f32.mrb[113].mxu1 }
0x167b   :  { %v4683_v28 = vadd.f32 %v5098_v22, %v4682_v61 }
0x167c   :  { %6436 = vtanh.f32 %v4688_v56 }
0x167d   :  { %6438 = vtanh.f32 %v4683_v28 }
0x167e   :  { %v6433_v29 = vpop.eup %6432 }
0x167f   :  { %v6435_v40 = vpop.eup %6434  ;;  %4711 = vst.msk [vmem:[%s8896_s17 + $0x8] sm:$0xff] %vm4709_vm1, %v6433_v29 }
0x1680   :  { %4710 = vst.msk [vmem:[%s8896_s17] sm:$0xff] %vm4709_vm1, %v6435_v40  ;;  %v5576_v45 = vpop.f32.mrb[114].mxu0 }
0x1681   :  { %v4678_v33 = vadd.f32 %v5576_v45, %v5098_v22  ;;  %v5582_v31 = vpop.f32.mrb[114].mxu1  ;;  %v4672_v34 = vpop.f32.mrb[115].mxu0 }
0x1682   :  { %v4698_v18 = vadd.f32 %v5582_v31, %v5098_v22  ;;  %v4673_v15 = vadd.f32 %v5098_v22, %v4672_v34  ;;  %v4692_v14 = vpop.f32.mrb[115].mxu1 }
0x1683   :  { %6440 = vtanh.f32 %v4678_v33  ;;  %v4693_v54 = vadd.f32 %v5098_v22, %v4692_v14 }
0x1684   :  { %6442 = vtanh.f32 %v4698_v18 }
0x1685   :  { %6444 = vtanh.f32 %v4673_v15 }
0x1686   :  { %v6437_v24 = vpop.eup %6436  ;;  %6446 = vtanh.f32 %v4693_v54 }
0x1687   :  { %v6439_v8 = vpop.eup %6438  ;;  %4715 = vst.msk [vmem:[%s8896_s17 + $0x28] sm:$0xff] %vm4709_vm1, %v6437_v24 }
0x1688   :  { %4714 = vst.msk [vmem:[%s8896_s17 + $0x20] sm:$0xff] %vm4709_vm1, %v6439_v8 }
0x168d   :  { %v6441_v51 = vpop.eup %6440 }
0x168e   :  { %v6443_v47 = vpop.eup %6442  ;;  %4713 = vst.msk [vmem:[%s8896_s17 + $0x18] sm:$0xff] %vm4709_vm1, %v6441_v51 }
0x168f   :  { %v6445_v13 = vpop.eup %6444  ;;  %4717 = vst.msk [vmem:[%s8896_s17 + $0x38] sm:$0xff] %vm4709_vm1, %v6443_v47 }
0x1690   :  { %v6447_v39 = vpop.eup %6446  ;;  %4712 = vst.msk [vmem:[%s8896_s17 + $0x10] sm:$0xff] %vm4709_vm1, %v6445_v13 }
0x1691   :  { %4716 = vst.msk [vmem:[%s8896_s17 + $0x30] sm:$0xff] %vm4709_vm1, %v6447_v39 }

</bundles_post_ra>
